<compile_context>
chip_gen: v7x
topology: tpu7x:2x2x1
jax: 0.10.0
libtpu: 0.0.40
codegen_flags: <defaults>
</compile_context>

<pallas_src>
import numpy as np

import jax
import jax.numpy as jnp
from jax.experimental import pallas as pl
from jax.experimental.pallas import tpu as pltpu


# ----------------------------------------------------------------------------
# Kernel 1: conv1(3x3, pad=1) + bias + ReLU + 2x2 maxpool for all images.
# One matmul over phase-concatenated patches; pooling = maxes over lane slices.
# ----------------------------------------------------------------------------
def conv1_kernel(p_ref, w_ref, b_ref, o_ref):
    # p_ref: (K, 4*M) bf16   lane = phase*M + n*Hp*Wp + i*Wp + j
    # w_ref: (Cmid, K) bf16 ; b_ref: (Cmid, 1) f32 ; o_ref: (Cmid, M) bf16
    M = o_ref.shape[1]
    z = jnp.dot(w_ref[...], p_ref[...], preferred_element_type=jnp.float32)
    m = jnp.maximum(jnp.maximum(z[:, 0 * M:1 * M], z[:, 1 * M:2 * M]),
                    jnp.maximum(z[:, 2 * M:3 * M], z[:, 3 * M:4 * M]))
    # bias is phase-invariant and relu is monotone, so bias+relu after the max
    # equals PyTorch conv -> relu -> maxpool.
    o_ref[...] = jnp.maximum(m + b_ref[...], 0.0).astype(o_ref.dtype)


def conv1_call(p1, w, b):
    K, M4 = p1.shape
    M = M4 // 4
    Cmid = w.shape[0]
    vmem = pl.BlockSpec(memory_space=pltpu.MemorySpace.VMEM)
    return pl.pallas_call(
        conv1_kernel,
        out_shape=jax.ShapeDtypeStruct((Cmid, M), jnp.bfloat16),
        in_specs=[vmem, vmem, vmem],
        out_specs=vmem,
    )(p1, w, b)


# ----------------------------------------------------------------------------
# Kernel 2: conv2 + bias + ReLU + pool + flatten + 2-layer LSTM + FC + sigmoid
# ----------------------------------------------------------------------------
def conv2_lstm_kernel(p2_ref, w2e_ref, b2e_ref, pad_ref,
                      w0i_ref, w0h_ref, b0_ref, w1_ref, b1_ref,
                      fcw_ref, fcb_ref, o_ref):
    # p2_ref : (4*T*B, K2*S) bf16  rows = phase*(T*B) + t*B + b (time-major)
    # w2e_ref: (K2*S, Cfin*S) bf16 expanded conv2 weight
    # b2e_ref: (1, Cfin*S) f32     conv2 bias broadcast over spatial cells
    # pad_ref: (T*BP, T*B) bf16    one-hot batch-pad/permutation (BP = 8)
    # w0i/w0h/b0: layer-0 fused-gate weights; w1/b1: layer-1 with [wih1; whh1]
    # fcw: (1, H) f32 ; fcb: (1, 1) f32 ; o_ref: (B, 1) f32
    B = o_ref.shape[0]
    TB = pad_ref.shape[1]
    T = TB // B
    TBP = pad_ref.shape[0]
    BP = TBP // T
    H = w0h_ref.shape[0]

    # ---- conv2 + bias + relu + 2x2 maxpool (phases are sublane blocks) ----
    z = jnp.dot(p2_ref[...], w2e_ref[...],
                preferred_element_type=jnp.float32)            # (4*TB, Cfin*S)
    x = jnp.maximum(jnp.maximum(z[0 * TB:1 * TB], z[1 * TB:2 * TB]),
                    jnp.maximum(z[2 * TB:3 * TB], z[3 * TB:4 * TB]))
    x = jnp.maximum(x + b2e_ref[...], 0.0)                     # (TB, F) f32
    # rows are already (t, b) time-major and columns are the PyTorch
    # (C, h, w) flatten order -> no regroup transpose needed.

    # ---- pad batch B -> BP=8 rows (sublane granule) via tiny one-hot matmul
    xp = jnp.dot(pad_ref[...], x.astype(jnp.bfloat16),
                 preferred_element_type=jnp.float32)           # (T*BP, F)

    # ---- hoisted layer-0 input projection for all T timesteps -------------
    xproj = jnp.dot(xp.astype(jnp.bfloat16), w0i_ref[...],
                    preferred_element_type=jnp.float32) + b0_ref[...]  # (T*BP, 4H)

    # hoisted weight loads (reused across the unrolled recurrence)
    w0h = w0h_ref[...]
    w1 = w1_ref[...]
    b1 = b1_ref[...]

    def gates(g, c):
        # 2 full-block transcendentals + 1 tanh(c_new): 3 EUP passes per step.
        sg = jax.nn.sigmoid(g)                                 # (BP, 4H)
        tg = jnp.tanh(g)                                       # (BP, 4H)
        i = sg[:, 0 * H:1 * H]
        f = sg[:, 1 * H:2 * H]
        o = sg[:, 3 * H:4 * H]
        gg = tg[:, 2 * H:3 * H]
        c_new = f * c + i * gg
        h_new = o * jnp.tanh(c_new)
        return h_new, c_new

    zst = jnp.zeros((BP, H), jnp.float32)
    h0, c0, h1, c1 = zst, zst, zst, zst
    for t in range(T):                                         # static unroll
        g0 = xproj[t * BP:(t + 1) * BP, :] + jnp.dot(
            h0.astype(jnp.bfloat16), w0h, preferred_element_type=jnp.float32)
        h0, c0 = gates(g0, c0)
        # layer-1: single fused matmul with [wih1; whh1] stacked on rows.
        hcat = jnp.concatenate([h0, h1], axis=1).astype(jnp.bfloat16)  # (BP, 2H)
        g1 = jnp.dot(hcat, w1, preferred_element_type=jnp.float32) + b1
        h1, c1 = gates(g1, c1)

    # ---- FC (VPU multiply + lane reduce, no MXU pass) + sigmoid ------------
    logits = jnp.sum(h1 * fcw_ref[...], axis=1, keepdims=True) + fcb_ref[...]
    o_ref[...] = jax.nn.sigmoid(logits[0:B, :])


def conv2_lstm_call(p2, pad, params, B):
    vmem = pl.BlockSpec(memory_space=pltpu.MemorySpace.VMEM)
    args = (p2, params["conv2_wexp"], params["conv2_bexp"], pad,
            params["lstm0_wih"], params["lstm0_whh"], params["lstm0_b"],
            params["lstm1_w"], params["lstm1_b"],
            params["fc_w"], params["fc_b"])
    return pl.pallas_call(
        conv2_lstm_kernel,
        out_shape=jax.ShapeDtypeStruct((B, 1), jnp.float32),
        in_specs=[vmem] * len(args),
        out_specs=vmem,
    )(*args)


# ----------------------------------------------------------------------------
# XLA layout glue (im2col patch building; cast to bf16 as early as possible)
# ----------------------------------------------------------------------------
def build_conv1_patches(x):
    """x (B,T,C,H,W) f32 -> (9C, 4*N*Hp*Wp) bf16 phase-concatenated patches."""
    B, T, C, H, W = x.shape
    N = B * T
    imgs = x.reshape(N, C, H, W).astype(jnp.bfloat16)          # cast early
    imgs = imgs.transpose(0, 2, 3, 1)                          # NHWC
    xp = jnp.pad(imgs, ((0, 0), (1, 1), (1, 1), (0, 0)))
    patches = jnp.concatenate(
        [xp[:, dy:dy + H, dx:dx + W, :] for dy in range(3) for dx in range(3)],
        axis=-1)                                               # (N,H,W,9C)
    K = 9 * C
    Hp, Wp = H // 2, W // 2
    p = patches.reshape(N, Hp, 2, Wp, 2, K)                    # n,i,a,j,b,k
    p = p.transpose(5, 2, 4, 0, 1, 3)                          # k,a,b,n,i,j
    return p.reshape(K, 4 * N * Hp * Wp)


def build_conv2_patches(y1, B, T, H1, W1, Cmid):
    """y1 (Cmid, N*H1*W1) bf16 -> (4*T*B, 9*Cmid*Hp*Wp) bf16 patches.

    Rows: phase*(T*B) + t*B + b (time-major batch, matching the LSTM).
    Cols: k*(Hp*Wp) + ip*Wp + jp with k = (dy*3+dx)*Cmid + cm, matching the
    expanded conv2 weight's row order.
    """
    y = y1.reshape(Cmid, B, T, H1, W1).transpose(1, 2, 3, 4, 0)  # (B,T,H1,W1,Cmid)
    yp = jnp.pad(y, ((0, 0), (0, 0), (1, 1), (1, 1), (0, 0)))
    patches = jnp.concatenate(
        [yp[:, :, dy:dy + H1, dx:dx + W1, :]
         for dy in range(3) for dx in range(3)], axis=-1)        # (B,T,H1,W1,9Cmid)
    K2 = 9 * Cmid
    Hp, Wp = H1 // 2, W1 // 2
    p = patches.reshape(B, T, Hp, 2, Wp, 2, K2)                  # b,t,ip,a,jp,bb,k
    p = p.transpose(3, 5, 1, 0, 6, 2, 4)                         # a,bb,t,b,k,ip,jp
    return p.reshape(4 * T * B, K2 * Hp * Wp)


def make_batch_pad(T, B):
    """One-hot (T*BP, T*B) matrix mapping row t*B+b -> row t*BP+b (BP=8-pad)."""
    BP = ((B + 7) // 8) * 8
    m = np.zeros((T * BP, T * B), np.float32)
    for t in range(T):
        m[t * BP:t * BP + B, t * B:t * B + B] = np.eye(B)
    return jnp.asarray(m, dtype=jnp.bfloat16)


# ----------------------------------------------------------------------------
# Full forward pass (mirrors ConvLSTMClassifier.forward)
# ----------------------------------------------------------------------------
def conv_lstm_classifier_forward(x, params):
    B, T, C, H, W = x.shape
    Cmid = params["conv1_w"].shape[0]
    H1, W1 = H // 2, W // 2

    # stage 1: conv1 + relu + pool1 (one gridless pallas_call)
    p1 = build_conv1_patches(x)
    y1 = conv1_call(p1, params["conv1_w"], params["conv1_b"])   # (Cmid, N*H1*W1)

    # stage 2: conv2 + relu + pool2 + flatten + LSTM + FC + sigmoid (fused)
    p2 = build_conv2_patches(y1, B, T, H1, W1, Cmid)
    pad = make_batch_pad(T, B)                                  # trace-time const
    probs = conv2_lstm_call(p2, pad, params, B)                 # (B, 1)
    return probs[:, 0]                                          # torch.flatten


def init_params(key, in_ch, filters_mid, filters_final, input_size, hidden):
    ks = jax.random.split(key, 12)
    s = 0.1
    n = lambda k, shape: s * jax.random.normal(k, shape, jnp.float32)
    bf = lambda a: a.astype(jnp.bfloat16)
    S2 = (input_size // 4) ** 2                 # pooled cells after conv2 (=16)
    feat = filters_final * S2                   # LSTM input features (=64)

    # conv weights in (Cout, 9*Cin) layout, feature order (dy, dx, cin).
    # (torch: conv.weight.permute(0, 2, 3, 1).reshape(Cout, 9*Cin))
    conv2_w = n(ks[2], (filters_final, 9 * filters_mid))
    conv2_b = n(ks[3], (filters_final,))
    # Expanded conv2 weight: W2exp[(k,s'),(c,s)] = W2[c,k] * [s'==s], so the
    # conv matmul directly emits (image, c*S2+s) feature rows in PyTorch
    # flatten order (147 KB bf16 -- negligible vs. the glue it removes).
    eye = jnp.eye(S2, dtype=jnp.float32)
    w2exp = (conv2_w.T[:, None, :, None] * eye[None, :, None, :]).reshape(
        9 * filters_mid * S2, filters_final * S2)
    b2exp = jnp.repeat(conv2_b, S2)[None, :]

    return dict(
        conv1_w=bf(n(ks[0], (filters_mid, 9 * in_ch))),
        conv1_b=n(ks[1], (filters_mid, 1)),
        conv2_wexp=bf(w2exp),
        conv2_bexp=b2exp,
        # fused-gate LSTM weights (in, 4H); gate order [i,f,g,o]; b = b_ih+b_hh
        lstm0_wih=bf(n(ks[4], (feat, 4 * hidden))),
        lstm0_whh=bf(n(ks[5], (hidden, 4 * hidden))),
        lstm0_b=n(ks[6], (1, 4 * hidden)),
        # layer-1 [wih1; whh1] stacked on rows -> one recurrent matmul per step
        lstm1_w=bf(jnp.concatenate([n(ks[7], (hidden, 4 * hidden)),
                                    n(ks[8], (hidden, 4 * hidden))], axis=0)),
        lstm1_b=n(ks[9], (1, 4 * hidden)),
        fc_w=n(ks[10], (1, hidden)),
        fc_b=n(ks[11], (1, 1)),
    )


if __name__ == "__main__":
    # Small shapes consistent with the module: sequence_length=8, input_size=16,
    # input_channels=4, filters_mid=8, filters_final=4, lstm_hidden=32,
    # lstm_n_layers=2, batch=2.
    BATCH, SEQ, IN_CH, IMG = 2, 8, 4, 16
    F_MID, F_FIN, HIDDEN = 8, 4, 32

    key = jax.random.PRNGKey(0)
    kx, kp = jax.random.split(key)
    x = jax.random.normal(kx, (BATCH, SEQ, IN_CH, IMG, IMG), jnp.float32)
    params = init_params(kp, IN_CH, F_MID, F_FIN, IMG, HIDDEN)

    fwd = jax.jit(conv_lstm_classifier_forward)
    out = fwd(x, params)
    jax.block_until_ready(out)
    assert out.shape == (BATCH,), out.shape
    assert bool(jnp.all(jnp.isfinite(out)))
    print("KERNEL_OK")
</pallas_src>

<mosaic_0001>
module attributes {stable_mosaic.version = 11 : i64} {
  func.func @conv1_kernel(%arg0: memref<36x4096xbf16, #tpu.memory_space<vmem>>, %arg1: memref<8x36xbf16, #tpu.memory_space<vmem>>, %arg2: memref<8x1xf32, #tpu.memory_space<vmem>>, %arg3: memref<8x1024xbf16, #tpu.memory_space<vmem>>) attributes {dimension_semantics = [], scalar_prefetch = 0 : i64, scratch_operands = 0 : i64, tpu.core_type = #tpu.core_type<tc>} {
    %c0 = arith.constant 0 : index
    %c0_0 = arith.constant 0 : index
    %0 = vector.load %arg1[%c0, %c0_0] : memref<8x36xbf16, #tpu.memory_space<vmem>>, vector<8x36xbf16>
    %c0_1 = arith.constant 0 : index
    %c0_2 = arith.constant 0 : index
    %1 = vector.load %arg0[%c0_1, %c0_2] : memref<36x4096xbf16, #tpu.memory_space<vmem>>, vector<36x4096xbf16>
    %cst = arith.constant dense<0.000000e+00> : vector<8x4096xf32>
    %2 = tpu.matmul %0, %1, %cst {dimension_numbers = #tpu.dot_dimension_numbers<[1], [0], [0], [1], [0, 0, 1, 1], [], []>} : vector<8x36xbf16>, vector<36x4096xbf16>, vector<8x4096xf32> -> vector<8x4096xf32>
    %3 = vector.extract_strided_slice %2 {offsets = [0, 0], sizes = [8, 1024], strides = [1, 1]} : vector<8x4096xf32> to vector<8x1024xf32>
    %4 = vector.extract_strided_slice %2 {offsets = [0, 1024], sizes = [8, 1024], strides = [1, 1]} : vector<8x4096xf32> to vector<8x1024xf32>
    %5 = arith.maximumf %3, %4 : vector<8x1024xf32>
    %6 = vector.extract_strided_slice %2 {offsets = [0, 2048], sizes = [8, 1024], strides = [1, 1]} : vector<8x4096xf32> to vector<8x1024xf32>
    %7 = vector.extract_strided_slice %2 {offsets = [0, 3072], sizes = [8, 1024], strides = [1, 1]} : vector<8x4096xf32> to vector<8x1024xf32>
    %8 = arith.maximumf %6, %7 : vector<8x1024xf32>
    %9 = arith.maximumf %5, %8 : vector<8x1024xf32>
    %c0_3 = arith.constant 0 : index
    %c0_4 = arith.constant 0 : index
    %10 = vector.load %arg2[%c0_3, %c0_4] : memref<8x1xf32, #tpu.memory_space<vmem>>, vector<8x1xf32>
    %11 = vector.broadcast %10 : vector<8x1xf32> to vector<8x1024xf32>
    %12 = arith.addf %9, %11 : vector<8x1024xf32>
    %cst_5 = arith.constant 0.000000e+00 : f32
    %13 = vector.broadcast %cst_5 : f32 to vector<8x1024xf32>
    %14 = arith.maximumf %12, %13 : vector<8x1024xf32>
    %15 = arith.truncf %14 : vector<8x1024xf32> to vector<8x1024xbf16>
    %c0_6 = arith.constant 0 : index
    %c0_7 = arith.constant 0 : index
    %16 = vector.load %arg3[%c0_6, %c0_7] : memref<8x1024xbf16, #tpu.memory_space<vmem>>, vector<8x1024xbf16>
    tpu.vector_store %arg3[%c0_6, %c0_7], %15 {strides = array<i32>} : memref<8x1024xbf16, #tpu.memory_space<vmem>>, vector<8x1024xbf16>,
    return
  }
}

module attributes {stable_mosaic.version = 11 : i64} {
  func.func @conv2_lstm_kernel(%arg0: memref<64x1152xbf16, #tpu.memory_space<vmem>>, %arg1: memref<1152x64xbf16, #tpu.memory_space<vmem>>, %arg2: memref<1x64xf32, #tpu.memory_space<vmem>>, %arg3: memref<64x16xbf16, #tpu.memory_space<vmem>>, %arg4: memref<64x128xbf16, #tpu.memory_space<vmem>>, %arg5: memref<32x128xbf16, #tpu.memory_space<vmem>>, %arg6: memref<1x128xf32, #tpu.memory_space<vmem>>, %arg7: memref<64x128xbf16, #tpu.memory_space<vmem>>, %arg8: memref<1x128xf32, #tpu.memory_space<vmem>>, %arg9: memref<1x32xf32, #tpu.memory_space<vmem>>, %arg10: memref<1x1xf32, #tpu.memory_space<vmem>>, %arg11: memref<2x1xf32, #tpu.memory_space<vmem>>) attributes {dimension_semantics = [], scalar_prefetch = 0 : i64, scratch_operands = 0 : i64, tpu.core_type = #tpu.core_type<tc>} {
    %c0 = arith.constant 0 : index
    %c0_0 = arith.constant 0 : index
    %0 = vector.load %arg0[%c0, %c0_0] : memref<64x1152xbf16, #tpu.memory_space<vmem>>, vector<64x1152xbf16>
    %c0_1 = arith.constant 0 : index
    %c0_2 = arith.constant 0 : index
    %1 = vector.load %arg1[%c0_1, %c0_2] : memref<1152x64xbf16, #tpu.memory_space<vmem>>, vector<1152x64xbf16>
    %cst = arith.constant dense<0.000000e+00> : vector<64x64xf32>
    %2 = tpu.matmul %0, %1, %cst {dimension_numbers = #tpu.dot_dimension_numbers<[1], [0], [0], [1], [0, 0, 1, 1], [], []>} : vector<64x1152xbf16>, vector<1152x64xbf16>, vector<64x64xf32> -> vector<64x64xf32>
    %3 = vector.extract_strided_slice %2 {offsets = [0, 0], sizes = [16, 64], strides = [1, 1]} : vector<64x64xf32> to vector<16x64xf32>
    %4 = vector.extract_strided_slice %2 {offsets = [16, 0], sizes = [16, 64], strides = [1, 1]} : vector<64x64xf32> to vector<16x64xf32>
    %5 = arith.maximumf %3, %4 : vector<16x64xf32>
    %6 = vector.extract_strided_slice %2 {offsets = [32, 0], sizes = [16, 64], strides = [1, 1]} : vector<64x64xf32> to vector<16x64xf32>
    %7 = vector.extract_strided_slice %2 {offsets = [48, 0], sizes = [16, 64], strides = [1, 1]} : vector<64x64xf32> to vector<16x64xf32>
    %8 = arith.maximumf %6, %7 : vector<16x64xf32>
    %9 = arith.maximumf %5, %8 : vector<16x64xf32>
    %c0_3 = arith.constant 0 : index
    %c0_4 = arith.constant 0 : index
    %10 = vector.load %arg2[%c0_3, %c0_4] : memref<1x64xf32, #tpu.memory_space<vmem>>, vector<1x64xf32>
    %11 = vector.broadcast %10 : vector<1x64xf32> to vector<16x64xf32>
    %12 = arith.addf %9, %11 : vector<16x64xf32>
    %cst_5 = arith.constant 0.000000e+00 : f32
    %13 = vector.broadcast %cst_5 : f32 to vector<16x64xf32>
    %14 = arith.maximumf %12, %13 : vector<16x64xf32>
    %c0_6 = arith.constant 0 : index
    %c0_7 = arith.constant 0 : index
    %15 = vector.load %arg3[%c0_6, %c0_7] : memref<64x16xbf16, #tpu.memory_space<vmem>>, vector<64x16xbf16>
    %16 = arith.truncf %14 : vector<16x64xf32> to vector<16x64xbf16>
    %cst_8 = arith.constant dense<0.000000e+00> : vector<64x64xf32>
    %17 = tpu.matmul %15, %16, %cst_8 {dimension_numbers = #tpu.dot_dimension_numbers<[1], [0], [0], [1], [0, 0, 1, 1], [], []>} : vector<64x16xbf16>, vector<16x64xbf16>, vector<64x64xf32> -> vector<64x64xf32>
    %18 = arith.truncf %17 : vector<64x64xf32> to vector<64x64xbf16>
    %c0_9 = arith.constant 0 : index
    %c0_10 = arith.constant 0 : index
    %19 = vector.load %arg4[%c0_9, %c0_10] : memref<64x128xbf16, #tpu.memory_space<vmem>>, vector<64x128xbf16>
    %cst_11 = arith.constant dense<0.000000e+00> : vector<64x128xf32>
    %20 = tpu.matmul %18, %19, %cst_11 {dimension_numbers = #tpu.dot_dimension_numbers<[1], [0], [0], [1], [0, 0, 1, 1], [], []>} : vector<64x64xbf16>, vector<64x128xbf16>, vector<64x128xf32> -> vector<64x128xf32>
    %c0_12 = arith.constant 0 : index
    %c0_13 = arith.constant 0 : index
    %21 = vector.load %arg6[%c0_12, %c0_13] : memref<1x128xf32, #tpu.memory_space<vmem>>, vector<1x128xf32>
    %22 = vector.broadcast %21 : vector<1x128xf32> to vector<64x128xf32>
    %23 = arith.addf %20, %22 : vector<64x128xf32>
    %c0_14 = arith.constant 0 : index
    %c0_15 = arith.constant 0 : index
    %24 = vector.load %arg5[%c0_14, %c0_15] : memref<32x128xbf16, #tpu.memory_space<vmem>>, vector<32x128xbf16>
    %c0_16 = arith.constant 0 : index
    %c0_17 = arith.constant 0 : index
    %25 = vector.load %arg7[%c0_16, %c0_17] : memref<64x128xbf16, #tpu.memory_space<vmem>>, vector<64x128xbf16>
    %c0_18 = arith.constant 0 : index
    %c0_19 = arith.constant 0 : index
    %26 = vector.load %arg8[%c0_18, %c0_19] : memref<1x128xf32, #tpu.memory_space<vmem>>, vector<1x128xf32>
    %cst_20 = arith.constant 0.000000e+00 : f32
    %27 = vector.broadcast %cst_20 : f32 to vector<8x32xf32>
    %28 = vector.extract_strided_slice %23 {offsets = [0, 0], sizes = [8, 128], strides = [1, 1]} : vector<64x128xf32> to vector<8x128xf32>
    %29 = arith.truncf %27 : vector<8x32xf32> to vector<8x32xbf16>
    %cst_21 = arith.constant dense<0.000000e+00> : vector<8x128xf32>
    %30 = tpu.matmul %29, %24, %cst_21 {dimension_numbers = #tpu.dot_dimension_numbers<[1], [0], [0], [1], [0, 0, 1, 1], [], []>} : vector<8x32xbf16>, vector<32x128xbf16>, vector<8x128xf32> -> vector<8x128xf32>
    %31 = arith.addf %28, %30 : vector<8x128xf32>
    %32 = arith.negf %31 : vector<8x128xf32>
    %33 = math.exp %32 : vector<8x128xf32>
    %cst_22 = arith.constant 1.000000e+00 : f32
    %34 = vector.broadcast %cst_22 : f32 to vector<8x128xf32>
    %35 = arith.addf %34, %33 : vector<8x128xf32>
    %36 = arith.divf %34, %35 : vector<8x128xf32>
    %37 = math.tanh %31 : vector<8x128xf32>
    %38 = vector.extract_strided_slice %36 {offsets = [0, 0], sizes = [8, 32], strides = [1, 1]} : vector<8x128xf32> to vector<8x32xf32>
    %39 = vector.extract_strided_slice %36 {offsets = [0, 32], sizes = [8, 32], strides = [1, 1]} : vector<8x128xf32> to vector<8x32xf32>
    %40 = vector.extract_strided_slice %36 {offsets = [0, 96], sizes = [8, 32], strides = [1, 1]} : vector<8x128xf32> to vector<8x32xf32>
    %41 = vector.extract_strided_slice %37 {offsets = [0, 64], sizes = [8, 32], strides = [1, 1]} : vector<8x128xf32> to vector<8x32xf32>
    %42 = arith.mulf %39, %27 : vector<8x32xf32>
    %43 = arith.mulf %38, %41 : vector<8x32xf32>
    %44 = arith.addf %42, %43 : vector<8x32xf32>
    %45 = math.tanh %44 : vector<8x32xf32>
    %46 = arith.mulf %40, %45 : vector<8x32xf32>
    %47 = tpu.concatenate %46, %27 in 1 : vector<8x32xf32>, vector<8x32xf32> -> vector<8x64xf32>
    %48 = arith.truncf %47 : vector<8x64xf32> to vector<8x64xbf16>
    %cst_23 = arith.constant dense<0.000000e+00> : vector<8x128xf32>
    %49 = tpu.matmul %48, %25, %cst_23 {dimension_numbers = #tpu.dot_dimension_numbers<[1], [0], [0], [1], [0, 0, 1, 1], [], []>} : vector<8x64xbf16>, vector<64x128xbf16>, vector<8x128xf32> -> vector<8x128xf32>
    %50 = vector.broadcast %26 : vector<1x128xf32> to vector<8x128xf32>
    %51 = arith.addf %49, %50 : vector<8x128xf32>
    %52 = arith.negf %51 : vector<8x128xf32>
    %53 = math.exp %52 : vector<8x128xf32>
    %cst_24 = arith.constant 1.000000e+00 : f32
    %54 = vector.broadcast %cst_24 : f32 to vector<8x128xf32>
    %55 = arith.addf %54, %53 : vector<8x128xf32>
    %56 = arith.divf %54, %55 : vector<8x128xf32>
    %57 = math.tanh %51 : vector<8x128xf32>
    %58 = vector.extract_strided_slice %56 {offsets = [0, 0], sizes = [8, 32], strides = [1, 1]} : vector<8x128xf32> to vector<8x32xf32>
    %59 = vector.extract_strided_slice %56 {offsets = [0, 32], sizes = [8, 32], strides = [1, 1]} : vector<8x128xf32> to vector<8x32xf32>
    %60 = vector.extract_strided_slice %56 {offsets = [0, 96], sizes = [8, 32], strides = [1, 1]} : vector<8x128xf32> to vector<8x32xf32>
    %61 = vector.extract_strided_slice %57 {offsets = [0, 64], sizes = [8, 32], strides = [1, 1]} : vector<8x128xf32> to vector<8x32xf32>
    %62 = arith.mulf %59, %27 : vector<8x32xf32>
    %63 = arith.mulf %58, %61 : vector<8x32xf32>
    %64 = arith.addf %62, %63 : vector<8x32xf32>
    %65 = math.tanh %64 : vector<8x32xf32>
    %66 = arith.mulf %60, %65 : vector<8x32xf32>
    %67 = vector.extract_strided_slice %23 {offsets = [8, 0], sizes = [8, 128], strides = [1, 1]} : vector<64x128xf32> to vector<8x128xf32>
    %68 = arith.truncf %46 : vector<8x32xf32> to vector<8x32xbf16>
    %cst_25 = arith.constant dense<0.000000e+00> : vector<8x128xf32>
    %69 = tpu.matmul %68, %24, %cst_25 {dimension_numbers = #tpu.dot_dimension_numbers<[1], [0], [0], [1], [0, 0, 1, 1], [], []>} : vector<8x32xbf16>, vector<32x128xbf16>, vector<8x128xf32> -> vector<8x128xf32>
    %70 = arith.addf %67, %69 : vector<8x128xf32>
    %71 = arith.negf %70 : vector<8x128xf32>
    %72 = math.exp %71 : vector<8x128xf32>
    %cst_26 = arith.constant 1.000000e+00 : f32
    %73 = vector.broadcast %cst_26 : f32 to vector<8x128xf32>
    %74 = arith.addf %73, %72 : vector<8x128xf32>
    %75 = arith.divf %73, %74 : vector<8x128xf32>
    %76 = math.tanh %70 : vector<8x128xf32>
    %77 = vector.extract_strided_slice %75 {offsets = [0, 0], sizes = [8, 32], strides = [1, 1]} : vector<8x128xf32> to vector<8x32xf32>
    %78 = vector.extract_strided_slice %75 {offsets = [0, 32], sizes = [8, 32], strides = [1, 1]} : vector<8x128xf32> to vector<8x32xf32>
    %79 = vector.extract_strided_slice %75 {offsets = [0, 96], sizes = [8, 32], strides = [1, 1]} : vector<8x128xf32> to vector<8x32xf32>
    %80 = vector.extract_strided_slice %76 {offsets = [0, 64], sizes = [8, 32], strides = [1, 1]} : vector<8x128xf32> to vector<8x32xf32>
    %81 = arith.mulf %78, %44 : vector<8x32xf32>
    %82 = arith.mulf %77, %80 : vector<8x32xf32>
    %83 = arith.addf %81, %82 : vector<8x32xf32>
    %84 = math.tanh %83 : vector<8x32xf32>
    %85 = arith.mulf %79, %84 : vector<8x32xf32>
    %86 = tpu.concatenate %85, %66 in 1 : vector<8x32xf32>, vector<8x32xf32> -> vector<8x64xf32>
    %87 = arith.truncf %86 : vector<8x64xf32> to vector<8x64xbf16>
    %cst_27 = arith.constant dense<0.000000e+00> : vector<8x128xf32>
    %88 = tpu.matmul %87, %25, %cst_27 {dimension_numbers = #tpu.dot_dimension_numbers<[1], [0], [0], [1], [0, 0, 1, 1], [], []>} : vector<8x64xbf16>, vector<64x128xbf16>, vector<8x128xf32> -> vector<8x128xf32>
    %89 = vector.broadcast %26 : vector<1x128xf32> to vector<8x128xf32>
    %90 = arith.addf %88, %89 : vector<8x128xf32>
    %91 = arith.negf %90 : vector<8x128xf32>
    %92 = math.exp %91 : vector<8x128xf32>
    %cst_28 = arith.constant 1.000000e+00 : f32
    %93 = vector.broadcast %cst_28 : f32 to vector<8x128xf32>
    %94 = arith.addf %93, %92 : vector<8x128xf32>
    %95 = arith.divf %93, %94 : vector<8x128xf32>
    %96 = math.tanh %90 : vector<8x128xf32>
    %97 = vector.extract_strided_slice %95 {offsets = [0, 0], sizes = [8, 32], strides = [1, 1]} : vector<8x128xf32> to vector<8x32xf32>
    %98 = vector.extract_strided_slice %95 {offsets = [0, 32], sizes = [8, 32], strides = [1, 1]} : vector<8x128xf32> to vector<8x32xf32>
    %99 = vector.extract_strided_slice %95 {offsets = [0, 96], sizes = [8, 32], strides = [1, 1]} : vector<8x128xf32> to vector<8x32xf32>
    %100 = vector.extract_strided_slice %96 {offsets = [0, 64], sizes = [8, 32], strides = [1, 1]} : vector<8x128xf32> to vector<8x32xf32>
    %101 = arith.mulf %98, %64 : vector<8x32xf32>
    %102 = arith.mulf %97, %100 : vector<8x32xf32>
    %103 = arith.addf %101, %102 : vector<8x32xf32>
    %104 = math.tanh %103 : vector<8x32xf32>
    %105 = arith.mulf %99, %104 : vector<8x32xf32>
    %106 = vector.extract_strided_slice %23 {offsets = [16, 0], sizes = [8, 128], strides = [1, 1]} : vector<64x128xf32> to vector<8x128xf32>
    %107 = arith.truncf %85 : vector<8x32xf32> to vector<8x32xbf16>
    %cst_29 = arith.constant dense<0.000000e+00> : vector<8x128xf32>
    %108 = tpu.matmul %107, %24, %cst_29 {dimension_numbers = #tpu.dot_dimension_numbers<[1], [0], [0], [1], [0, 0, 1, 1], [], []>} : vector<8x32xbf16>, vector<32x128xbf16>, vector<8x128xf32> -> vector<8x128xf32>
    %109 = arith.addf %106, %108 : vector<8x128xf32>
    %110 = arith.negf %109 : vector<8x128xf32>
    %111 = math.exp %110 : vector<8x128xf32>
    %cst_30 = arith.constant 1.000000e+00 : f32
    %112 = vector.broadcast %cst_30 : f32 to vector<8x128xf32>
    %113 = arith.addf %112, %111 : vector<8x128xf32>
    %114 = arith.divf %112, %113 : vector<8x128xf32>
    %115 = math.tanh %109 : vector<8x128xf32>
    %116 = vector.extract_strided_slice %114 {offsets = [0, 0], sizes = [8, 32], strides = [1, 1]} : vector<8x128xf32> to vector<8x32xf32>
    %117 = vector.extract_strided_slice %114 {offsets = [0, 32], sizes = [8, 32], strides = [1, 1]} : vector<8x128xf32> to vector<8x32xf32>
    %118 = vector.extract_strided_slice %114 {offsets = [0, 96], sizes = [8, 32], strides = [1, 1]} : vector<8x128xf32> to vector<8x32xf32>
    %119 = vector.extract_strided_slice %115 {offsets = [0, 64], sizes = [8, 32], strides = [1, 1]} : vector<8x128xf32> to vector<8x32xf32>
    %120 = arith.mulf %117, %83 : vector<8x32xf32>
    %121 = arith.mulf %116, %119 : vector<8x32xf32>
    %122 = arith.addf %120, %121 : vector<8x32xf32>
    %123 = math.tanh %122 : vector<8x32xf32>
    %124 = arith.mulf %118, %123 : vector<8x32xf32>
    %125 = tpu.concatenate %124, %105 in 1 : vector<8x32xf32>, vector<8x32xf32> -> vector<8x64xf32>
    %126 = arith.truncf %125 : vector<8x64xf32> to vector<8x64xbf16>
    %cst_31 = arith.constant dense<0.000000e+00> : vector<8x128xf32>
    %127 = tpu.matmul %126, %25, %cst_31 {dimension_numbers = #tpu.dot_dimension_numbers<[1], [0], [0], [1], [0, 0, 1, 1], [], []>} : vector<8x64xbf16>, vector<64x128xbf16>, vector<8x128xf32> -> vector<8x128xf32>
    %128 = vector.broadcast %26 : vector<1x128xf32> to vector<8x128xf32>
    %129 = arith.addf %127, %128 : vector<8x128xf32>
    %130 = arith.negf %129 : vector<8x128xf32>
    %131 = math.exp %130 : vector<8x128xf32>
    %cst_32 = arith.constant 1.000000e+00 : f32
    %132 = vector.broadcast %cst_32 : f32 to vector<8x128xf32>
    %133 = arith.addf %132, %131 : vector<8x128xf32>
    %134 = arith.divf %132, %133 : vector<8x128xf32>
    %135 = math.tanh %129 : vector<8x128xf32>
    %136 = vector.extract_strided_slice %134 {offsets = [0, 0], sizes = [8, 32], strides = [1, 1]} : vector<8x128xf32> to vector<8x32xf32>
    %137 = vector.extract_strided_slice %134 {offsets = [0, 32], sizes = [8, 32], strides = [1, 1]} : vector<8x128xf32> to vector<8x32xf32>
    %138 = vector.extract_strided_slice %134 {offsets = [0, 96], sizes = [8, 32], strides = [1, 1]} : vector<8x128xf32> to vector<8x32xf32>
    %139 = vector.extract_strided_slice %135 {offsets = [0, 64], sizes = [8, 32], strides = [1, 1]} : vector<8x128xf32> to vector<8x32xf32>
    %140 = arith.mulf %137, %103 : vector<8x32xf32>
    %141 = arith.mulf %136, %139 : vector<8x32xf32>
    %142 = arith.addf %140, %141 : vector<8x32xf32>
    %143 = math.tanh %142 : vector<8x32xf32>
    %144 = arith.mulf %138, %143 : vector<8x32xf32>
    %145 = vector.extract_strided_slice %23 {offsets = [24, 0], sizes = [8, 128], strides = [1, 1]} : vector<64x128xf32> to vector<8x128xf32>
    %146 = arith.truncf %124 : vector<8x32xf32> to vector<8x32xbf16>
    %cst_33 = arith.constant dense<0.000000e+00> : vector<8x128xf32>
    %147 = tpu.matmul %146, %24, %cst_33 {dimension_numbers = #tpu.dot_dimension_numbers<[1], [0], [0], [1], [0, 0, 1, 1], [], []>} : vector<8x32xbf16>, vector<32x128xbf16>, vector<8x128xf32> -> vector<8x128xf32>
    %148 = arith.addf %145, %147 : vector<8x128xf32>
    %149 = arith.negf %148 : vector<8x128xf32>
    %150 = math.exp %149 : vector<8x128xf32>
    %cst_34 = arith.constant 1.000000e+00 : f32
    %151 = vector.broadcast %cst_34 : f32 to vector<8x128xf32>
    %152 = arith.addf %151, %150 : vector<8x128xf32>
    %153 = arith.divf %151, %152 : vector<8x128xf32>
    %154 = math.tanh %148 : vector<8x128xf32>
    %155 = vector.extract_strided_slice %153 {offsets = [0, 0], sizes = [8, 32], strides = [1, 1]} : vector<8x128xf32> to vector<8x32xf32>
    %156 = vector.extract_strided_slice %153 {offsets = [0, 32], sizes = [8, 32], strides = [1, 1]} : vector<8x128xf32> to vector<8x32xf32>
    %157 = vector.extract_strided_slice %153 {offsets = [0, 96], sizes = [8, 32], strides = [1, 1]} : vector<8x128xf32> to vector<8x32xf32>
    %158 = vector.extract_strided_slice %154 {offsets = [0, 64], sizes = [8, 32], strides = [1, 1]} : vector<8x128xf32> to vector<8x32xf32>
    %159 = arith.mulf %156, %122 : vector<8x32xf32>
    %160 = arith.mulf %155, %158 : vector<8x32xf32>
    %161 = arith.addf %159, %160 : vector<8x32xf32>
    %162 = math.tanh %161 : vector<8x32xf32>
    %163 = arith.mulf %157, %162 : vector<8x32xf32>
    %164 = tpu.concatenate %163, %144 in 1 : vector<8x32xf32>, vector<8x32xf32> -> vector<8x64xf32>
    %165 = arith.truncf %164 : vector<8x64xf32> to vector<8x64xbf16>
    %cst_35 = arith.constant dense<0.000000e+00> : vector<8x128xf32>
    %166 = tpu.matmul %165, %25, %cst_35 {dimension_numbers = #tpu.dot_dimension_numbers<[1], [0], [0], [1], [0, 0, 1, 1], [], []>} : vector<8x64xbf16>, vector<64x128xbf16>, vector<8x128xf32> -> vector<8x128xf32>
    %167 = vector.broadcast %26 : vector<1x128xf32> to vector<8x128xf32>
    %168 = arith.addf %166, %167 : vector<8x128xf32>
    %169 = arith.negf %168 : vector<8x128xf32>
    %170 = math.exp %169 : vector<8x128xf32>
    %cst_36 = arith.constant 1.000000e+00 : f32
    %171 = vector.broadcast %cst_36 : f32 to vector<8x128xf32>
    %172 = arith.addf %171, %170 : vector<8x128xf32>
    %173 = arith.divf %171, %172 : vector<8x128xf32>
    %174 = math.tanh %168 : vector<8x128xf32>
    %175 = vector.extract_strided_slice %173 {offsets = [0, 0], sizes = [8, 32], strides = [1, 1]} : vector<8x128xf32> to vector<8x32xf32>
    %176 = vector.extract_strided_slice %173 {offsets = [0, 32], sizes = [8, 32], strides = [1, 1]} : vector<8x128xf32> to vector<8x32xf32>
    %177 = vector.extract_strided_slice %173 {offsets = [0, 96], sizes = [8, 32], strides = [1, 1]} : vector<8x128xf32> to vector<8x32xf32>
    %178 = vector.extract_strided_slice %174 {offsets = [0, 64], sizes = [8, 32], strides = [1, 1]} : vector<8x128xf32> to vector<8x32xf32>
    %179 = arith.mulf %176, %142 : vector<8x32xf32>
    %180 = arith.mulf %175, %178 : vector<8x32xf32>
    %181 = arith.addf %179, %180 : vector<8x32xf32>
    %182 = math.tanh %181 : vector<8x32xf32>
    %183 = arith.mulf %177, %182 : vector<8x32xf32>
    %184 = vector.extract_strided_slice %23 {offsets = [32, 0], sizes = [8, 128], strides = [1, 1]} : vector<64x128xf32> to vector<8x128xf32>
    %185 = arith.truncf %163 : vector<8x32xf32> to vector<8x32xbf16>
    %cst_37 = arith.constant dense<0.000000e+00> : vector<8x128xf32>
    %186 = tpu.matmul %185, %24, %cst_37 {dimension_numbers = #tpu.dot_dimension_numbers<[1], [0], [0], [1], [0, 0, 1, 1], [], []>} : vector<8x32xbf16>, vector<32x128xbf16>, vector<8x128xf32> -> vector<8x128xf32>
    %187 = arith.addf %184, %186 : vector<8x128xf32>
    %188 = arith.negf %187 : vector<8x128xf32>
    %189 = math.exp %188 : vector<8x128xf32>
    %cst_38 = arith.constant 1.000000e+00 : f32
    %190 = vector.broadcast %cst_38 : f32 to vector<8x128xf32>
    %191 = arith.addf %190, %189 : vector<8x128xf32>
    %192 = arith.divf %190, %191 : vector<8x128xf32>
    %193 = math.tanh %187 : vector<8x128xf32>
    %194 = vector.extract_strided_slice %192 {offsets = [0, 0], sizes = [8, 32], strides = [1, 1]} : vector<8x128xf32> to vector<8x32xf32>
    %195 = vector.extract_strided_slice %192 {offsets = [0, 32], sizes = [8, 32], strides = [1, 1]} : vector<8x128xf32> to vector<8x32xf32>
    %196 = vector.extract_strided_slice %192 {offsets = [0, 96], sizes = [8, 32], strides = [1, 1]} : vector<8x128xf32> to vector<8x32xf32>
    %197 = vector.extract_strided_slice %193 {offsets = [0, 64], sizes = [8, 32], strides = [1, 1]} : vector<8x128xf32> to vector<8x32xf32>
    %198 = arith.mulf %195, %161 : vector<8x32xf32>
    %199 = arith.mulf %194, %197 : vector<8x32xf32>
    %200 = arith.addf %198, %199 : vector<8x32xf32>
    %201 = math.tanh %200 : vector<8x32xf32>
    %202 = arith.mulf %196, %201 : vector<8x32xf32>
    %203 = tpu.concatenate %202, %183 in 1 : vector<8x32xf32>, vector<8x32xf32> -> vector<8x64xf32>
    %204 = arith.truncf %203 : vector<8x64xf32> to vector<8x64xbf16>
    %cst_39 = arith.constant dense<0.000000e+00> : vector<8x128xf32>
    %205 = tpu.matmul %204, %25, %cst_39 {dimension_numbers = #tpu.dot_dimension_numbers<[1], [0], [0], [1], [0, 0, 1, 1], [], []>} : vector<8x64xbf16>, vector<64x128xbf16>, vector<8x128xf32> -> vector<8x128xf32>
    %206 = vector.broadcast %26 : vector<1x128xf32> to vector<8x128xf32>
    %207 = arith.addf %205, %206 : vector<8x128xf32>
    %208 = arith.negf %207 : vector<8x128xf32>
    %209 = math.exp %208 : vector<8x128xf32>
    %cst_40 = arith.constant 1.000000e+00 : f32
    %210 = vector.broadcast %cst_40 : f32 to vector<8x128xf32>
    %211 = arith.addf %210, %209 : vector<8x128xf32>
    %212 = arith.divf %210, %211 : vector<8x128xf32>
    %213 = math.tanh %207 : vector<8x128xf32>
    %214 = vector.extract_strided_slice %212 {offsets = [0, 0], sizes = [8, 32], strides = [1, 1]} : vector<8x128xf32> to vector<8x32xf32>
    %215 = vector.extract_strided_slice %212 {offsets = [0, 32], sizes = [8, 32], strides = [1, 1]} : vector<8x128xf32> to vector<8x32xf32>
    %216 = vector.extract_strided_slice %212 {offsets = [0, 96], sizes = [8, 32], strides = [1, 1]} : vector<8x128xf32> to vector<8x32xf32>
    %217 = vector.extract_strided_slice %213 {offsets = [0, 64], sizes = [8, 32], strides = [1, 1]} : vector<8x128xf32> to vector<8x32xf32>
    %218 = arith.mulf %215, %181 : vector<8x32xf32>
    %219 = arith.mulf %214, %217 : vector<8x32xf32>
    %220 = arith.addf %218, %219 : vector<8x32xf32>
    %221 = math.tanh %220 : vector<8x32xf32>
    %222 = arith.mulf %216, %221 : vector<8x32xf32>
    %223 = vector.extract_strided_slice %23 {offsets = [40, 0], sizes = [8, 128], strides = [1, 1]} : vector<64x128xf32> to vector<8x128xf32>
    %224 = arith.truncf %202 : vector<8x32xf32> to vector<8x32xbf16>
    %cst_41 = arith.constant dense<0.000000e+00> : vector<8x128xf32>
    %225 = tpu.matmul %224, %24, %cst_41 {dimension_numbers = #tpu.dot_dimension_numbers<[1], [0], [0], [1], [0, 0, 1, 1], [], []>} : vector<8x32xbf16>, vector<32x128xbf16>, vector<8x128xf32> -> vector<8x128xf32>
    %226 = arith.addf %223, %225 : vector<8x128xf32>
    %227 = arith.negf %226 : vector<8x128xf32>
    %228 = math.exp %227 : vector<8x128xf32>
    %cst_42 = arith.constant 1.000000e+00 : f32
    %229 = vector.broadcast %cst_42 : f32 to vector<8x128xf32>
    %230 = arith.addf %229, %228 : vector<8x128xf32>
    %231 = arith.divf %229, %230 : vector<8x128xf32>
    %232 = math.tanh %226 : vector<8x128xf32>
    %233 = vector.extract_strided_slice %231 {offsets = [0, 0], sizes = [8, 32], strides = [1, 1]} : vector<8x128xf32> to vector<8x32xf32>
    %234 = vector.extract_strided_slice %231 {offsets = [0, 32], sizes = [8, 32], strides = [1, 1]} : vector<8x128xf32> to vector<8x32xf32>
    %235 = vector.extract_strided_slice %231 {offsets = [0, 96], sizes = [8, 32], strides = [1, 1]} : vector<8x128xf32> to vector<8x32xf32>
    %236 = vector.extract_strided_slice %232 {offsets = [0, 64], sizes = [8, 32], strides = [1, 1]} : vector<8x128xf32> to vector<8x32xf32>
    %237 = arith.mulf %234, %200 : vector<8x32xf32>
    %238 = arith.mulf %233, %236 : vector<8x32xf32>
    %239 = arith.addf %237, %238 : vector<8x32xf32>
    %240 = math.tanh %239 : vector<8x32xf32>
    %241 = arith.mulf %235, %240 : vector<8x32xf32>
    %242 = tpu.concatenate %241, %222 in 1 : vector<8x32xf32>, vector<8x32xf32> -> vector<8x64xf32>
    %243 = arith.truncf %242 : vector<8x64xf32> to vector<8x64xbf16>
    %cst_43 = arith.constant dense<0.000000e+00> : vector<8x128xf32>
    %244 = tpu.matmul %243, %25, %cst_43 {dimension_numbers = #tpu.dot_dimension_numbers<[1], [0], [0], [1], [0, 0, 1, 1], [], []>} : vector<8x64xbf16>, vector<64x128xbf16>, vector<8x128xf32> -> vector<8x128xf32>
    %245 = vector.broadcast %26 : vector<1x128xf32> to vector<8x128xf32>
    %246 = arith.addf %244, %245 : vector<8x128xf32>
    %247 = arith.negf %246 : vector<8x128xf32>
    %248 = math.exp %247 : vector<8x128xf32>
    %cst_44 = arith.constant 1.000000e+00 : f32
    %249 = vector.broadcast %cst_44 : f32 to vector<8x128xf32>
    %250 = arith.addf %249, %248 : vector<8x128xf32>
    %251 = arith.divf %249, %250 : vector<8x128xf32>
    %252 = math.tanh %246 : vector<8x128xf32>
    %253 = vector.extract_strided_slice %251 {offsets = [0, 0], sizes = [8, 32], strides = [1, 1]} : vector<8x128xf32> to vector<8x32xf32>
    %254 = vector.extract_strided_slice %251 {offsets = [0, 32], sizes = [8, 32], strides = [1, 1]} : vector<8x128xf32> to vector<8x32xf32>
    %255 = vector.extract_strided_slice %251 {offsets = [0, 96], sizes = [8, 32], strides = [1, 1]} : vector<8x128xf32> to vector<8x32xf32>
    %256 = vector.extract_strided_slice %252 {offsets = [0, 64], sizes = [8, 32], strides = [1, 1]} : vector<8x128xf32> to vector<8x32xf32>
    %257 = arith.mulf %254, %220 : vector<8x32xf32>
    %258 = arith.mulf %253, %256 : vector<8x32xf32>
    %259 = arith.addf %257, %258 : vector<8x32xf32>
    %260 = math.tanh %259 : vector<8x32xf32>
    %261 = arith.mulf %255, %260 : vector<8x32xf32>
    %262 = vector.extract_strided_slice %23 {offsets = [48, 0], sizes = [8, 128], strides = [1, 1]} : vector<64x128xf32> to vector<8x128xf32>
    %263 = arith.truncf %241 : vector<8x32xf32> to vector<8x32xbf16>
    %cst_45 = arith.constant dense<0.000000e+00> : vector<8x128xf32>
    %264 = tpu.matmul %263, %24, %cst_45 {dimension_numbers = #tpu.dot_dimension_numbers<[1], [0], [0], [1], [0, 0, 1, 1], [], []>} : vector<8x32xbf16>, vector<32x128xbf16>, vector<8x128xf32> -> vector<8x128xf32>
    %265 = arith.addf %262, %264 : vector<8x128xf32>
    %266 = arith.negf %265 : vector<8x128xf32>
    %267 = math.exp %266 : vector<8x128xf32>
    %cst_46 = arith.constant 1.000000e+00 : f32
    %268 = vector.broadcast %cst_46 : f32 to vector<8x128xf32>
    %269 = arith.addf %268, %267 : vector<8x128xf32>
    %270 = arith.divf %268, %269 : vector<8x128xf32>
    %271 = math.tanh %265 : vector<8x128xf32>
    %272 = vector.extract_strided_slice %270 {offsets = [0, 0], sizes = [8, 32], strides = [1, 1]} : vector<8x128xf32> to vector<8x32xf32>
    %273 = vector.extract_strided_slice %270 {offsets = [0, 32], sizes = [8, 32], strides = [1, 1]} : vector<8x128xf32> to vector<8x32xf32>
    %274 = vector.extract_strided_slice %270 {offsets = [0, 96], sizes = [8, 32], strides = [1, 1]} : vector<8x128xf32> to vector<8x32xf32>
    %275 = vector.extract_strided_slice %271 {offsets = [0, 64], sizes = [8, 32], strides = [1, 1]} : vector<8x128xf32> to vector<8x32xf32>
    %276 = arith.mulf %273, %239 : vector<8x32xf32>
    %277 = arith.mulf %272, %275 : vector<8x32xf32>
    %278 = arith.addf %276, %277 : vector<8x32xf32>
    %279 = math.tanh %278 : vector<8x32xf32>
    %280 = arith.mulf %274, %279 : vector<8x32xf32>
    %281 = tpu.concatenate %280, %261 in 1 : vector<8x32xf32>, vector<8x32xf32> -> vector<8x64xf32>
    %282 = arith.truncf %281 : vector<8x64xf32> to vector<8x64xbf16>
    %cst_47 = arith.constant dense<0.000000e+00> : vector<8x128xf32>
    %283 = tpu.matmul %282, %25, %cst_47 {dimension_numbers = #tpu.dot_dimension_numbers<[1], [0], [0], [1], [0, 0, 1, 1], [], []>} : vector<8x64xbf16>, vector<64x128xbf16>, vector<8x128xf32> -> vector<8x128xf32>
    %284 = vector.broadcast %26 : vector<1x128xf32> to vector<8x128xf32>
    %285 = arith.addf %283, %284 : vector<8x128xf32>
    %286 = arith.negf %285 : vector<8x128xf32>
    %287 = math.exp %286 : vector<8x128xf32>
    %cst_48 = arith.constant 1.000000e+00 : f32
    %288 = vector.broadcast %cst_48 : f32 to vector<8x128xf32>
    %289 = arith.addf %288, %287 : vector<8x128xf32>
    %290 = arith.divf %288, %289 : vector<8x128xf32>
    %291 = math.tanh %285 : vector<8x128xf32>
    %292 = vector.extract_strided_slice %290 {offsets = [0, 0], sizes = [8, 32], strides = [1, 1]} : vector<8x128xf32> to vector<8x32xf32>
    %293 = vector.extract_strided_slice %290 {offsets = [0, 32], sizes = [8, 32], strides = [1, 1]} : vector<8x128xf32> to vector<8x32xf32>
    %294 = vector.extract_strided_slice %290 {offsets = [0, 96], sizes = [8, 32], strides = [1, 1]} : vector<8x128xf32> to vector<8x32xf32>
    %295 = vector.extract_strided_slice %291 {offsets = [0, 64], sizes = [8, 32], strides = [1, 1]} : vector<8x128xf32> to vector<8x32xf32>
    %296 = arith.mulf %293, %259 : vector<8x32xf32>
    %297 = arith.mulf %292, %295 : vector<8x32xf32>
    %298 = arith.addf %296, %297 : vector<8x32xf32>
    %299 = math.tanh %298 : vector<8x32xf32>
    %300 = arith.mulf %294, %299 : vector<8x32xf32>
    %301 = vector.extract_strided_slice %23 {offsets = [56, 0], sizes = [8, 128], strides = [1, 1]} : vector<64x128xf32> to vector<8x128xf32>
    %302 = arith.truncf %280 : vector<8x32xf32> to vector<8x32xbf16>
    %cst_49 = arith.constant dense<0.000000e+00> : vector<8x128xf32>
    %303 = tpu.matmul %302, %24, %cst_49 {dimension_numbers = #tpu.dot_dimension_numbers<[1], [0], [0], [1], [0, 0, 1, 1], [], []>} : vector<8x32xbf16>, vector<32x128xbf16>, vector<8x128xf32> -> vector<8x128xf32>
    %304 = arith.addf %301, %303 : vector<8x128xf32>
    %305 = arith.negf %304 : vector<8x128xf32>
    %306 = math.exp %305 : vector<8x128xf32>
    %cst_50 = arith.constant 1.000000e+00 : f32
    %307 = vector.broadcast %cst_50 : f32 to vector<8x128xf32>
    %308 = arith.addf %307, %306 : vector<8x128xf32>
    %309 = arith.divf %307, %308 : vector<8x128xf32>
    %310 = math.tanh %304 : vector<8x128xf32>
    %311 = vector.extract_strided_slice %309 {offsets = [0, 0], sizes = [8, 32], strides = [1, 1]} : vector<8x128xf32> to vector<8x32xf32>
    %312 = vector.extract_strided_slice %309 {offsets = [0, 32], sizes = [8, 32], strides = [1, 1]} : vector<8x128xf32> to vector<8x32xf32>
    %313 = vector.extract_strided_slice %309 {offsets = [0, 96], sizes = [8, 32], strides = [1, 1]} : vector<8x128xf32> to vector<8x32xf32>
    %314 = vector.extract_strided_slice %310 {offsets = [0, 64], sizes = [8, 32], strides = [1, 1]} : vector<8x128xf32> to vector<8x32xf32>
    %315 = arith.mulf %312, %278 : vector<8x32xf32>
    %316 = arith.mulf %311, %314 : vector<8x32xf32>
    %317 = arith.addf %315, %316 : vector<8x32xf32>
    %318 = math.tanh %317 : vector<8x32xf32>
    %319 = arith.mulf %313, %318 : vector<8x32xf32>
    %320 = tpu.concatenate %319, %300 in 1 : vector<8x32xf32>, vector<8x32xf32> -> vector<8x64xf32>
    %321 = arith.truncf %320 : vector<8x64xf32> to vector<8x64xbf16>
    %cst_51 = arith.constant dense<0.000000e+00> : vector<8x128xf32>
    %322 = tpu.matmul %321, %25, %cst_51 {dimension_numbers = #tpu.dot_dimension_numbers<[1], [0], [0], [1], [0, 0, 1, 1], [], []>} : vector<8x64xbf16>, vector<64x128xbf16>, vector<8x128xf32> -> vector<8x128xf32>
    %323 = vector.broadcast %26 : vector<1x128xf32> to vector<8x128xf32>
    %324 = arith.addf %322, %323 : vector<8x128xf32>
    %325 = arith.negf %324 : vector<8x128xf32>
    %326 = math.exp %325 : vector<8x128xf32>
    %cst_52 = arith.constant 1.000000e+00 : f32
    %327 = vector.broadcast %cst_52 : f32 to vector<8x128xf32>
    %328 = arith.addf %327, %326 : vector<8x128xf32>
    %329 = arith.divf %327, %328 : vector<8x128xf32>
    %330 = math.tanh %324 : vector<8x128xf32>
    %331 = vector.extract_strided_slice %329 {offsets = [0, 0], sizes = [8, 32], strides = [1, 1]} : vector<8x128xf32> to vector<8x32xf32>
    %332 = vector.extract_strided_slice %329 {offsets = [0, 32], sizes = [8, 32], strides = [1, 1]} : vector<8x128xf32> to vector<8x32xf32>
    %333 = vector.extract_strided_slice %329 {offsets = [0, 96], sizes = [8, 32], strides = [1, 1]} : vector<8x128xf32> to vector<8x32xf32>
    %334 = vector.extract_strided_slice %330 {offsets = [0, 64], sizes = [8, 32], strides = [1, 1]} : vector<8x128xf32> to vector<8x32xf32>
    %335 = arith.mulf %332, %298 : vector<8x32xf32>
    %336 = arith.mulf %331, %334 : vector<8x32xf32>
    %337 = arith.addf %335, %336 : vector<8x32xf32>
    %338 = math.tanh %337 : vector<8x32xf32>
    %339 = arith.mulf %333, %338 : vector<8x32xf32>
    %c0_53 = arith.constant 0 : index
    %c0_54 = arith.constant 0 : index
    %340 = vector.load %arg9[%c0_53, %c0_54] : memref<1x32xf32, #tpu.memory_space<vmem>>, vector<1x32xf32>
    %341 = vector.broadcast %340 : vector<1x32xf32> to vector<8x32xf32>
    %342 = arith.mulf %339, %341 : vector<8x32xf32>
    %cst_55 = arith.constant dense<0.000000e+00> : vector<8xf32>
    %343 = vector.multi_reduction <add>, %342, %cst_55 [1] : vector<8x32xf32> to vector<8xf32>
    %344 = vector.shape_cast %343 : vector<8xf32> to vector<8x1xf32>
    %c0_56 = arith.constant 0 : index
    %c0_57 = arith.constant 0 : index
    %345 = vector.load %arg10[%c0_56, %c0_57] : memref<1x1xf32, #tpu.memory_space<vmem>>, vector<1x1xf32>
    %346 = vector.broadcast %345 : vector<1x1xf32> to vector<8x1xf32>
    %347 = arith.addf %344, %346 : vector<8x1xf32>
    %348 = vector.extract_strided_slice %347 {offsets = [0, 0], sizes = [2, 1], strides = [1, 1]} : vector<8x1xf32> to vector<2x1xf32>
    %349 = arith.negf %348 : vector<2x1xf32>
    %350 = math.exp %349 : vector<2x1xf32>
    %cst_58 = arith.constant 1.000000e+00 : f32
    %351 = vector.broadcast %cst_58 : f32 to vector<2x1xf32>
    %352 = arith.addf %351, %350 : vector<2x1xf32>
    %353 = arith.divf %351, %352 : vector<2x1xf32>
    %c0_59 = arith.constant 0 : index
    %c0_60 = arith.constant 0 : index
    %354 = vector.load %arg11[%c0_59, %c0_60] : memref<2x1xf32, #tpu.memory_space<vmem>>, vector<2x1xf32>
    tpu.vector_store %arg11[%c0_59, %c0_60], %353 {strides = array<i32>} : memref<2x1xf32, #tpu.memory_space<vmem>>, vector<2x1xf32>,
    return
  }
}

</mosaic_0001>

<bundles_post_ra>
// kernel: conv_lstm_classifier_forward.2
= control target key start
LH: loop header
LB: loop body
LE: loop exit
PB: predicated region body
PF: predicated region fallthrough
CT: control target
= control target key end

     0   :  { %v1509_v3 = vmov 0   ;;  %vm500_vm0 = vcmask 1041408   ;;  %vm496_vm1 = vcmask 293888   ;;  %s1919_s0 = inlined_call_operand.vmem [shape: bf16[36,4096], index: 0, kind: input, shape index: {}]   ;;  %s1920_s1 = inlined_call_operand.vmem [shape: bf16[8,36], index: 1, kind: input, shape index: {}]   ;;  %s1921_s2 = inlined_call_operand.vmem [shape: f32[8,1], index: 2, kind: input, shape index: {}]   ;;  %s1922_s3 = inlined_call_operand.vmem [shape: bf16[8,1024], index: 3, kind: output, shape index: {}]  }
   0x1   :  { %v16_v0 = vld [vmem:[%s1919_s0] sm:$0xff]  ;;  %v17_v2 = vld [vmem:[%s1919_s0 + $0x8] sm:$0xff]  ;;  %629 = vmatprep.mubr.bf16.mxu0 %v1509_v3  ;;  %670 = vmatprep.mubr.bf16.mxu1 %v1509_v3  ;;  %v18_v23 = vld [vmem:[%s1919_s0 + $0x10] sm:$0xff] }
   0x2   :  { %v32_v1 = vld [vmem:[%s1919_s0 + $0x80] sm:$0xff]  ;;  %v33_v5 = vld [vmem:[%s1919_s0 + $0x88] sm:$0xff]  ;;  %1476 = vset.pattern.permute.xlu0 %v1509_v3  ;;  %v34_v24 = vld [vmem:[%s1919_s0 + $0x90] sm:$0xff] }
   0x3   :  { %v1340_v4 = vcombine.high %v16_v0, %v32_v1  ;;  %v1339_v6 = vcombine.low %v16_v0, %v32_v1  ;;  %v48_v7 = vld [vmem:[%s1919_s0 + $0x100] sm:$0xff]  ;;  %v1342_v9 = vcombine.high %v17_v2, %v33_v5  ;;  %v1341_v10 = vcombine.low %v17_v2, %v33_v5  ;;  %v49_v12 = vld [vmem:[%s1919_s0 + $0x108] sm:$0xff]  ;;  %v19_v25 = vld [vmem:[%s1919_s0 + $0x18] sm:$0xff] }
   0x4   :  { %v64_v8 = vld [vmem:[%s1919_s0 + $0x180] sm:$0xff]  ;;  %v65_v13 = vld [vmem:[%s1919_s0 + $0x188] sm:$0xff]  ;;  %v35_v26 = vld [vmem:[%s1919_s0 + $0x98] sm:$0xff]  ;;  %v1344_v28 = vcombine.high %v18_v23, %v34_v24  ;;  %v1343_v36 = vcombine.low %v18_v23, %v34_v24 }
   0x5   :  { %v1372_v11 = vcombine.high %v48_v7, %v64_v8  ;;  %v80_v14 = vld [vmem:[%s1919_s0 + $0x200] sm:$0x33]  ;;  %597 = vmatprep.subr.bf16.mxu0 %v1340_v4  ;;  %v1374_v15 = vcombine.high %v49_v12, %v65_v13  ;;  %v81_v16 = vld [vmem:[%s1919_s0 + $0x208] sm:$0x33]  ;;  %638 = vmatprep.subr.bf16.mxu1 %v1342_v9  ;;  %v1371_v17 = vcombine.low %v48_v7, %v64_v8  ;;  %v50_v31 = vld [vmem:[%s1919_s0 + $0x110] sm:$0xff] }
   0x6   :  { %598 = vmatpush1.bf16.msra.mxu0 %v1339_v6  ;;  %639 = vmatpush1.bf16.msra.mxu1 %v1341_v10  ;;  %v1373_v18 = vcombine.low %v49_v12, %v65_v13  ;;  %v1404_v19 = vcombine.high %v80_v14, %v80_v14  ;;  %v1403_v20 = vcombine.low %v80_v14, %v80_v14  ;;  %v66_v32 = vld [vmem:[%s1919_s0 + $0x190] sm:$0xff]  ;;  %v51_v33 = vld [vmem:[%s1919_s0 + $0x118] sm:$0xff]  ;;  %v1594_v35 = vld [vmem:[%s1920_s1] sm:$0xf] }
   0x7   :  { %599 = vmatprep.subr.bf16.mxu0 %v1372_v11  ;;  %640 = vmatprep.subr.bf16.mxu1 %v1374_v15  ;;  %v1406_v21 = vcombine.high %v81_v16, %v81_v16  ;;  %v1405_v22 = vcombine.low %v81_v16, %v81_v16  ;;  %v1346_v30 = vcombine.high %v19_v25, %v35_v26  ;;  %v67_v34 = vld [vmem:[%s1919_s0 + $0x198] sm:$0xff]  ;;  %v82_v40 = vld [vmem:[%s1919_s0 + $0x210] sm:$0x33]  ;;  %v20_v48 = vld [vmem:[%s1919_s0 + $0x20] sm:$0xff] }
   0x8   :  { %v502_v27 = vsel %vm500_vm0, %v1403_v20, 0  ;;  %v1345_v37 = vcombine.low %v19_v25, %v35_v26  ;;  %v1376_v38 = vcombine.high %v50_v31, %v66_v32  ;;  %v1378_v39 = vcombine.high %v51_v33, %v67_v34  ;;  %v83_v41 = vld [vmem:[%s1919_s0 + $0x218] sm:$0x33]  ;;  %v36_v49 = vld [vmem:[%s1919_s0 + $0xa0] sm:$0xff]  ;;  %v21_v50 = vld [vmem:[%s1919_s0 + $0x28] sm:$0xff] }
   0x9   :  { %v508_v29 = vsel %vm500_vm0, %v1405_v22, 0  ;;  %v1375_v42 = vcombine.low %v50_v31, %v66_v32  ;;  %v1377_v43 = vcombine.low %v51_v33, %v67_v34  ;;  %v1408_v44 = vcombine.high %v82_v40, %v82_v40  ;;  %v37_v51 = vld [vmem:[%s1919_s0 + $0xa8] sm:$0xff]  ;;  %v52_v56 = vld [vmem:[%s1919_s0 + $0x120] sm:$0xff]  ;;  %v22_v10 = vld [vmem:[%s1919_s0 + $0x30] sm:$0xff] }
   0xa   :  { %600 = vmatpush1.bf16.msra.mxu0 %v1371_v17  ;;  %641 = vmatpush1.bf16.msra.mxu1 %v1373_v18  ;;  %v1407_v45 = vcombine.low %v82_v40, %v82_v40  ;;  %v1410_v46 = vcombine.high %v83_v41, %v83_v41  ;;  %v1409_v47 = vcombine.low %v83_v41, %v83_v41  ;;  %v68_v57 = vld [vmem:[%s1919_s0 + $0x1a0] sm:$0xff]  ;;  %v53_v58 = vld [vmem:[%s1919_s0 + $0x128] sm:$0xff]  ;;  %v38_v11 = vld [vmem:[%s1919_s0 + $0xb0] sm:$0xff] }
   0xb   :  { %1435 = vmatprep.subr.msk.bf16.mxu0 %vm500_vm0, %v1404_v19  ;;  %1437 = vmatprep.subr.msk.bf16.mxu1 %vm500_vm0, %v1406_v21  ;;  %v1348_v53 = vcombine.high %v20_v48, %v36_v49  ;;  %v1350_v55 = vcombine.high %v21_v50, %v37_v51  ;;  %v69_v59 = vld [vmem:[%s1919_s0 + $0x1a8] sm:$0xff]  ;;  %v1347_v60 = vcombine.low %v20_v48, %v36_v49  ;;  %v84_v0 = vld [vmem:[%s1919_s0 + $0x220] sm:$0x33]  ;;  %v23_v12 = vld [vmem:[%s1919_s0 + $0x38] sm:$0xff] }
   0xc   :  { %v514_v52 = vsel %vm500_vm0, %v1407_v45, 0  ;;  %v520_v54 = vsel %vm500_vm0, %v1409_v47, 0  ;;  %v1349_v61 = vcombine.low %v21_v50, %v37_v51  ;;  %v1380_v62 = vcombine.high %v52_v56, %v68_v57  ;;  %v85_v1 = vld [vmem:[%s1919_s0 + $0x228] sm:$0x33]  ;;  %v1277_v4 = vld [vmem:[%s1921_s2] sm:$0xff]  ;;  %v39_v13 = vld [vmem:[%s1919_s0 + $0xb8] sm:$0xff] }
   0xd   :  { %v1382_v63 = vcombine.high %v53_v58, %v69_v59  ;;  %v1379_v2 = vcombine.low %v52_v56, %v68_v57  ;;  %v1381_v5 = vcombine.low %v53_v58, %v69_v59  ;;  %v1412_v6 = vcombine.high %v84_v0, %v84_v0  ;;  %1280 = vperm.xlu0 %1476, %v1277_v4   ;;  %v54_v18 = vld [vmem:[%s1919_s0 + $0x130] sm:$0xff]  ;;  %v55_v20 = vld [vmem:[%s1919_s0 + $0x138] sm:$0xff]  ;;  %v24_v34 = vld [vmem:[%s1919_s0 + $0x40] sm:$0xff] }
   0xe   :  { %602 = vmatpush1.bf16.msra.mxu0 %v502_v27  ;;  %643 = vmatpush1.bf16.msra.mxu1 %v508_v29  ;;  %v1411_v7 = vcombine.low %v84_v0, %v84_v0  ;;  %v1414_v8 = vcombine.high %v85_v1, %v85_v1  ;;  %v1413_v9 = vcombine.low %v85_v1, %v85_v1  ;;  %v70_v19 = vld [vmem:[%s1919_s0 + $0x1b0] sm:$0xff]  ;;  %v71_v21 = vld [vmem:[%s1919_s0 + $0x1b8] sm:$0xff]  ;;  %v57_v45 = vld [vmem:[%s1919_s0 + $0x148] sm:$0xff] }
   0xf   :  { %679 = vmatprep.subr.bf16.mxu0 %v1344_v28  ;;  %720 = vmatprep.subr.bf16.mxu1 %v1346_v30  ;;  %v1352_v15 = vcombine.high %v22_v10, %v38_v11  ;;  %v1354_v17 = vcombine.high %v23_v12, %v39_v13  ;;  %v1351_v22 = vcombine.low %v22_v10, %v38_v11  ;;  %v86_v26 = vld [vmem:[%s1919_s0 + $0x230] sm:$0x33]  ;;  %v87_v27 = vld [vmem:[%s1919_s0 + $0x238] sm:$0x33]  ;;  %v88_v51 = vld [vmem:[%s1919_s0 + $0x240] sm:$0x33] }
  0x10   :  { %v526_v14 = vsel %vm500_vm0, %v1411_v7, 0  ;;  %v532_v16 = vsel %vm500_vm0, %v1413_v9, 0  ;;  %v1353_v23 = vcombine.low %v23_v12, %v39_v13  ;;  %v1384_v24 = vcombine.high %v54_v18, %v70_v19  ;;  %v26_v59 = vld [vmem:[%s1919_s0 + $0x50] sm:$0xff]  ;;  %v75_v7 = vld [vmem:[%s1919_s0 + $0x1d8] sm:$0xff] }
  0x11   :  { %1436 = vmatmul.mubr.msk.bf16.vlgmr.msra.gmra.mrb[0].mxu0 %vm496_vm1, %v1594_v35  ;;  %1438 = vmatmul.mubr.msk.bf16.vlgmr.msra.gmra.mrb[0].mxu1 %vm496_vm1, %v1594_v35  ;;  %v1386_v25 = vcombine.high %v55_v20, %v71_v21  ;;  %v1383_v28 = vcombine.low %v54_v18, %v70_v19  ;;  %v1385_v29 = vcombine.low %v55_v20, %v71_v21  ;;  %v58_v4 = vld [vmem:[%s1919_s0 + $0x150] sm:$0xff]  ;;  %v91_v13 = vld [vmem:[%s1919_s0 + $0x258] sm:$0x33]  ;;  %v28_v20 = vld [vmem:[%s1919_s0 + $0x60] sm:$0xff] }
  0x12   :  { %680 = vmatpush1.bf16.msra.mxu0 %v1343_v36  ;;  %721 = vmatpush1.bf16.msra.mxu1 %v1345_v37  ;;  %v1416_v30 = vcombine.high %v86_v26, %v86_v26  ;;  %v1415_v31 = vcombine.low %v86_v26, %v86_v26  ;;  %v1418_v32 = vcombine.high %v87_v27, %v87_v27  ;;  %v40_v36 = vld [vmem:[%s1919_s0 + $0xc0] sm:$0xff]  ;;  %v25_v37 = vld [vmem:[%s1919_s0 + $0x48] sm:$0xff]  ;;  %v90_v12 = vld [vmem:[%s1919_s0 + $0x250] sm:$0x33] }
  0x13   :  { %681 = vmatprep.subr.bf16.mxu0 %v1376_v38  ;;  %722 = vmatprep.subr.bf16.mxu1 %v1378_v39  ;;  %v1417_v33 = vcombine.low %v87_v27, %v87_v27  ;;  %v41_v38 = vld [vmem:[%s1919_s0 + $0xc8] sm:$0xff]  ;;  %v1356_v40 = vcombine.high %v24_v34, %v40_v36  ;;  %v1355_v47 = vcombine.low %v24_v34, %v40_v36  ;;  %v44_v21 = vld [vmem:[%s1919_s0 + $0xe0] sm:$0xff] }
  0x14   :  { %711 = vmatprep.mubr.bf16.mxu0 %v1509_v3  ;;  %752 = vmatprep.mubr.bf16.mxu1 %v1509_v3  ;;  %v538_v39 = vsel %vm500_vm0, %v1415_v31, 0  ;;  %v1357_v48 = vcombine.low %v25_v37, %v41_v38  ;;  %v1419_v56 = vcombine.low %v88_v51, %v88_v51  ;;  %v1426_v18 = vcombine.high %v91_v13, %v91_v13  ;;  %v77_v31 = vld [vmem:[%s1919_s0 + $0x1e8] sm:$0xff] }
  0x15   :  { %v544_v41 = vsel %vm500_vm0, %v1417_v33, 0  ;;  %v1425_v19 = vcombine.low %v91_v13, %v91_v13 }
  0x16   :  { %682 = vmatpush1.bf16.msra.mxu0 %v1375_v42  ;;  %723 = vmatpush1.bf16.msra.mxu1 %v1377_v43  ;;  %v1358_v42 = vcombine.high %v25_v37, %v41_v38  ;;  %v56_v43 = vld [vmem:[%s1919_s0 + $0x140] sm:$0xff]  ;;  %v93_v38 = vld [vmem:[%s1919_s0 + $0x268] sm:$0x33] }
  0x17   :  { %1439 = vmatprep.subr.msk.bf16.mxu0 %vm500_vm0, %v1408_v44  ;;  %1441 = vmatprep.subr.msk.bf16.mxu1 %vm500_vm0, %v1410_v46  ;;  %v72_v44 = vld [vmem:[%s1919_s0 + $0x1c0] sm:$0xff]  ;;  %v73_v46 = vld [vmem:[%s1919_s0 + $0x1c8] sm:$0xff]  ;;  %v568_v26 = vsel %vm500_vm0, %v1425_v19, 0 }
  0x18   :  { %v1388_v49 = vcombine.high %v56_v43, %v72_v44  ;;  %v1390_v50 = vcombine.high %v57_v45, %v73_v46  ;;  %v92_v37 = vld [vmem:[%s1919_s0 + $0x260] sm:$0x33] }
  0x1a   :  { %684 = vmatpush1.bf16.msra.mxu0 %v514_v52  ;;  %725 = vmatpush1.bf16.msra.mxu1 %v520_v54  ;;  %v89_v52 = vld [vmem:[%s1919_s0 + $0x248] sm:$0x33]  ;;  %v1389_v54 = vcombine.low %v57_v45, %v73_v46  ;;  %v30_v45 = vld [vmem:[%s1919_s0 + $0x70] sm:$0xff] }
  0x1b   :  { %761 = vmatprep.subr.bf16.mxu0 %v1348_v53  ;;  %802 = vmatprep.subr.bf16.mxu1 %v1350_v55  ;;  %v1387_v53 = vcombine.low %v56_v43, %v72_v44  ;;  %v1420_v55 = vcombine.high %v88_v51, %v88_v51  ;;  %v1422_v57 = vcombine.high %v89_v52, %v89_v52  ;;  %v46_v46 = vld [vmem:[%s1919_s0 + $0xf0] sm:$0xff] }
  0x1c   :  { %v1421_v58 = vcombine.low %v89_v52, %v89_v52  ;;  %v1430_v43 = vcombine.high %v93_v38, %v93_v38  ;;  %v1429_v44 = vcombine.low %v93_v38, %v93_v38 }
  0x1d   :  { %1440 = vmatmul.mubr.msk.bf16.vlgmr.msra.gmra.mrb[4].mxu0 %vm496_vm1, %v1594_v35  ;;  %1442 = vmatmul.mubr.msk.bf16.vlgmr.msra.gmra.mrb[4].mxu1 %vm496_vm1, %v1594_v35 }
  0x1e   :  { %762 = vmatpush1.bf16.msra.mxu0 %v1347_v60  ;;  %803 = vmatpush1.bf16.msra.mxu1 %v1349_v61  ;;  %v42_v60 = vld [vmem:[%s1919_s0 + $0xd0] sm:$0xff]  ;;  %v27_v61 = vld [vmem:[%s1919_s0 + $0x58] sm:$0xff]  ;;  %v556_v1 = vsel %vm500_vm0, %v1421_v58, 0  ;;  %v580_v51 = vsel %vm500_vm0, %v1429_v44, 0 }
  0x1f   :  { %763 = vmatprep.subr.bf16.mxu0 %v1380_v62  ;;  %804 = vmatprep.subr.bf16.mxu1 %v1382_v63  ;;  %v43_v62 = vld [vmem:[%s1919_s0 + $0xd8] sm:$0xff]  ;;  %v550_v63 = vsel %vm500_vm0, %v1419_v56, 0  ;;  %v1360_v0 = vcombine.high %v26_v59, %v42_v60 }
  0x20   :  { %793 = vmatprep.mubr.bf16.mxu0 %v1509_v3  ;;  %834 = vmatprep.mubr.bf16.mxu1 %v1509_v3  ;;  %v1361_v9 = vcombine.low %v27_v61, %v43_v62  ;;  %v79_v56 = vld [vmem:[%s1919_s0 + $0x1f8] sm:$0xff] }
  0x22   :  { %764 = vmatpush1.bf16.msra.mxu0 %v1379_v2  ;;  %805 = vmatpush1.bf16.msra.mxu1 %v1381_v5  ;;  %v1362_v2 = vcombine.high %v27_v61, %v43_v62  ;;  %v74_v5 = vld [vmem:[%s1919_s0 + $0x1d0] sm:$0xff]  ;;  %v95_v62 = vld [vmem:[%s1919_s0 + $0x278] sm:$0x33] }
  0x23   :  { %1443 = vmatprep.subr.msk.bf16.mxu0 %vm500_vm0, %v1412_v6  ;;  %1445 = vmatprep.subr.msk.bf16.mxu1 %vm500_vm0, %v1414_v8  ;;  %v59_v6 = vld [vmem:[%s1919_s0 + $0x158] sm:$0xff]  ;;  %v1359_v8 = vcombine.low %v26_v59, %v42_v60  ;;  %v1392_v10 = vcombine.high %v58_v4, %v74_v5  ;;  %v94_v61 = vld [vmem:[%s1919_s0 + $0x270] sm:$0x33] }
  0x24   :  { %v1394_v11 = vcombine.high %v59_v6, %v75_v7 }
  0x26   :  { %766 = vmatpush1.bf16.msra.mxu0 %v526_v14  ;;  %807 = vmatpush1.bf16.msra.mxu1 %v532_v16  ;;  %v1391_v14 = vcombine.low %v58_v4, %v74_v5  ;;  %v1424_v16 = vcombine.high %v90_v12, %v90_v12  ;;  %v1434_v4 = vcombine.high %v95_v62, %v95_v62 }
  0x27   :  { %843 = vmatprep.subr.bf16.mxu0 %v1352_v15  ;;  %884 = vmatprep.subr.bf16.mxu1 %v1354_v17  ;;  %v1393_v15 = vcombine.low %v59_v6, %v75_v7  ;;  %v1423_v17 = vcombine.low %v90_v12, %v90_v12  ;;  %v1433_v5 = vcombine.low %v95_v62, %v95_v62 }
  0x29   :  { %1444 = vmatmul.mubr.msk.bf16.vlgmr.msra.gmra.mrb[8].mxu0 %vm496_vm1, %v1594_v35  ;;  %1446 = vmatmul.mubr.msk.bf16.vlgmr.msra.gmra.mrb[8].mxu1 %vm496_vm1, %v1594_v35  ;;  %v592_v7 = vsel %vm500_vm0, %v1433_v5, 0 }
  0x2a   :  { %844 = vmatpush1.bf16.msra.mxu0 %v1351_v22  ;;  %885 = vmatpush1.bf16.msra.mxu1 %v1353_v23  ;;  %v29_v22 = vld [vmem:[%s1919_s0 + $0x68] sm:$0xff] }
  0x2b   :  { %845 = vmatprep.subr.bf16.mxu0 %v1384_v24  ;;  %886 = vmatprep.subr.bf16.mxu1 %v1386_v25  ;;  %v45_v23 = vld [vmem:[%s1919_s0 + $0xe8] sm:$0xff]  ;;  %v562_v24 = vsel %vm500_vm0, %v1423_v17, 0  ;;  %v1364_v25 = vcombine.high %v28_v20, %v44_v21 }
  0x2c   :  { %875 = vmatprep.mubr.bf16.mxu0 %v1509_v3  ;;  %916 = vmatprep.mubr.bf16.mxu1 %v1509_v3  ;;  %v1366_v27 = vcombine.high %v29_v22, %v45_v23  ;;  %v1365_v33 = vcombine.low %v29_v22, %v45_v23 }
  0x2e   :  { %846 = vmatpush1.bf16.msra.mxu0 %v1383_v28  ;;  %887 = vmatpush1.bf16.msra.mxu1 %v1385_v29  ;;  %v60_v28 = vld [vmem:[%s1919_s0 + $0x160] sm:$0xff] }
  0x2f   :  { %1447 = vmatprep.subr.msk.bf16.mxu0 %vm500_vm0, %v1416_v30  ;;  %1449 = vmatprep.subr.msk.bf16.mxu1 %vm500_vm0, %v1418_v32  ;;  %v76_v29 = vld [vmem:[%s1919_s0 + $0x1e0] sm:$0xff]  ;;  %v61_v30 = vld [vmem:[%s1919_s0 + $0x168] sm:$0xff]  ;;  %v1363_v32 = vcombine.low %v28_v20, %v44_v21 }
  0x30   :  { %v1396_v34 = vcombine.high %v60_v28, %v76_v29  ;;  %v1398_v36 = vcombine.high %v61_v30, %v77_v31 }
  0x32   :  { %848 = vmatpush1.bf16.msra.mxu0 %v538_v39  ;;  %889 = vmatpush1.bf16.msra.mxu1 %v544_v41  ;;  %v1395_v39 = vcombine.low %v60_v28, %v76_v29  ;;  %v1428_v41 = vcombine.high %v92_v37, %v92_v37 }
  0x33   :  { %925 = vmatprep.subr.bf16.mxu0 %v1356_v40  ;;  %966 = vmatprep.subr.bf16.mxu1 %v1358_v42  ;;  %v1397_v40 = vcombine.low %v61_v30, %v77_v31  ;;  %v1427_v42 = vcombine.low %v92_v37, %v92_v37 }
  0x35   :  { %1448 = vmatmul.mubr.msk.bf16.vlgmr.msra.gmra.mrb[12].mxu0 %vm496_vm1, %v1594_v35  ;;  %1450 = vmatmul.mubr.msk.bf16.vlgmr.msra.gmra.mrb[12].mxu1 %vm496_vm1, %v1594_v35 }
  0x36   :  { %926 = vmatpush1.bf16.msra.mxu0 %v1355_v47  ;;  %967 = vmatpush1.bf16.msra.mxu1 %v1357_v48  ;;  %v31_v47 = vld [vmem:[%s1919_s0 + $0x78] sm:$0xff] }
  0x37   :  { %927 = vmatprep.subr.bf16.mxu0 %v1388_v49  ;;  %968 = vmatprep.subr.bf16.mxu1 %v1390_v50  ;;  %v47_v48 = vld [vmem:[%s1919_s0 + $0xf8] sm:$0xff]  ;;  %v574_v49 = vsel %vm500_vm0, %v1427_v42, 0  ;;  %v1368_v50 = vcombine.high %v30_v45, %v46_v46 }
  0x38   :  { %957 = vmatprep.mubr.bf16.mxu0 %v1509_v3  ;;  %998 = vmatprep.mubr.bf16.mxu1 %v1509_v3  ;;  %v1370_v52 = vcombine.high %v31_v47, %v47_v48  ;;  %v1369_v58 = vcombine.low %v31_v47, %v47_v48 }
  0x3a   :  { %928 = vmatpush1.bf16.msra.mxu0 %v1387_v53  ;;  %969 = vmatpush1.bf16.msra.mxu1 %v1389_v54  ;;  %v62_v53 = vld [vmem:[%s1919_s0 + $0x170] sm:$0xff] }
  0x3b   :  { %1451 = vmatprep.subr.msk.bf16.mxu0 %vm500_vm0, %v1420_v55  ;;  %1453 = vmatprep.subr.msk.bf16.mxu1 %vm500_vm0, %v1422_v57  ;;  %v78_v54 = vld [vmem:[%s1919_s0 + $0x1f0] sm:$0xff]  ;;  %v63_v55 = vld [vmem:[%s1919_s0 + $0x178] sm:$0xff]  ;;  %v1367_v57 = vcombine.low %v30_v45, %v46_v46 }
  0x3c   :  { %v1400_v59 = vcombine.high %v62_v53, %v78_v54  ;;  %v1402_v60 = vcombine.high %v63_v55, %v79_v56 }
  0x3e   :  { %930 = vmatpush1.bf16.msra.mxu0 %v550_v63  ;;  %971 = vmatpush1.bf16.msra.mxu1 %v556_v1  ;;  %v1399_v63 = vcombine.low %v62_v53, %v78_v54  ;;  %v1432_v1 = vcombine.high %v94_v61, %v94_v61 }
  0x3f   :  { %1007 = vmatprep.subr.bf16.mxu0 %v1360_v0  ;;  %1048 = vmatprep.subr.bf16.mxu1 %v1362_v2  ;;  %v1401_v0 = vcombine.low %v63_v55, %v79_v56  ;;  %v1431_v2 = vcombine.low %v94_v61, %v94_v61 }
  0x41   :  { %1452 = vmatmul.mubr.msk.bf16.vlgmr.msra.gmra.mrb[16].mxu0 %vm496_vm1, %v1594_v35  ;;  %1454 = vmatmul.mubr.msk.bf16.vlgmr.msra.gmra.mrb[16].mxu1 %vm496_vm1, %v1594_v35  ;;  %v586_v6 = vsel %vm500_vm0, %v1431_v2, 0 }
  0x42   :  { %1008 = vmatpush1.bf16.msra.mxu0 %v1359_v8  ;;  %1049 = vmatpush1.bf16.msra.mxu1 %v1361_v9 }
  0x43   :  { %1009 = vmatprep.subr.bf16.mxu0 %v1392_v10  ;;  %1050 = vmatprep.subr.bf16.mxu1 %v1394_v11 }
  0x44   :  { %1039 = vmatprep.mubr.bf16.mxu0 %v1509_v3  ;;  %1080 = vmatprep.mubr.bf16.mxu1 %v1509_v3 }
  0x46   :  { %1010 = vmatpush1.bf16.msra.mxu0 %v1391_v14  ;;  %1051 = vmatpush1.bf16.msra.mxu1 %v1393_v15 }
  0x47   :  { %1455 = vmatprep.subr.msk.bf16.mxu0 %vm500_vm0, %v1424_v16  ;;  %1457 = vmatprep.subr.msk.bf16.mxu1 %vm500_vm0, %v1426_v18 }
  0x4a   :  { %1012 = vmatpush1.bf16.msra.mxu0 %v562_v24  ;;  %1053 = vmatpush1.bf16.msra.mxu1 %v568_v26 }
  0x4b   :  { %1089 = vmatprep.subr.bf16.mxu0 %v1364_v25  ;;  %1130 = vmatprep.subr.bf16.mxu1 %v1366_v27 }
  0x4d   :  { %1456 = vmatmul.mubr.msk.bf16.vlgmr.msra.gmra.mrb[20].mxu0 %vm496_vm1, %v1594_v35  ;;  %1458 = vmatmul.mubr.msk.bf16.vlgmr.msra.gmra.mrb[20].mxu1 %vm496_vm1, %v1594_v35 }
  0x4e   :  { %1090 = vmatpush1.bf16.msra.mxu0 %v1363_v32  ;;  %1131 = vmatpush1.bf16.msra.mxu1 %v1365_v33 }
  0x4f   :  { %1091 = vmatprep.subr.bf16.mxu0 %v1396_v34  ;;  %1132 = vmatprep.subr.bf16.mxu1 %v1398_v36 }
  0x50   :  { %1121 = vmatprep.mubr.bf16.mxu0 %v1509_v3  ;;  %1162 = vmatprep.mubr.bf16.mxu1 %v1509_v3 }
  0x52   :  { %1092 = vmatpush1.bf16.msra.mxu0 %v1395_v39  ;;  %1133 = vmatpush1.bf16.msra.mxu1 %v1397_v40 }
  0x53   :  { %1459 = vmatprep.subr.msk.bf16.mxu0 %vm500_vm0, %v1428_v41  ;;  %1461 = vmatprep.subr.msk.bf16.mxu1 %vm500_vm0, %v1430_v43 }
  0x56   :  { %1094 = vmatpush1.bf16.msra.mxu0 %v574_v49  ;;  %1135 = vmatpush1.bf16.msra.mxu1 %v580_v51 }
  0x57   :  { %1171 = vmatprep.subr.bf16.mxu0 %v1368_v50  ;;  %1212 = vmatprep.subr.bf16.mxu1 %v1370_v52 }
  0x59   :  { %1460 = vmatmul.mubr.msk.bf16.vlgmr.msra.gmra.mrb[24].mxu0 %vm496_vm1, %v1594_v35  ;;  %1462 = vmatmul.mubr.msk.bf16.vlgmr.msra.gmra.mrb[24].mxu1 %vm496_vm1, %v1594_v35 }
  0x5a   :  { %1172 = vmatpush1.bf16.msra.mxu0 %v1367_v57  ;;  %1213 = vmatpush1.bf16.msra.mxu1 %v1369_v58 }
  0x5b   :  { %1173 = vmatprep.subr.bf16.mxu0 %v1400_v59  ;;  %1214 = vmatprep.subr.bf16.mxu1 %v1402_v60 }
  0x5c   :  { %1203 = vmatprep.mubr.bf16.mxu0 %v1509_v3  ;;  %1244 = vmatprep.mubr.bf16.mxu1 %v1509_v3 }
  0x5e   :  { %1174 = vmatpush1.bf16.msra.mxu0 %v1399_v63  ;;  %1215 = vmatpush1.bf16.msra.mxu1 %v1401_v0 }
  0x5f   :  { %1463 = vmatprep.subr.msk.bf16.mxu0 %vm500_vm0, %v1432_v1  ;;  %1465 = vmatprep.subr.msk.bf16.mxu1 %vm500_vm0, %v1434_v4 }
  0x62   :  { %1176 = vmatpush1.bf16.msra.mxu0 %v586_v6  ;;  %1217 = vmatpush1.bf16.msra.mxu1 %v592_v7 }
  0x65   :  { %1464 = vmatmul.mubr.msk.bf16.vlgmr.msra.gmra.mrb[28].mxu0 %vm496_vm1, %v1594_v35  ;;  %1466 = vmatmul.mubr.msk.bf16.vlgmr.msra.gmra.mrb[28].mxu1 %vm496_vm1, %v1594_v35 }
  0x8c   :  { %v1281_v0 = vpop.permute.xlu0 %1280 }
  0xe4   :  { %v1859_v8 = vpop.f32.mrb[0].mxu0  ;;  %v1861_v3 = vpop.f32.mrb[0].mxu1 }
  0xe5   :  { %v1863_v9 = vpop.f32.mrb[1].mxu0  ;;  %v1865_v10 = vpop.f32.mrb[1].mxu1 }
  0xe6   :  { %v635_v11 = vpop.f32.mrb[2].mxu0  ;;  %v676_v12 = vpop.f32.mrb[2].mxu1 }
  0xe7   :  { %v636_v13 = vpop.f32.mrb[3].mxu0  ;;  %v677_v14 = vpop.f32.mrb[3].mxu1 }
  0xf0   :  { %v1867_v15 = vpop.f32.mrb[4].mxu0  ;;  %v1869_v16 = vpop.f32.mrb[4].mxu1 }
  0xf1   :  { %v1871_v17 = vpop.f32.mrb[5].mxu0  ;;  %v1873_v18 = vpop.f32.mrb[5].mxu1 }
  0xf2   :  { %v717_v35 = vpop.f32.mrb[6].mxu0  ;;  %v758_v19 = vpop.f32.mrb[6].mxu1 }
  0xf3   :  { %v718_v20 = vpop.f32.mrb[7].mxu0  ;;  %v759_v21 = vpop.f32.mrb[7].mxu1 }
  0xfc   :  { %v795_v22 = vpop.f32.mrb[8].mxu0  ;;  %v836_v24 = vpop.f32.mrb[8].mxu1 }
  0xfd   :  { %v1253_v23 = vmax.f32 %v1859_v8, %v795_v22  ;;  %v797_v25 = vpop.f32.mrb[9].mxu0  ;;  %v1255_v26 = vmax.f32 %v1861_v3, %v836_v24  ;;  %v838_v28 = vpop.f32.mrb[9].mxu1 }
  0xfe   :  { %v1254_v27 = vmax.f32 %v1863_v9, %v797_v25  ;;  %v799_v29 = vpop.f32.mrb[10].mxu0  ;;  %v1256_v30 = vmax.f32 %v1865_v10, %v838_v28  ;;  %v840_v31 = vpop.f32.mrb[10].mxu1 }
  0xff   :  { %v800_v32 = vpop.f32.mrb[11].mxu0  ;;  %v841_v33 = vpop.f32.mrb[11].mxu1 }
 0x108   :  { %v1879_v34 = vpop.f32.mrb[12].mxu0  ;;  %v1883_v37 = vpop.f32.mrb[12].mxu1 }
 0x109   :  { %v1257_v36 = vmax.f32 %v1867_v15, %v1879_v34  ;;  %v1885_v38 = vpop.f32.mrb[13].mxu0  ;;  %v1259_v39 = vmax.f32 %v1869_v16, %v1883_v37  ;;  %v1891_v41 = vpop.f32.mrb[13].mxu1 }
 0x10a   :  { %v1258_v40 = vmax.f32 %v1871_v17, %v1885_v38  ;;  %v881_v42 = vpop.f32.mrb[14].mxu0  ;;  %v1260_v43 = vmax.f32 %v1873_v18, %v1891_v41  ;;  %v922_v44 = vpop.f32.mrb[14].mxu1 }
 0x10b   :  { %v882_v45 = vpop.f32.mrb[15].mxu0  ;;  %v923_v46 = vpop.f32.mrb[15].mxu1 }
 0x114   :  { %v959_v47 = vpop.f32.mrb[16].mxu0  ;;  %v1000_v48 = vpop.f32.mrb[16].mxu1 }
 0x115   :  { %v961_v49 = vpop.f32.mrb[17].mxu0  ;;  %v1002_v50 = vpop.f32.mrb[17].mxu1 }
 0x116   :  { %v963_v51 = vpop.f32.mrb[18].mxu0  ;;  %v1004_v52 = vpop.f32.mrb[18].mxu1 }
 0x117   :  { %v964_v53 = vpop.f32.mrb[19].mxu0  ;;  %v1005_v54 = vpop.f32.mrb[19].mxu1 }
 0x120   :  { %v1041_v55 = vpop.f32.mrb[20].mxu0  ;;  %v1082_v56 = vpop.f32.mrb[20].mxu1 }
 0x121   :  { %v1043_v57 = vpop.f32.mrb[21].mxu0  ;;  %v1084_v58 = vpop.f32.mrb[21].mxu1 }
 0x122   :  { %v1045_v59 = vpop.f32.mrb[22].mxu0  ;;  %v1086_v60 = vpop.f32.mrb[22].mxu1 }
 0x123   :  { %v1046_v61 = vpop.f32.mrb[23].mxu0  ;;  %v1087_v62 = vpop.f32.mrb[23].mxu1 }
 0x12c   :  { %v1123_v63 = vpop.f32.mrb[24].mxu0  ;;  %v1164_v2 = vpop.f32.mrb[24].mxu1 }
 0x12d   :  { %v1261_v1 = vmax.f32 %v959_v47, %v1123_v63  ;;  %v1125_v4 = vpop.f32.mrb[25].mxu0  ;;  %v1263_v5 = vmax.f32 %v1000_v48, %v1164_v2  ;;  %v1166_v7 = vpop.f32.mrb[25].mxu1 }
 0x12e   :  { %v1262_v6 = vmax.f32 %v961_v49, %v1125_v4  ;;  %v1127_v8 = vpop.f32.mrb[26].mxu0  ;;  %v1264_v9 = vmax.f32 %v1002_v50, %v1166_v7  ;;  %v1168_v10 = vpop.f32.mrb[26].mxu1 }
 0x12f   :  { %v1269_v3 = vmax.f32 %v1253_v23, %v1261_v1  ;;  %v1128_v11 = vpop.f32.mrb[27].mxu0  ;;  %v1271_v12 = vmax.f32 %v1255_v26, %v1263_v5  ;;  %v1169_v14 = vpop.f32.mrb[27].mxu1 }
 0x130   :  { %v1270_v13 = vmax.f32 %v1254_v27, %v1262_v6  ;;  %v1272_v35 = vmax.f32 %v1256_v30, %v1264_v9 }
 0x131   :  { %v1283_v19 = vadd.f32 %v1281_v0, %v1269_v3  ;;  %v1285_v21 = vadd.f32 %v1281_v0, %v1271_v12 }
 0x132   :  { %v1284_v20 = vadd.f32 %v1281_v0, %v1270_v13  ;;  %v1286_v22 = vadd.f32 %v1281_v0, %v1272_v35 }
 0x133   :  { %v1291_v24 = vmax.f32 %v1283_v19, 0.0  ;;  %v1293_v28 = vmax.f32 %v1285_v21, 0.0 }
 0x134   :  { %v1292_v25 = vmax.f32 %v1284_v20, 0.0  ;;  %v1294_v29 = vmax.f32 %v1286_v22, 0.0 }
 0x136   :  { %v1471_v31 = vpack.c.bf16 %v1292_v25, %v1291_v24  ;;  %v1472_v32 = vpack.c.bf16 %v1294_v29, %v1293_v28 }
 0x138   :  { %v1205_v33 = vpop.f32.mrb[28].mxu0  ;;  %1331 = vst [vmem:[%s1922_s3] sm:$0xff] %v1471_v31  ;;  %v1246_v26 = vpop.f32.mrb[28].mxu1  ;;  %1332 = vst [vmem:[%s1922_s3 + $0x8] sm:$0xff] %v1472_v32 }
 0x139   :  { %v1265_v23 = vmax.f32 %v1041_v55, %v1205_v33  ;;  %v1207_v27 = vpop.f32.mrb[29].mxu0  ;;  %v1267_v30 = vmax.f32 %v1082_v56, %v1246_v26  ;;  %v1248_v44 = vpop.f32.mrb[29].mxu1 }
 0x13a   :  { %v1266_v42 = vmax.f32 %v1043_v57, %v1207_v27  ;;  %v1209_v45 = vpop.f32.mrb[30].mxu0  ;;  %v1268_v47 = vmax.f32 %v1084_v58, %v1248_v44  ;;  %v1250_v48 = vpop.f32.mrb[30].mxu1 }
 0x13b   :  { %v1273_v46 = vmax.f32 %v1257_v36, %v1265_v23  ;;  %v1210_v49 = vpop.f32.mrb[31].mxu0  ;;  %v1275_v50 = vmax.f32 %v1259_v39, %v1267_v30  ;;  %v1251_v52 = vpop.f32.mrb[31].mxu1 }
 0x13c   :  { %v1274_v51 = vmax.f32 %v1258_v40, %v1266_v42  ;;  %v1276_v54 = vmax.f32 %v1260_v43, %v1268_v47 }
 0x13d   :  { %v1287_v53 = vadd.f32 %v1281_v0, %v1273_v46  ;;  %v1289_v55 = vadd.f32 %v1281_v0, %v1275_v50 }
 0x13e   :  { %v1288_v15 = vadd.f32 %v1281_v0, %v1274_v51  ;;  %v1290_v36 = vadd.f32 %v1281_v0, %v1276_v54 }
 0x13f   :  { %v1295_v34 = vmax.f32 %v1287_v53, 0.0  ;;  %v1297_v56 = vmax.f32 %v1289_v55, 0.0 }
 0x140   :  { %v1296_v57 = vmax.f32 %v1288_v15, 0.0  ;;  %v1298_v58 = vmax.f32 %v1290_v36, 0.0 }
 0x142   :  { %v1473_v59 = vpack.c.bf16 %v1296_v57, %v1295_v34  ;;  %v1474_v16 = vpack.c.bf16 %v1298_v58, %v1297_v56 }
 0x144   :  { %1333 = vst [vmem:[%s1922_s3 + $0x10] sm:$0xff] %v1473_v59  ;;  %1334 = vst [vmem:[%s1922_s3 + $0x18] sm:$0xff] %v1474_v16 }

// kernel: conv_lstm_classifier_forward.3
= control target key start
LH: loop header
LB: loop body
LE: loop exit
PB: predicated region body
PF: predicated region fallthrough
CT: control target
= control target key end

     0   :  { %vm1212_vm0 = vcmask 130048   ;;  %vm3592_vm1 = vmmov 0   ;;  %vm1333_vm2 = vcmask 523264   ;;  %s3594_s22 = smov 64   ;;  %s3595_s23 = smov 32   ;;  %vm1436_vm3 = vcmask 261120   ;;  %s4379_s1 = inlined_call_operand.vmem [shape: bf16[1152,64], index: 1, kind: input, shape index: {}]   ;;  %s4380_s0 = inlined_call_operand.vmem [shape: bf16[64,1152], index: 0, kind: input, shape index: {}]   ;;  %s4381_s3 = inlined_call_operand.vmem [shape: bf16[64,16], index: 3, kind: input, shape index: {}]   ;;  %s4382_s4 = inlined_call_operand.vmem [shape: bf16[64,128], index: 4, kind: input, shape index: {}]   ;;  %s4383_s2 = inlined_call_operand.vmem [shape: f32[1,64], index: 2, kind: input, shape index: {}]   ;;  %s4384_s5 = inlined_call_operand.vmem [shape: bf16[32,128], index: 5, kind: input, shape index: {}]   ;;  %s4385_s6 = inlined_call_operand.vmem [shape: f32[1,128], index: 6, kind: input, shape index: {}]   ;;  %s4386_s7 = inlined_call_operand.vmem [shape: bf16[64,128], index: 7, kind: input, shape index: {}]   ;;  %s4387_s8 = inlined_call_operand.vmem [shape: f32[1,128], index: 8, kind: input, shape index: {}]   ;;  %s4388_s9 = inlined_call_operand.vmem [shape: f32[1,32], index: 9, kind: input, shape index: {}]   ;;  %s4389_s10 = inlined_call_operand.<no memory space> [shape: f32[1,1], index: 10, kind: input, shape index: {}]   ;;  %s4390_s11 = inlined_call_operand.vmem [shape: f32[2,1], index: 11, kind: output, shape index: {}]  }
   0x1   :  { %v3320_v0 = vld [vmem:[%s4379_s1 + $0x40] sm:$0xff]   ;;  %v3324_v4 = vld [vmem:[%s4379_s1 + $0x48] sm:$0xff]   ;;  %v3328_v8 = vld [vmem:[%s4379_s1 + $0x50] sm:$0xff]   ;;  %s3596_s15 = smov 96   ;;  %vm2682_vm4 = vcmask 1024  }
   0x2   :  { %v3321_v1 = vld [vmem:[%s4379_s1 + $0xc0] sm:$0xff]   ;;  %2855 = vmatprep.subr.bf16.mxu0 %v3320_v0  ;;  %v3325_v5 = vld [vmem:[%s4379_s1 + $0xc8] sm:$0xff]   ;;  %v3329_v9 = vld [vmem:[%s4379_s1 + $0xd0] sm:$0xff]  }
   0x3   :  { %v3322_v2 = vld [vmem:[%s4379_s1] sm:$0xff]   ;;  %2895 = vmatprep.subr.bf16.mxu1 %v3321_v1  ;;  %v3326_v6 = vld [vmem:[%s4379_s1 + $0x8] sm:$0xff]   ;;  %v3330_v10 = vld [vmem:[%s4379_s1 + $0x10] sm:$0xff]  }
   0x4   :  { %v3323_v3 = vld [vmem:[%s4379_s1 + $0x80] sm:$0xff]   ;;  %2856 = vmatpush3.bf16.msra.mxu0 %v3322_v2  ;;  %v3327_v7 = vld [vmem:[%s4379_s1 + $0x88] sm:$0xff]   ;;  %v3331_v11 = vld [vmem:[%s4379_s1 + $0x90] sm:$0xff]  }
   0x5   :  { %2896 = vmatpush3.bf16.msra.mxu1 %v3323_v3  ;;  %2857 = vmatprep.subr.bf16.mxu0 %v3324_v4  ;;  %v3332_v12 = vld [vmem:[%s4379_s1 + $0x58] sm:$0xff]   ;;  %v3336_v16 = vld [vmem:[%s4379_s1 + $0x60] sm:$0xff]   ;;  %v3340_v20 = vld [vmem:[%s4379_s1 + $0x68] sm:$0xff]  }
   0x6   :  { %2897 = vmatprep.subr.bf16.mxu1 %v3325_v5  ;;  %v3333_v13 = vld [vmem:[%s4379_s1 + $0xd8] sm:$0xff]   ;;  %v3337_v17 = vld [vmem:[%s4379_s1 + $0xe0] sm:$0xff]   ;;  %v3341_v21 = vld [vmem:[%s4379_s1 + $0xe8] sm:$0xff]  }
   0x7   :  { %v3334_v14 = vld [vmem:[%s4379_s1 + $0x18] sm:$0xff]   ;;  %v3338_v18 = vld [vmem:[%s4379_s1 + $0x20] sm:$0xff]   ;;  %v3342_v22 = vld [vmem:[%s4379_s1 + $0x28] sm:$0xff]  }
   0x8   :  { %2858 = vmatpush3.bf16.msra.mxu0 %v3326_v6  ;;  %v3335_v15 = vld [vmem:[%s4379_s1 + $0x98] sm:$0xff]   ;;  %v3339_v19 = vld [vmem:[%s4379_s1 + $0xa0] sm:$0xff]   ;;  %v3343_v23 = vld [vmem:[%s4379_s1 + $0xa8] sm:$0xff]  }
   0x9   :  { %2898 = vmatpush3.bf16.msra.mxu1 %v3327_v7  ;;  %2859 = vmatprep.subr.bf16.mxu0 %v3328_v8  ;;  %v3344_v24 = vld [vmem:[%s4379_s1 + $0x70] sm:$0xff]   ;;  %v3348_v28 = vld [vmem:[%s4379_s1 + $0x78] sm:$0xff]   ;;  %v3352_v32 = vld [vmem:[%s4380_s0] ss:$36 sps:$4 sm:$0xff]  }
   0xa   :  { %2899 = vmatprep.subr.bf16.mxu1 %v3329_v9  ;;  %v3345_v25 = vld [vmem:[%s4379_s1 + $0xf0] sm:$0xff]   ;;  %v3349_v29 = vld [vmem:[%s4379_s1 + $0xf8] sm:$0xff]   ;;  %v3354_v33 = vld [vmem:[%s4380_s0 + $0x4] ss:$36 sps:$4 sm:$0xff]  }
   0xb   :  { %v3346_v26 = vld [vmem:[%s4379_s1 + $0x30] sm:$0xff]   ;;  %v3350_v30 = vld [vmem:[%s4379_s1 + $0x38] sm:$0xff]   ;;  %v3355_v34 = vld [vmem:[%s4380_s0 + $0x8] ss:$36 sps:$4 sm:$0xff]   ;;  %873 = vmatprep.mubr.bf16.mxu0 %v3354_v33 }
   0xc   :  { %2860 = vmatpush3.bf16.msra.mxu0 %v3330_v10  ;;  %v3347_v27 = vld [vmem:[%s4379_s1 + $0xb0] sm:$0xff]   ;;  %v3351_v31 = vld [vmem:[%s4379_s1 + $0xb8] sm:$0xff]   ;;  %v3358_v36 = vld [vmem:[%s4379_s1 + $0x140] sm:$0xff]  }
   0xd   :  { %2900 = vmatpush3.bf16.msra.mxu1 %v3331_v11  ;;  %2861 = vmatprep.subr.bf16.mxu0 %v3332_v12  ;;  %v3357_v35 = vld [vmem:[%s4380_s0 + $0xc] ss:$36 sps:$4 sm:$0xff]   ;;  %v3359_v37 = vld [vmem:[%s4379_s1 + $0x100] sm:$0xff]   ;;  %v3367_v44 = vld [vmem:[%s4380_s0 + $0x54] ss:$36 sps:$4 sm:$0xff]  }
   0xe   :  { %2901 = vmatprep.subr.bf16.mxu1 %v3333_v13  ;;  %938 = vmatprep.mubr.bf16.mxu1 %v3357_v35  ;;  %v3360_v38 = vld [vmem:[%s4379_s1 + $0x1c0] sm:$0xff]   ;;  %v3362_v40 = vld [vmem:[%s4379_s1 + $0x148] sm:$0xff]   ;;  %v3371_v47 = vld [vmem:[%s4380_s0 + $0x50] ss:$36 sps:$4 sm:$0xff]  }
   0xf   :  { %v3361_v39 = vld [vmem:[%s4379_s1 + $0x180] sm:$0xff]   ;;  %v3363_v41 = vld [vmem:[%s4379_s1 + $0x108] sm:$0xff]   ;;  %v3372_v48 = vld [vmem:[%s4379_s1 + $0x150] sm:$0xff]  }
  0x10   :  { %2862 = vmatpush3.bf16.msra.mxu0 %v3334_v14  ;;  %v3364_v42 = vld [vmem:[%s4379_s1 + $0x1c8] sm:$0xff]   ;;  %v3373_v49 = vld [vmem:[%s4379_s1 + $0x110] sm:$0xff]   ;;  %v3376_v52 = vld [vmem:[%s4379_s1 + $0x158] sm:$0xff]  }
  0x11   :  { %2902 = vmatpush3.bf16.msra.mxu1 %v3335_v15  ;;  %2863 = vmatprep.subr.bf16.mxu0 %v3336_v16  ;;  %v3365_v43 = vld [vmem:[%s4380_s0 + $0x4c] ss:$36 sps:$4 sm:$0xff]   ;;  %v3377_v53 = vld [vmem:[%s4379_s1 + $0x118] sm:$0xff]   ;;  %v3386_v60 = vld [vmem:[%s4379_s1 + $0x160] sm:$0xff]  }
  0x12   :  { %2903 = vmatprep.subr.bf16.mxu1 %v3337_v17  ;;  %v3369_v45 = vld [vmem:[%s4379_s1 + $0x188] sm:$0xff]   ;;  %v3374_v50 = vld [vmem:[%s4379_s1 + $0x1d0] sm:$0xff]   ;;  %v3378_v54 = vld [vmem:[%s4379_s1 + $0x1d8] sm:$0xff]  }
  0x13   :  { %v3370_v46 = vld [vmem:[%s4380_s0 + $0x48] ss:$36 sps:$4 sm:$0xff]   ;;  %v3375_v51 = vld [vmem:[%s4379_s1 + $0x190] sm:$0xff]   ;;  %v3381_v56 = vld [vmem:[%s4380_s0 + $0x9c] ss:$36 sps:$4 sm:$0xff]  }
  0x14   :  { %2864 = vmatpush3.bf16.msra.mxu0 %v3338_v18  ;;  %v3379_v55 = vld [vmem:[%s4380_s0 + $0x94] ss:$36 sps:$4 sm:$0xff]   ;;  %v3387_v61 = vld [vmem:[%s4379_s1 + $0x120] sm:$0xff]   ;;  %v3390_v0 = vld [vmem:[%s4379_s1 + $0x168] sm:$0xff]  }
  0x15   :  { %2904 = vmatpush3.bf16.msra.mxu1 %v3339_v19  ;;  %2865 = vmatprep.subr.bf16.mxu0 %v3340_v20  ;;  %v3383_v57 = vld [vmem:[%s4379_s1 + $0x198] sm:$0xff]   ;;  %v3384_v58 = vld [vmem:[%s4380_s0 + $0x90] ss:$36 sps:$4 sm:$0xff]   ;;  %v3388_v62 = vld [vmem:[%s4379_s1 + $0x1e0] sm:$0xff]  }
  0x16   :  { %2905 = vmatprep.subr.bf16.mxu1 %v3341_v21  ;;  %v3385_v59 = vld [vmem:[%s4380_s0 + $0x98] ss:$36 sps:$4 sm:$0xff]   ;;  %v3389_v63 = vld [vmem:[%s4379_s1 + $0x1a0] sm:$0xff]   ;;  %v3391_v1 = vld [vmem:[%s4379_s1 + $0x128] sm:$0xff]  }
  0x17   :  { %v3392_v2 = vld [vmem:[%s4379_s1 + $0x1e8] sm:$0xff]   ;;  %v3393_v3 = vld [vmem:[%s4380_s0 + $0xdc] ss:$36 sps:$4 sm:$0xff]   ;;  %v3400_v8 = vld [vmem:[%s4379_s1 + $0x170] sm:$0xff]  }
  0x18   :  { %2866 = vmatpush3.bf16.msra.mxu0 %v3342_v22  ;;  %v3395_v4 = vld [vmem:[%s4380_s0 + $0xe4] ss:$36 sps:$4 sm:$0xff]   ;;  %v3398_v6 = vld [vmem:[%s4380_s0 + $0xd8] ss:$36 sps:$4 sm:$0xff]   ;;  %v3401_v9 = vld [vmem:[%s4379_s1 + $0x130] sm:$0xff]  }
  0x19   :  { %2906 = vmatpush3.bf16.msra.mxu1 %v3343_v23  ;;  %2867 = vmatprep.subr.bf16.mxu0 %v3344_v24  ;;  %v3397_v5 = vld [vmem:[%s4379_s1 + $0x1a8] sm:$0xff]   ;;  %v3399_v7 = vld [vmem:[%s4380_s0 + $0xe0] ss:$36 sps:$4 sm:$0xff]   ;;  %v3402_v10 = vld [vmem:[%s4379_s1 + $0x1f0] sm:$0xff]  }
  0x1a   :  { %2907 = vmatprep.subr.bf16.mxu1 %v3345_v25  ;;  %v3403_v11 = vld [vmem:[%s4379_s1 + $0x1b0] sm:$0xff]   ;;  %v3404_v12 = vld [vmem:[%s4379_s1 + $0x178] sm:$0xff]   ;;  %v3411_v18 = vld [vmem:[%s4379_s1 + $0x200] sm:$0xff]  }
  0x1b   :  { %v3405_v13 = vld [vmem:[%s4379_s1 + $0x138] sm:$0xff]   ;;  %v3407_v15 = vld [vmem:[%s4380_s0 + $0x10] ss:$36 sps:$4 sm:$0xff]   ;;  %v3415_v21 = vld [vmem:[%s4379_s1 + $0x208] sm:$0xff]  }
  0x1c   :  { %2868 = vmatpush3.bf16.msra.mxu0 %v3346_v26  ;;  %v3406_v14 = vld [vmem:[%s4379_s1 + $0x1f8] sm:$0xff]   ;;  %v3419_v24 = vld [vmem:[%s4379_s1 + $0x210] sm:$0xff]   ;;  %v3420_v25 = vld [vmem:[%s4380_s0 + $0x64] ss:$36 sps:$4 sm:$0xff]  }
  0x1d   :  { %2908 = vmatpush3.bf16.msra.mxu1 %v3347_v27  ;;  %2869 = vmatprep.subr.bf16.mxu0 %v3348_v28  ;;  %v3409_v16 = vld [vmem:[%s4380_s0 + $0x14] ss:$36 sps:$4 sm:$0xff]   ;;  %v3414_v20 = vld [vmem:[%s4380_s0 + $0x1c] ss:$36 sps:$4 sm:$0xff]   ;;  %v3424_v27 = vld [vmem:[%s4380_s0 + $0xa4] ss:$36 sps:$4 sm:$0xff]  }
  0x1e   :  { %2909 = vmatprep.subr.bf16.mxu1 %v3349_v29  ;;  %v3410_v17 = vld [vmem:[%s4379_s1 + $0x1b8] sm:$0xff]   ;;  %v3422_v28 = vld [vmem:[%s4380_s0 + $0x60] ss:$36 sps:$4 sm:$0xff]   ;;  %v3428_v29 = vld [vmem:[%s4380_s0 + $0xac] ss:$36 sps:$4 sm:$0xff]  }
  0x1f   :  { %v3412_v19 = vld [vmem:[%s4380_s0 + $0x18] ss:$36 sps:$4 sm:$0xff]   ;;  %v3431_v33 = vld [vmem:[%s4379_s1 + $0x228] sm:$0xff]  }
  0x20   :  { %2870 = vmatpush3.bf16.msra.mxu0 %v3350_v30  ;;  %v3416_v22 = vld [vmem:[%s4380_s0 + $0x5c] ss:$36 sps:$4 sm:$0xff]   ;;  %v3436_v35 = vld [vmem:[%s4380_s0 + $0xf4] ss:$36 sps:$4 sm:$0xff]  }
  0x21   :  { %2910 = vmatpush3.bf16.msra.mxu1 %v3351_v31  ;;  %2935 = vmatprep.subr.bf16.mxu0 %v3358_v36  ;;  %v3418_v23 = vld [vmem:[%s4380_s0 + $0x58] ss:$36 sps:$4 sm:$0xff]   ;;  %v3427_v30 = vld [vmem:[%s4379_s1 + $0x220] sm:$0xff]   ;;  %v3435_v36 = vld [vmem:[%s4379_s1 + $0x230] sm:$0xff]  }
  0x22   :  { %2975 = vmatprep.subr.bf16.mxu1 %v3360_v38  ;;  %v3423_v26 = vld [vmem:[%s4379_s1 + $0x218] sm:$0xff]   ;;  %v3426_v31 = vld [vmem:[%s4380_s0 + $0xa0] ss:$36 sps:$4 sm:$0xff]  }
  0x23   :  { %874 = vmatmul.mubr.bf16.vlgmr.msra.gmra.mrb[0].mxu0 %v3352_v32  ;;  %v3432_v32 = vld [vmem:[%s4380_s0 + $0xec] ss:$36 sps:$4 sm:$0xff]   ;;  %v3440_v38 = vld [vmem:[%s4380_s0 + $0x20] ss:$36 sps:$4 sm:$0xff]  }
  0x24   :  { %939 = vmatmul.mubr.bf16.vlgmr.msra.gmra.mrb[0].mxu1 %v3355_v34  ;;  %2936 = vmatpush3.bf16.msra.mxu0 %v3359_v37  ;;  %v3430_v34 = vld [vmem:[%s4380_s0 + $0xa8] ss:$36 sps:$4 sm:$0xff]  }
  0x25   :  { %2976 = vmatpush3.bf16.msra.mxu1 %v3361_v39  ;;  %2937 = vmatprep.subr.bf16.mxu0 %v3362_v40  ;;  %v3434_v37 = vld [vmem:[%s4380_s0 + $0xe8] ss:$36 sps:$4 sm:$0xff]   ;;  %v3439_v39 = vld [vmem:[%s4379_s1 + $0x238] sm:$0xff]   ;;  %v3438_v40 = vld [vmem:[%s4380_s0 + $0xf0] ss:$36 sps:$4 sm:$0xff]  }
  0x26   :  { %2977 = vmatprep.subr.bf16.mxu1 %v3364_v42  ;;  %881 = vmatprep.mubr.bf16.mxu0 %v3365_v43  ;;  %v3442_v42 = vld [vmem:[%s4380_s0 + $0xb0] ss:$36 sps:$4 sm:$0xff]   ;;  %v3443_v43 = vld [vmem:[%s4380_s0 + $0xf8] ss:$36 sps:$4 sm:$0xff]  }
  0x27   :  { %946 = vmatprep.mubr.bf16.mxu1 %v3367_v44  ;;  %v3444_v44 = vld [vmem:[%s4381_s3] sm:$0xff]  }
  0x28   :  { %2938 = vmatpush3.bf16.msra.mxu0 %v3363_v41  ;;  %v3441_v41 = vld [vmem:[%s4380_s0 + $0x68] ss:$36 sps:$4 sm:$0xff]  }
  0x29   :  { %2978 = vmatpush3.bf16.msra.mxu1 %v3369_v45  ;;  %2939 = vmatprep.subr.bf16.mxu0 %v3372_v48  ;;  %v3446_v45 = vld [vmem:[%s4382_s4] sm:$0xff]  }
  0x2a   :  { %2979 = vmatprep.subr.bf16.mxu1 %v3374_v50 }
  0x2b   :  { %882 = vmatmul.mubr.bf16.gmra.mrb[4].mxu0 %v3370_v46  ;;  %v3447_v46 = vld [vmem:[%s4382_s4 + $0x8] sm:$0xff]  }
  0x2c   :  { %947 = vmatmul.mubr.bf16.gmra.mrb[4].mxu1 %v3371_v47  ;;  %2940 = vmatpush3.bf16.msra.mxu0 %v3373_v49  ;;  %v3448_v47 = vld [vmem:[%s4382_s4 + $0x10] sm:$0xff]  }
  0x2d   :  { %2980 = vmatpush3.bf16.msra.mxu1 %v3375_v51  ;;  %2941 = vmatprep.subr.bf16.mxu0 %v3376_v52 }
  0x2e   :  { %2981 = vmatprep.subr.bf16.mxu1 %v3378_v54  ;;  %889 = vmatprep.mubr.bf16.mxu0 %v3379_v55 }
  0x2f   :  { %954 = vmatprep.mubr.bf16.mxu1 %v3381_v56 }
  0x30   :  { %2942 = vmatpush3.bf16.msra.mxu0 %v3377_v53 }
  0x31   :  { %2982 = vmatpush3.bf16.msra.mxu1 %v3383_v57  ;;  %2943 = vmatprep.subr.bf16.mxu0 %v3386_v60 }
  0x32   :  { %2983 = vmatprep.subr.bf16.mxu1 %v3388_v62 }
  0x33   :  { %890 = vmatmul.mubr.bf16.gmra.mrb[8].mxu0 %v3384_v58 }
  0x34   :  { %955 = vmatmul.mubr.bf16.gmra.mrb[8].mxu1 %v3385_v59  ;;  %2944 = vmatpush3.bf16.msra.mxu0 %v3387_v61 }
  0x35   :  { %2984 = vmatpush3.bf16.msra.mxu1 %v3389_v63  ;;  %2945 = vmatprep.subr.bf16.mxu0 %v3390_v0 }
  0x36   :  { %2985 = vmatprep.subr.bf16.mxu1 %v3392_v2  ;;  %897 = vmatprep.mubr.bf16.mxu0 %v3393_v3 }
  0x37   :  { %962 = vmatprep.mubr.bf16.mxu1 %v3395_v4 }
  0x38   :  { %2946 = vmatpush3.bf16.msra.mxu0 %v3391_v1 }
  0x39   :  { %2986 = vmatpush3.bf16.msra.mxu1 %v3397_v5  ;;  %2947 = vmatprep.subr.bf16.mxu0 %v3400_v8 }
  0x3a   :  { %2987 = vmatprep.subr.bf16.mxu1 %v3402_v10 }
  0x3b   :  { %898 = vmatmul.mubr.bf16.gmra.mrb[12].mxu0 %v3398_v6 }
  0x3c   :  { %963 = vmatmul.mubr.bf16.gmra.mrb[12].mxu1 %v3399_v7  ;;  %2948 = vmatpush3.bf16.msra.mxu0 %v3401_v9 }
  0x3d   :  { %2988 = vmatpush3.bf16.msra.mxu1 %v3403_v11  ;;  %2949 = vmatprep.subr.bf16.mxu0 %v3404_v12 }
  0x3e   :  { %2989 = vmatprep.subr.bf16.mxu1 %v3406_v14  ;;  %1003 = vmatprep.mubr.bf16.mxu0 %v3409_v16 }
  0x3f   :  { %1068 = vmatprep.mubr.bf16.mxu1 %v3414_v20 }
  0x40   :  { %2950 = vmatpush3.bf16.msra.mxu0 %v3405_v13 }
  0x41   :  { %2990 = vmatpush3.bf16.msra.mxu1 %v3410_v17  ;;  %3104 = vmatprep.subr.bf16.mxu0 %v3411_v18 }
  0x43   :  { %1004 = vmatmul.mubr.bf16.vlgmr.msra.gmra.mrb[16].mxu0 %v3407_v15 }
  0x44   :  { %3105 = vmatpush3.bf16.msra.mxu0 %v3411_v18  ;;  %1069 = vmatmul.mubr.bf16.vlgmr.msra.gmra.mrb[16].mxu1 %v3412_v19 }
  0x45   :  { %3106 = vmatprep.subr.bf16.mxu0 %v3415_v21  ;;  %1011 = vmatprep.mubr.bf16.mxu0 %v3416_v22 }
  0x46   :  { %1076 = vmatprep.mubr.bf16.mxu1 %v3420_v25 }
  0x48   :  { %3107 = vmatpush3.bf16.msra.mxu0 %v3415_v21 }
  0x49   :  { %3108 = vmatprep.subr.bf16.mxu0 %v3419_v24 }
  0x4b   :  { %1012 = vmatmul.mubr.bf16.gmra.mrb[20].mxu0 %v3418_v23 }
  0x4c   :  { %1019 = vmatprep.mubr.bf16.mxu0 %v3424_v27  ;;  %3109 = vmatpush3.bf16.msra.mxu0 %v3419_v24 }
  0x4d   :  { %3110 = vmatprep.subr.bf16.mxu0 %v3423_v26  ;;  %1077 = vmatmul.mubr.bf16.gmra.mrb[20].mxu1 %v3422_v28 }
  0x4e   :  { %1084 = vmatprep.mubr.bf16.mxu1 %v3428_v29 }
  0x50   :  { %3111 = vmatpush3.bf16.msra.mxu0 %v3423_v26 }
  0x51   :  { %3112 = vmatprep.subr.bf16.mxu0 %v3427_v30 }
  0x53   :  { %1020 = vmatmul.mubr.bf16.gmra.mrb[24].mxu0 %v3426_v31 }
  0x54   :  { %1027 = vmatprep.mubr.bf16.mxu0 %v3432_v32  ;;  %3113 = vmatpush3.bf16.msra.mxu0 %v3427_v30 }
  0x55   :  { %3114 = vmatprep.subr.bf16.mxu0 %v3431_v33  ;;  %1085 = vmatmul.mubr.bf16.gmra.mrb[24].mxu1 %v3430_v34 }
  0x56   :  { %1092 = vmatprep.mubr.bf16.mxu1 %v3436_v35 }
  0x58   :  { %3115 = vmatpush3.bf16.msra.mxu0 %v3431_v33 }
  0x59   :  { %3116 = vmatprep.subr.bf16.mxu0 %v3435_v36 }
  0x5b   :  { %1028 = vmatmul.mubr.bf16.gmra.mrb[28].mxu0 %v3434_v37 }
  0x5c   :  { %3120 = vmatprep.mubr.bf16.mxu0 %v3440_v38  ;;  %3117 = vmatpush3.bf16.msra.mxu0 %v3435_v36 }
  0x5d   :  { %3118 = vmatprep.subr.bf16.mxu0 %v3439_v39  ;;  %1093 = vmatmul.mubr.bf16.gmra.mrb[28].mxu1 %v3438_v40 }
  0x5e   :  { %3130 = vmatprep.mubr.msk.bf16.mxu1 %vm1212_vm0, %v3444_v44 }
  0x60   :  { %3119 = vmatpush3.bf16.msra.mxu0 %v3439_v39 }
  0x61   :  { %3138 = vmatprep.subr.bf16.mxu0 %v3446_v45 }
  0x63   :  { %3121 = vmatmul.mubr.bf16.vlgmr.msra.gmra.mrb[32].mxu0 %v3441_v41 }
  0x64   :  { %3124 = vmatprep.mubr.bf16.mxu0 %v3442_v42  ;;  %3139 = vmatpush3.bf16.msra.mxu0 %v3446_v45 }
  0x65   :  { %3140 = vmatprep.subr.bf16.mxu0 %v3447_v46 }
  0x68   :  { %3141 = vmatpush3.bf16.msra.mxu0 %v3447_v46 }
  0x69   :  { %3142 = vmatprep.subr.bf16.mxu0 %v3448_v47 }
  0x6b   :  { %3125 = vmatmul.mubr.bf16.gmra.mrb[36].mxu0 %v3443_v43 }
  0x6c   :  { %3143 = vmatpush3.bf16.msra.mxu0 %v3448_v47 }
  0xf6   :  { %v2871_v48 = vpop.f32.mrb[0].mxu0 }
  0xf7   :  { %v2911_v49 = vpop.f32.mrb[0].mxu1  ;;  %v2872_v50 = vpop.f32.mrb[1].mxu0 }
  0xf8   :  { %v2873_v51 = vadd.f32 %v2872_v50, %v2871_v48  ;;  %v2912_v52 = vpop.f32.mrb[1].mxu1  ;;  %v2874_v53 = vpop.f32.mrb[2].mxu0 }
  0xf9   :  { %v2913_v54 = vadd.f32 %v2912_v52, %v2911_v49  ;;  %v2914_v55 = vpop.f32.mrb[2].mxu1  ;;  %v2875_v56 = vpop.f32.mrb[3].mxu0 }
  0xfa   :  { %v2876_v57 = vadd.f32 %v2875_v56, %v2874_v53  ;;  %v2915_v58 = vpop.f32.mrb[3].mxu1 }
  0xfb   :  { %v941_v59 = vadd.f32 %v2913_v54, %v2873_v51  ;;  %v2916_v60 = vadd.f32 %v2915_v58, %v2914_v55 }
  0xfd   :  { %v944_v61 = vadd.f32 %v2916_v60, %v2876_v57 }
  0xfe   :  { %v2877_v62 = vpop.f32.mrb[4].mxu0 }
  0xff   :  { %v2917_v63 = vpop.f32.mrb[4].mxu1  ;;  %v2878_v0 = vpop.f32.mrb[5].mxu0 }
 0x100   :  { %v2879_v1 = vadd.f32 %v2878_v0, %v2877_v62  ;;  %v2918_v2 = vpop.f32.mrb[5].mxu1  ;;  %v2880_v3 = vpop.f32.mrb[6].mxu0 }
 0x101   :  { %v2919_v4 = vadd.f32 %v2918_v2, %v2917_v63  ;;  %v2920_v5 = vpop.f32.mrb[6].mxu1  ;;  %v2881_v6 = vpop.f32.mrb[7].mxu0 }
 0x102   :  { %v2882_v7 = vadd.f32 %v2881_v6, %v2880_v3  ;;  %v2921_v8 = vpop.f32.mrb[7].mxu1 }
 0x103   :  { %v949_v9 = vadd.f32 %v2919_v4, %v2879_v1  ;;  %v2922_v10 = vadd.f32 %v2921_v8, %v2920_v5 }
 0x105   :  { %v952_v11 = vadd.f32 %v2922_v10, %v2882_v7 }
 0x106   :  { %v2883_v12 = vpop.f32.mrb[8].mxu0 }
 0x107   :  { %v2923_v13 = vpop.f32.mrb[8].mxu1  ;;  %v2884_v14 = vpop.f32.mrb[9].mxu0 }
 0x108   :  { %v2885_v15 = vadd.f32 %v2884_v14, %v2883_v12  ;;  %v2924_v16 = vpop.f32.mrb[9].mxu1  ;;  %v2886_v17 = vpop.f32.mrb[10].mxu0 }
 0x109   :  { %v2925_v18 = vadd.f32 %v2924_v16, %v2923_v13  ;;  %v2926_v19 = vpop.f32.mrb[10].mxu1  ;;  %v2887_v20 = vpop.f32.mrb[11].mxu0 }
 0x10a   :  { %v2888_v21 = vadd.f32 %v2887_v20, %v2886_v17  ;;  %v2927_v22 = vpop.f32.mrb[11].mxu1 }
 0x10b   :  { %v957_v23 = vadd.f32 %v2925_v18, %v2885_v15  ;;  %v2928_v24 = vadd.f32 %v2927_v22, %v2926_v19 }
 0x10d   :  { %v960_v25 = vadd.f32 %v2928_v24, %v2888_v21 }
 0x10e   :  { %v2889_v26 = vpop.f32.mrb[12].mxu0 }
 0x10f   :  { %v2929_v27 = vpop.f32.mrb[12].mxu1  ;;  %v2890_v28 = vpop.f32.mrb[13].mxu0 }
 0x110   :  { %v2930_v29 = vpop.f32.mrb[13].mxu1  ;;  %v2891_v30 = vadd.f32 %v2890_v28, %v2889_v26  ;;  %v2892_v32 = vpop.f32.mrb[14].mxu0 }
 0x111   :  { %v2931_v31 = vadd.f32 %v2930_v29, %v2929_v27  ;;  %v2932_v33 = vpop.f32.mrb[14].mxu1  ;;  %v2893_v34 = vpop.f32.mrb[15].mxu0 }
 0x112   :  { %v2933_v35 = vpop.f32.mrb[15].mxu1  ;;  %v2894_v37 = vadd.f32 %v2893_v34, %v2892_v32 }
 0x113   :  { %v965_v36 = vadd.f32 %v2931_v31, %v2891_v30  ;;  %v2934_v38 = vadd.f32 %v2933_v35, %v2932_v33 }
 0x115   :  { %v968_v39 = vadd.f32 %v2934_v38, %v2894_v37 }
 0x116   :  { %v2951_v40 = vpop.f32.mrb[16].mxu0 }
 0x117   :  { %v2952_v41 = vpop.f32.mrb[17].mxu0  ;;  %v2991_v46 = vpop.f32.mrb[16].mxu1 }
 0x118   :  { %v2953_v42 = vadd.f32 %v2952_v41, %v2951_v40  ;;  %v2954_v43 = vpop.f32.mrb[18].mxu0  ;;  %v2992_v48 = vpop.f32.mrb[17].mxu1 }
 0x119   :  { %v2955_v44 = vpop.f32.mrb[19].mxu0  ;;  %v2993_v50 = vadd.f32 %v2992_v48, %v2991_v46  ;;  %v2994_v51 = vpop.f32.mrb[18].mxu1 }
 0x11a   :  { %v1006_v45 = vadd.f32 %v2953_v42, %v941_v59  ;;  %v2956_v47 = vadd.f32 %v2955_v44, %v2954_v43  ;;  %v2995_v52 = vpop.f32.mrb[19].mxu1 }
 0x11b   :  { %v2996_v53 = vadd.f32 %v2995_v52, %v2994_v51 }
 0x11c   :  { %v1009_v49 = vadd.f32 %v2956_v47, %v944_v61  ;;  %v1071_v55 = vadd.f32 %v2993_v50, %v1006_v45 }
 0x11e   :  { %v2957_v54 = vpop.f32.mrb[20].mxu0  ;;  %v1074_v60 = vadd.f32 %v2996_v53, %v1009_v49 }
 0x11f   :  { %v2958_v56 = vpop.f32.mrb[21].mxu0 }
 0x120   :  { %v2959_v57 = vadd.f32 %v2958_v56, %v2957_v54  ;;  %v2960_v58 = vpop.f32.mrb[22].mxu0  ;;  %v2997_v0 = vpop.f32.mrb[20].mxu1 }
 0x121   :  { %v2961_v62 = vpop.f32.mrb[23].mxu0  ;;  %v2998_v2 = vpop.f32.mrb[21].mxu1 }
 0x122   :  { %v1014_v63 = vadd.f32 %v2959_v57, %v949_v9  ;;  %v2962_v1 = vadd.f32 %v2961_v62, %v2960_v58  ;;  %v2999_v3 = vadd.f32 %v2998_v2, %v2997_v0  ;;  %v3000_v4 = vpop.f32.mrb[22].mxu1 }
 0x123   :  { %v3001_v5 = vpop.f32.mrb[23].mxu1 }
 0x124   :  { %v1017_v59 = vadd.f32 %v2962_v1, %v952_v11  ;;  %v3002_v61 = vadd.f32 %v3001_v5, %v3000_v4  ;;  %v1079_v7 = vadd.f32 %v2999_v3, %v1014_v63  ;;  %v2796_v63 = vld [vmem:[%s4383_s2] ss:$0 sm:$0xff]  ;;  %v3445_v5 = vld [vmem:[%s4381_s3 + $0x8] sm:$0xff]  }
 0x126   :  { %v2963_v6 = vpop.f32.mrb[24].mxu0  ;;  %v1082_v13 = vadd.f32 %v3002_v61, %v1017_v59  ;;  %v3449_v61 = vld [vmem:[%s4381_s3 + $0x10] sm:$0xff]  }
 0x127   :  { %v2964_v8 = vpop.f32.mrb[25].mxu0 }
 0x128   :  { %v2965_v10 = vadd.f32 %v2964_v8, %v2963_v6  ;;  %v2966_v12 = vpop.f32.mrb[26].mxu0  ;;  %v3003_v16 = vpop.f32.mrb[24].mxu1  ;;  %v3450_v6 = vld [vmem:[%s4381_s3 + $0x18] sm:$0xff]   ;;  %v3591_v8 = vmov 0.0  }
 0x129   :  { %v2967_v14 = vpop.f32.mrb[27].mxu0  ;;  %v3004_v18 = vpop.f32.mrb[25].mxu1 }
 0x12a   :  { %v1022_v15 = vadd.f32 %v2965_v10, %v957_v23  ;;  %v2968_v17 = vadd.f32 %v2967_v14, %v2966_v12  ;;  %v3005_v19 = vadd.f32 %v3004_v18, %v3003_v16  ;;  %v3006_v20 = vpop.f32.mrb[26].mxu1  ;;  %v3451_v10 = vld [vmem:[%s4382_s4 + $0x18] sm:$0xff]   ;;  %v4023_v12 = vld [vmem:[%s4384_s5 + $0x8] sm:$0xff]  }
 0x12b   :  { %v3007_v21 = vpop.f32.mrb[27].mxu1  ;;  %3144 = vmatprep.subr.bf16.mxu0 %v3451_v10 }
 0x12c   :  { %v1025_v9 = vadd.f32 %v2968_v17, %v960_v25  ;;  %v3008_v11 = vadd.f32 %v3007_v21, %v3006_v20  ;;  %v1087_v24 = vadd.f32 %v3005_v19, %v1022_v15  ;;  %3145 = vmatpush3.bf16.msra.mxu0 %v3451_v10 }
 0x12d   :  { %3162 = vmatprep.subr.bf16.mxu0 %v3591_v8 }
 0x12e   :  { %v2969_v22 = vpop.f32.mrb[28].mxu0  ;;  %v1090_v29 = vadd.f32 %v3008_v11, %v1025_v9 }
 0x12f   :  { %v2970_v26 = vpop.f32.mrb[29].mxu0 }
 0x130   :  { %v2971_v27 = vadd.f32 %v2970_v26, %v2969_v22  ;;  %v2972_v28 = vpop.f32.mrb[30].mxu0  ;;  %v3009_v32 = vpop.f32.mrb[28].mxu1 }
 0x131   :  { %v2973_v30 = vpop.f32.mrb[31].mxu0  ;;  %v3010_v34 = vpop.f32.mrb[29].mxu1 }
 0x132   :  { %v1030_v31 = vadd.f32 %v2971_v27, %v965_v36  ;;  %v2974_v33 = vadd.f32 %v2973_v30, %v2972_v28  ;;  %v3011_v35 = vadd.f32 %v3010_v34, %v3009_v32  ;;  %v3012_v37 = vpop.f32.mrb[30].mxu1  ;;  %v4045_v30 = vld [vmem:[%s4385_s6] ss:$0 sm:$0xff] }
 0x133   :  { %v3013_v38 = vpop.f32.mrb[31].mxu1 }
 0x134   :  { %v1033_v23 = vadd.f32 %v2974_v33, %v968_v39  ;;  %v3014_v25 = vadd.f32 %v3013_v38, %v3012_v37  ;;  %v1095_v40 = vadd.f32 %v3011_v35, %v1030_v31 }
 0x136   :  { %v3122_v41 = vpop.f32.mrb[32].mxu0  ;;  %v1098_v44 = vadd.f32 %v3014_v25, %v1033_v23 }
 0x137   :  { %v1144_v42 = vadd.f32 %v3122_v41, %v1079_v7  ;;  %v1135_v43 = vpop.f32.mrb[33].mxu0  ;;  %v4012_v7 = vld [vmem:[%s4384_s5] sm:$0xff]  }
 0x138   :  { %v1136_v45 = vadd.f32 %v1135_v43, %v1071_v55  ;;  %v3123_v46 = vpop.f32.mrb[34].mxu0 }
 0x139   :  { %v1147_v47 = vadd.f32 %v3123_v46, %v1082_v13  ;;  %v1138_v48 = vpop.f32.mrb[35].mxu0  ;;  %v3593_v13 = vmov 0  }
 0x13a   :  { %v1166_v49 = vmax.f32 %v1136_v45, %v1144_v42  ;;  %v1139_v50 = vadd.f32 %v1138_v48, %v1074_v60 }
 0x13c   :  { %v1167_v36 = vmax.f32 %v1139_v50, %v1147_v47 }
 0x13e   :  { %v3126_v51 = vpop.f32.mrb[36].mxu0 }
 0x13f   :  { %v1160_v52 = vadd.f32 %v3126_v51, %v1095_v40  ;;  %v1151_v53 = vpop.f32.mrb[37].mxu0  ;;  %v4076_v51 = vld [vmem:[%s4386_s7 + $0x8] sm:$0xff]  }
 0x140   :  { %v1152_v39 = vadd.f32 %v1151_v53, %v1087_v24  ;;  %v3127_v54 = vpop.f32.mrb[38].mxu0 }
 0x141   :  { %v1163_v56 = vadd.f32 %v3127_v54, %v1098_v44  ;;  %v1154_v57 = vpop.f32.mrb[39].mxu0 }
 0x142   :  { %v1168_v58 = vmax.f32 %v1152_v39, %v1160_v52  ;;  %v1155_v62 = vadd.f32 %v1154_v57, %v1090_v29  ;;  %v4083_v52 = vld [vmem:[%s4386_s7 + $0x10] sm:$0xff]   ;;  %v4092_v39 = vld [vmem:[%s4386_s7 + $0x18] sm:$0xff]  }
 0x144   :  { %v1170_v55 = vmax.f32 %v1166_v49, %v1168_v58  ;;  %v1169_v0 = vmax.f32 %v1155_v62, %v1163_v56 }
 0x146   :  { %v1171_v1 = vmax.f32 %v1167_v36, %v1169_v0  ;;  %v1179_v2 = vadd.f32 %v2796_v63, %v1170_v55  ;;  %v4070_v36 = vld [vmem:[%s4386_s7] sm:$0xff]  }
 0x148   :  { %v1180_v59 = vadd.f32 %v2796_v63, %v1171_v1  ;;  %v1181_v60 = vmax.f32 %v1179_v2, 0.0  ;;  %v4122_v1 = vld [vmem:[%s4387_s8] ss:$0 sm:$0xff] }
 0x14a   :  { %v1182_v3 = vmax.f32 %v1180_v59, 0.0 }
 0x14c   :  { %v1191_v4 = vpack.c.bf16 %v1182_v3, %v1181_v60 }
 0x14e   :  { %3128 = vmatprep.subr.bf16.mxu1 %v1191_v4 }
 0x14f   :  { %3129 = vmatpush3.bf16.msra.mxu1 %v1191_v4 }
 0x150   :  { %3154 = vmatprep.subr.bf16.mxu1 %v3591_v8 }
 0x152   :  { %3131 = vmatmul.mubr.msk.bf16.vlgmr.msra.gmra.mrb[32].mxu1 %vm1212_vm0, %v3445_v5 }
 0x153   :  { %3134 = vmatprep.mubr.msk.bf16.mxu1 %vm1212_vm0, %v3449_v61  ;;  %3155 = vmatpush3.bf16.msra.mxu1 %v4012_v7 }
 0x154   :  { %3156 = vmatprep.subr.bf16.mxu1 %v3591_v8 }
 0x157   :  { %3157 = vmatpush3.bf16.msra.mxu1 %v4023_v12 }
 0x158   :  { %3174 = vmatprep.subr.bf16.mxu1 %v3591_v8 }
 0x15a   :  { %3135 = vmatmul.mubr.msk.bf16.gmra.mrb[36].mxu1 %vm1212_vm0, %v3450_v6 }
 0x15b   :  { %3158 = vmatprep.mubr.msk.bf16.mxu1 %vm3592_vm1, %v3591_v8 }
 0x162   :  { %3159 = vmatmul.mubr.bf16.vlgmr.msra.gmra.mrb[40].mxu1 %v3593_v13 }
 0x163   :  { %3175 = vmatpush3.bf16.msra.mxu1 %v4012_v7  ;;  %3178 = vmatprep.mubr.msk.bf16.mxu1 %vm3592_vm1, %v3591_v8 }
 0x164   :  { %3176 = vmatprep.subr.bf16.mxu1 %v3591_v8 }
 0x167   :  { %3177 = vmatpush3.bf16.msra.mxu1 %v4023_v12 }
 0x168   :  { %3182 = vmatprep.subr.bf16.mxu1 %v3591_v8 }
 0x225   :  { %v3132_v14 = vpop.f32.mrb[32].mxu1 }
 0x226   :  { %v1259_v15 = vpop.f32.mrb[33].mxu1 }
 0x227   :  { %v3133_v16 = vpop.f32.mrb[34].mxu1 }
 0x228   :  { %v1291_v17 = vpack.c.bf16 %v3133_v16, %v3132_v14  ;;  %v1262_v18 = vpop.f32.mrb[35].mxu1 }
 0x229   :  { %v1290_v9 = vpack.c.bf16 %v1262_v18, %v1259_v15 }
 0x22b   :  { %3146 = vmatprep.mubr.msk.bf16.mxu0 %vm1333_vm2, %v1290_v9 }
 0x22c   :  { %3147 = vmatmul.mubr.msk.bf16.vlgmr.msra.gmra.mrb[40].mxu0 %vm1333_vm2, %v1291_v17 }
 0x22d   :  { %v3136_v19 = vpop.f32.mrb[36].mxu1  ;;  %3163 = vmatpush3.bf16.msra.mxu0 %v4070_v36 }
 0x22e   :  { %v1275_v20 = vpop.f32.mrb[37].mxu1  ;;  %3164 = vmatprep.subr.bf16.mxu0 %v3591_v8 }
 0x22f   :  { %v3137_v21 = vpop.f32.mrb[38].mxu1 }
 0x230   :  { %v1278_v11 = vpop.f32.mrb[39].mxu1  ;;  %v1293_v24 = vpack.c.bf16 %v3137_v21, %v3136_v19 }
 0x231   :  { %v1292_v22 = vpack.c.bf16 %v1278_v11, %v1275_v20  ;;  %3165 = vmatpush3.bf16.msra.mxu0 %v4076_v51 }
 0x232   :  { %3166 = vmatprep.subr.bf16.mxu0 %v3591_v8 }
 0x233   :  { %3150 = vmatprep.mubr.msk.bf16.mxu0 %vm1333_vm2, %v1292_v22 }
 0x234   :  { %3151 = vmatmul.mubr.msk.bf16.gmra.mrb[44].mxu0 %vm1333_vm2, %v1293_v24 }
 0x235   :  { %3170 = vmatprep.mubr.msk.bf16.mxu0 %vm3592_vm1, %v3591_v8  ;;  %v1474_v26 = vpop.f32.mrb[40].mxu1  ;;  %3167 = vmatpush3.bf16.msra.mxu0 %v4083_v52 }
 0x236   :  { %v3160_v27 = vpop.f32.mrb[41].mxu1  ;;  %3168 = vmatprep.subr.bf16.mxu0 %v3591_v8 }
 0x237   :  { %v1477_v28 = vpop.f32.mrb[42].mxu1 }
 0x238   :  { %v3161_v29 = vpop.f32.mrb[43].mxu1 }
 0x239   :  { %3169 = vmatpush3.bf16.msra.mxu0 %v4092_v39 }
 0x23a   :  { %3194 = vmatprep.subr.bf16.mxu0 %v3591_v8 }
 0x2ff   :  { %v4047_v31 = vpop.f32.mrb[40].mxu0 }
 0x300   :  { %v1380_v32 = vpop.f32.mrb[41].mxu0 }
 0x301   :  { %v1381_v33 = vadd.f32 %v4045_v30, %v1380_v32  ;;  %v4050_v34 = vpop.f32.mrb[42].mxu0 }
 0x302   :  { %v4052_v23 = vpop.f32.mrb[43].mxu0 }
 0x303   :  { %v1480_v35 = vadd.f32 %v1474_v26, %v1381_v33  ;;  %v1384_v0 = vadd.f32 %v4045_v30, %v4052_v23 }
 0x305   :  { %3458 = vtanh.f32 %v1480_v35  ;;  %v2816_v42 = vmul.f32 -1.442695, %v1480_v35 }
 0x307   :  { %v4055_v38 = vpop.f32.mrb[44].mxu0  ;;  %3460 = vpow2.f32 %v2816_v42 }
 0x308   :  { %v4057_v25 = vpop.f32.mrb[45].mxu0 }
 0x309   :  { %v4059_v40 = vpop.f32.mrb[46].mxu0 }
 0x30a   :  { %v4061_v41 = vpop.f32.mrb[47].mxu0 }
 0x30f   :  { %v3459_v37 = vpop.eup %3458 }
 0x310   :  { %1490 = vrot.lane.b32.xlu0 %v3459_v37, %s3594_s22 }
 0x311   :  { %v3461_v43 = vpop.eup %3460 }
 0x312   :  { %v1484_v44 = vadd.f32 1.0, %v3461_v43 }
 0x314   :  { %3462 = vrcp.f32 %v1484_v44 }
 0x31e   :  { %v3463_v45 = vpop.eup %3462 }
 0x31f   :  { %v1488_v48 = vmul.f32 0.0, %v3463_v45 }
 0x382   :  { %v1491_v46 = vpop.permute.xlu0 %1490 }
 0x383   :  { %v1493_v47 = vmul.f32 %v3463_v45, %v1491_v46 }
 0x385   :  { %1495 = vrot.lane.b32.xlu0 %v1493_v47, %s3595_s23 }
 0x3f7   :  { %v1496_v49 = vpop.permute.xlu0 %1495 }
 0x3f8   :  { %v4064_v50 = vadd.f32 %v1496_v49, %v1488_v48 }
 0x3fa   :  { %3464 = vtanh.f32 %v4064_v50 }
 0x404   :  { %v3465_v53 = vpop.eup %3464 }
 0x405   :  { %1501 = vrot.lane.b32.xlu1 %v3465_v53, %s3594_s22 }
 0x477   :  { %v1502_v54 = vpop.permute.xlu1 %1501 }
 0x478   :  { %v1504_v56 = vmul.f32 %v3463_v45, %v1502_v54 }
 0x47a   :  { %v1608_v57 = vpack.c.bf16 %v1504_v56, %v1504_v56  ;;  %1506 = vrot.lane.b32.xlu1 %v1504_v56, %s3595_s23  ;;  %v1389_v56 = vadd.f32 %v4047_v31, %v4045_v30 }
 0x47c   :  { %1610 = vrot.lane.b32.xlu0 %v1608_v57, %s3595_s23 }
 0x4ec   :  { %v1507_v58 = vpop.permute.xlu1 %1506 }
 0x4ed   :  { %v1509_v62 = vsel %vm1436_vm3, %v1507_v58, 0.0 }
 0x4ee   :  { %v1510_v63 = vpack.c.bf16 %v1509_v62, %v1509_v62  ;;  %v1611_v55 = vpop.permute.xlu0 %1610 }
 0x4ef   :  { %3179 = vmatmul.mubr.msk.bf16.vlgmr.msra.gmra.mrb[44].mxu1 %vm1436_vm3, %v1611_v55 }
 0x4f0   :  { %3171 = vmatmul.mubr.msk.bf16.vlgmr.msra.gmra.mrb[48].mxu0 %vm1333_vm2, %v1510_v63  ;;  %3183 = vmatpush3.bf16.msra.mxu1 %v4070_v36 }
 0x4f1   :  { %3184 = vmatprep.subr.bf16.mxu1 %v3591_v8  ;;  %3195 = vmatpush3.bf16.msra.mxu0 %v4012_v7 }
 0x4f2   :  { %3196 = vmatprep.subr.bf16.mxu0 %v3591_v8  ;;  %3190 = vmatprep.mubr.msk.bf16.mxu1 %vm3592_vm1, %v3591_v8 }
 0x4f3   :  { %3198 = vmatprep.mubr.msk.bf16.mxu0 %vm3592_vm1, %v3591_v8 }
 0x4f4   :  { %3185 = vmatpush3.bf16.msra.mxu1 %v4076_v51 }
 0x4f5   :  { %3186 = vmatprep.subr.bf16.mxu1 %v3591_v8  ;;  %3197 = vmatpush3.bf16.msra.mxu0 %v4023_v12 }
 0x4f6   :  { %3202 = vmatprep.subr.bf16.mxu0 %v3591_v8 }
 0x4f8   :  { %3187 = vmatpush3.bf16.msra.mxu1 %v4083_v52 }
 0x4f9   :  { %3188 = vmatprep.subr.bf16.mxu1 %v3591_v8 }
 0x4fc   :  { %3189 = vmatpush3.bf16.msra.mxu1 %v4092_v39 }
 0x4fd   :  { %3214 = vmatprep.subr.bf16.mxu1 %v3591_v8 }
 0x5c2   :  { %v1649_v2 = vpop.f32.mrb[44].mxu1 }
 0x5c3   :  { %v1655_v59 = vadd.f32 %v1649_v2, %v1384_v0  ;;  %v1578_v60 = vpop.f32.mrb[48].mxu0  ;;  %v3180_v3 = vpop.f32.mrb[45].mxu1 }
 0x5c4   :  { %v1579_v4 = vadd.f32 %v4122_v1, %v1578_v60  ;;  %v3172_v5 = vpop.f32.mrb[49].mxu0  ;;  %v1652_v61 = vpop.f32.mrb[46].mxu1 }
 0x5c5   :  { %3466 = vtanh.f32 %v1655_v59  ;;  %v1581_v6 = vpop.f32.mrb[50].mxu0  ;;  %v3181_v10 = vpop.f32.mrb[47].mxu1  ;;  %v2825_v16 = vmul.f32 -1.442695, %v1655_v59 }
 0x5c6   :  { %3468 = vtanh.f32 %v1579_v4  ;;  %v3173_v13 = vpop.f32.mrb[51].mxu0  ;;  %v2823_v17 = vmul.f32 -1.442695, %v1579_v4 }
 0x5c7   :  { %3470 = vpow2.f32 %v2825_v16 }
 0x5c8   :  { %3472 = vpow2.f32 %v2823_v17 }
 0x5cf   :  { %v3467_v14 = vpop.eup %3466 }
 0x5d0   :  { %v3469_v15 = vpop.eup %3468  ;;  %1665 = vrot.lane.b32.xlu0 %v3467_v14, %s3594_s22 }
 0x5d1   :  { %1593 = vrot.lane.b32.xlu1 %v3469_v15, %s3594_s22  ;;  %v3471_v18 = vpop.eup %3470 }
 0x5d2   :  { %v3473_v9 = vpop.eup %3472  ;;  %v1659_v19 = vadd.f32 1.0, %v3471_v18 }
 0x5d3   :  { %v1587_v20 = vadd.f32 1.0, %v3473_v9 }
 0x5d4   :  { %3474 = vrcp.f32 %v1659_v19 }
 0x5d5   :  { %3476 = vrcp.f32 %v1587_v20 }
 0x5de   :  { %v3475_v21 = vpop.eup %3474 }
 0x5df   :  { %v3477_v22 = vpop.eup %3476  ;;  %v1663_v28 = vmul.f32 %v3475_v21, %v4064_v50 }
 0x5e0   :  { %v1591_v32 = vmul.f32 0.0, %v3477_v22 }
 0x642   :  { %v1666_v11 = vpop.permute.xlu0 %1665 }
 0x643   :  { %v1668_v24 = vmul.f32 %v3475_v21, %v1666_v11  ;;  %v1594_v26 = vpop.permute.xlu1 %1593 }
 0x644   :  { %v1596_v27 = vmul.f32 %v3477_v22, %v1594_v26 }
 0x645   :  { %1670 = vrot.lane.b32.xlu0 %v1668_v24, %s3595_s23 }
 0x646   :  { %1598 = vrot.lane.b32.xlu1 %v1596_v27, %s3595_s23 }
 0x6b7   :  { %v1671_v29 = vpop.permute.xlu0 %1670 }
 0x6b8   :  { %v4130_v33 = vadd.f32 %v1671_v29, %v1663_v28  ;;  %v1599_v23 = vpop.permute.xlu1 %1598 }
 0x6b9   :  { %v4132_v35 = vadd.f32 %v1599_v23, %v1591_v32 }
 0x6ba   :  { %3478 = vtanh.f32 %v4130_v33 }
 0x6bb   :  { %3480 = vtanh.f32 %v4132_v35 }
 0x6c4   :  { %v3479_v37 = vpop.eup %3478 }
 0x6c5   :  { %v3481_v42 = vpop.eup %3480  ;;  %1676 = vrot.lane.b32.xlu0 %v3479_v37, %s3594_s22 }
 0x6c6   :  { %1604 = vrot.lane.b32.xlu1 %v3481_v42, %s3594_s22 }
 0x737   :  { %v1677_v43 = vpop.permute.xlu0 %1676 }
 0x738   :  { %v1679_v44 = vmul.f32 %v3475_v21, %v1677_v43  ;;  %v1605_v45 = vpop.permute.xlu1 %1604 }
 0x739   :  { %v1607_v46 = vmul.f32 %v3477_v22, %v1605_v45 }
 0x73a   :  { %1681 = vrot.lane.b32.xlu1 %v1679_v44, %s3595_s23  ;;  %v1757_v47 = vpack.c.bf16 %v1679_v44, %v1679_v44 }
 0x73b   :  { %1685 = vrot.lane.b32.xlu0 %v1607_v46, %s3594_s22  ;;  %v1392_v46 = vadd.f32 %v4050_v34, %v4045_v30 }
 0x73e   :  { %1759 = vrot.lane.b32.xlu1 %v1757_v47, %s3595_s23 }
 0x7ac   :  { %v1682_v48 = vpop.permute.xlu1 %1681 }
 0x7ad   :  { %v1686_v49 = vpop.permute.xlu0 %1685 }
 0x7ae   :  { %v1688_v50 = vsel %vm1436_vm3, %v1682_v48, %v1686_v49 }
 0x7af   :  { %v1689_v53 = vpack.c.bf16 %v1688_v50, %v1688_v50 }
 0x7b0   :  { %v1760_v54 = vpop.permute.xlu1 %1759 }
 0x7b1   :  { %3191 = vmatmul.mubr.msk.bf16.vlgmr.msra.gmra.mrb[48].mxu1 %vm1333_vm2, %v1689_v53  ;;  %3199 = vmatmul.mubr.msk.bf16.vlgmr.msra.gmra.mrb[52].mxu0 %vm1436_vm3, %v1760_v54 }
 0x7b2   :  { %3203 = vmatpush3.bf16.msra.mxu0 %v4070_v36  ;;  %3215 = vmatpush3.bf16.msra.mxu1 %v4012_v7 }
 0x7b3   :  { %3204 = vmatprep.subr.bf16.mxu0 %v3591_v8  ;;  %3216 = vmatprep.subr.bf16.mxu1 %v3591_v8 }
 0x7b4   :  { %3210 = vmatprep.mubr.msk.bf16.mxu0 %vm3592_vm1, %v3591_v8  ;;  %3218 = vmatprep.mubr.msk.bf16.mxu1 %vm3592_vm1, %v3591_v8 }
 0x7b6   :  { %3205 = vmatpush3.bf16.msra.mxu0 %v4076_v51  ;;  %3217 = vmatpush3.bf16.msra.mxu1 %v4023_v12 }
 0x7b7   :  { %3206 = vmatprep.subr.bf16.mxu0 %v3591_v8  ;;  %3222 = vmatprep.subr.bf16.mxu1 %v3591_v8 }
 0x7ba   :  { %3207 = vmatpush3.bf16.msra.mxu0 %v4083_v52 }
 0x7bb   :  { %3208 = vmatprep.subr.bf16.mxu0 %v3591_v8 }
 0x7be   :  { %3209 = vmatpush3.bf16.msra.mxu0 %v4092_v39 }
 0x7bf   :  { %3234 = vmatprep.subr.bf16.mxu0 %v3591_v8 }
 0x884   :  { %v1727_v57 = vpop.f32.mrb[48].mxu1  ;;  %v1798_v58 = vpop.f32.mrb[52].mxu0 }
 0x885   :  { %v1728_v62 = vadd.f32 %v4122_v1, %v1727_v57  ;;  %v1804_v63 = vadd.f32 %v1798_v58, %v1389_v56  ;;  %v3192_v55 = vpop.f32.mrb[49].mxu1  ;;  %v3200_v0 = vpop.f32.mrb[53].mxu0 }
 0x886   :  { %v1730_v2 = vpop.f32.mrb[50].mxu1  ;;  %v1801_v59 = vpop.f32.mrb[54].mxu0 }
 0x887   :  { %3482 = vtanh.f32 %v1728_v62  ;;  %v3193_v60 = vpop.f32.mrb[51].mxu1  ;;  %v3201_v3 = vpop.f32.mrb[55].mxu0  ;;  %v2827_v31 = vmul.f32 -1.442695, %v1728_v62  ;;  %v2829_v61 = vmul.f32 -1.442695, %v1804_v63 }
 0x888   :  { %3484 = vtanh.f32 %v1804_v63 }
 0x889   :  { %3486 = vpow2.f32 %v2827_v31 }
 0x88a   :  { %3488 = vpow2.f32 %v2829_v61 }
 0x891   :  { %v3483_v4 = vpop.eup %3482 }
 0x892   :  { %v3485_v5 = vpop.eup %3484  ;;  %1742 = vrot.lane.b32.xlu0 %v3483_v4, %s3594_s22 }
 0x893   :  { %1814 = vrot.lane.b32.xlu1 %v3485_v5, %s3594_s22  ;;  %v3487_v6 = vpop.eup %3486 }
 0x894   :  { %v3489_v10 = vpop.eup %3488  ;;  %v1736_v13 = vadd.f32 1.0, %v3487_v6 }
 0x895   :  { %v1808_v14 = vadd.f32 1.0, %v3489_v10 }
 0x896   :  { %3490 = vrcp.f32 %v1736_v13 }
 0x897   :  { %3492 = vrcp.f32 %v1808_v14 }
 0x8a0   :  { %v3491_v15 = vpop.eup %3490 }
 0x8a1   :  { %v3493_v17 = vpop.eup %3492  ;;  %v1740_v20 = vmul.f32 %v3491_v15, %v4132_v35 }
 0x8a2   :  { %v1812_v11 = vmul.f32 %v3493_v17, %v4130_v33 }
 0x904   :  { %v1743_v16 = vpop.permute.xlu0 %1742 }
 0x905   :  { %v1745_v18 = vmul.f32 %v3491_v15, %v1743_v16  ;;  %v1815_v9 = vpop.permute.xlu1 %1814 }
 0x906   :  { %v1817_v19 = vmul.f32 %v3493_v17, %v1815_v9 }
 0x907   :  { %1747 = vrot.lane.b32.xlu0 %v1745_v18, %s3595_s23 }
 0x908   :  { %1819 = vrot.lane.b32.xlu1 %v1817_v19, %s3595_s23 }
 0x979   :  { %v1748_v21 = vpop.permute.xlu0 %1747 }
 0x97a   :  { %v4169_v22 = vadd.f32 %v1748_v21, %v1740_v20  ;;  %v1820_v24 = vpop.permute.xlu1 %1819 }
 0x97b   :  { %v4171_v26 = vadd.f32 %v1820_v24, %v1812_v11 }
 0x97c   :  { %3494 = vtanh.f32 %v4169_v22 }
 0x97d   :  { %3496 = vtanh.f32 %v4171_v26 }
 0x986   :  { %v3495_v27 = vpop.eup %3494 }
 0x987   :  { %v3497_v28 = vpop.eup %3496  ;;  %1753 = vrot.lane.b32.xlu0 %v3495_v27, %s3594_s22 }
 0x988   :  { %1825 = vrot.lane.b32.xlu1 %v3497_v28, %s3594_s22 }
 0x9f9   :  { %v1754_v29 = vpop.permute.xlu0 %1753 }
 0x9fa   :  { %v1756_v32 = vmul.f32 %v3491_v15, %v1754_v29  ;;  %v1826_v23 = vpop.permute.xlu1 %1825 }
 0x9fb   :  { %v1828_v35 = vmul.f32 %v3493_v17, %v1826_v23  ;;  %v1397_v23 = vadd.f32 %v4045_v30, %v4057_v25 }
 0x9fc   :  { %1834 = vrot.lane.b32.xlu1 %v1756_v32, %s3594_s22 }
 0x9fd   :  { %1830 = vrot.lane.b32.xlu0 %v1828_v35, %s3595_s23  ;;  %v1906_v33 = vpack.c.bf16 %v1828_v35, %v1828_v35 }
 0xa01   :  { %1908 = vrot.lane.b32.xlu0 %v1906_v33, %s3595_s23 }
 0xa6e   :  { %v1835_v37 = vpop.permute.xlu1 %1834 }
 0xa6f   :  { %v1831_v42 = vpop.permute.xlu0 %1830 }
 0xa70   :  { %v1837_v43 = vsel %vm1436_vm3, %v1831_v42, %v1835_v37 }
 0xa71   :  { %v1838_v44 = vpack.c.bf16 %v1837_v43, %v1837_v43 }
 0xa73   :  { %v1909_v45 = vpop.permute.xlu0 %1908  ;;  %3211 = vmatmul.mubr.msk.bf16.vlgmr.msra.gmra.mrb[56].mxu0 %vm1333_vm2, %v1838_v44 }
 0xa74   :  { %3219 = vmatmul.mubr.msk.bf16.vlgmr.msra.gmra.mrb[52].mxu1 %vm1436_vm3, %v1909_v45  ;;  %3235 = vmatpush3.bf16.msra.mxu0 %v4012_v7 }
 0xa75   :  { %3223 = vmatpush3.bf16.msra.mxu1 %v4070_v36  ;;  %3236 = vmatprep.subr.bf16.mxu0 %v3591_v8 }
 0xa76   :  { %3224 = vmatprep.subr.bf16.mxu1 %v3591_v8  ;;  %3230 = vmatprep.mubr.msk.bf16.mxu1 %vm3592_vm1, %v3591_v8 }
 0xa77   :  { %3238 = vmatprep.mubr.msk.bf16.mxu0 %vm3592_vm1, %v3591_v8 }
 0xa78   :  { %3237 = vmatpush3.bf16.msra.mxu0 %v4023_v12 }
 0xa79   :  { %3225 = vmatpush3.bf16.msra.mxu1 %v4076_v51  ;;  %3242 = vmatprep.subr.bf16.mxu0 %v3591_v8 }
 0xa7a   :  { %3226 = vmatprep.subr.bf16.mxu1 %v3591_v8 }
 0xa7d   :  { %3227 = vmatpush3.bf16.msra.mxu1 %v4083_v52 }
 0xa7e   :  { %3228 = vmatprep.subr.bf16.mxu1 %v3591_v8 }
 0xa81   :  { %3229 = vmatpush3.bf16.msra.mxu1 %v4092_v39 }
 0xa82   :  { %3254 = vmatprep.subr.bf16.mxu1 %v3591_v8 }
 0xb46   :  { %v1876_v47 = vpop.f32.mrb[56].mxu0 }
 0xb47   :  { %v1877_v48 = vadd.f32 %v4122_v1, %v1876_v47  ;;  %v3212_v49 = vpop.f32.mrb[57].mxu0  ;;  %v1947_v50 = vpop.f32.mrb[52].mxu1 }
 0xb48   :  { %v1953_v53 = vadd.f32 %v1947_v50, %v1392_v46  ;;  %v1879_v54 = vpop.f32.mrb[58].mxu0  ;;  %v3220_v56 = vpop.f32.mrb[53].mxu1 }
 0xb49   :  { %3498 = vtanh.f32 %v1877_v48  ;;  %v3213_v57 = vpop.f32.mrb[59].mxu0  ;;  %v1950_v58 = vpop.f32.mrb[54].mxu1  ;;  %v2831_v34 = vmul.f32 -1.442695, %v1877_v48 }
 0xb4a   :  { %3500 = vtanh.f32 %v1953_v53  ;;  %v3221_v62 = vpop.f32.mrb[55].mxu1  ;;  %v2833_v0 = vmul.f32 -1.442695, %v1953_v53 }
 0xb4b   :  { %3502 = vpow2.f32 %v2831_v34 }
 0xb4c   :  { %3504 = vpow2.f32 %v2833_v0 }
 0xb53   :  { %v3499_v63 = vpop.eup %3498 }
 0xb54   :  { %v3501_v55 = vpop.eup %3500  ;;  %1891 = vrot.lane.b32.xlu1 %v3499_v63, %s3594_s22 }
 0xb55   :  { %1963 = vrot.lane.b32.xlu0 %v3501_v55, %s3594_s22  ;;  %v3503_v2 = vpop.eup %3502 }
 0xb56   :  { %v3505_v59 = vpop.eup %3504  ;;  %v1885_v60 = vadd.f32 1.0, %v3503_v2 }
 0xb57   :  { %v1957_v3 = vadd.f32 1.0, %v3505_v59 }
 0xb58   :  { %3506 = vrcp.f32 %v1885_v60 }
 0xb59   :  { %3508 = vrcp.f32 %v1957_v3 }
 0xb62   :  { %v3507_v4 = vpop.eup %3506 }
 0xb63   :  { %v3509_v31 = vpop.eup %3508  ;;  %v1889_v13 = vmul.f32 %v3507_v4, %v4169_v22 }
 0xb64   :  { %v1961_v15 = vmul.f32 %v3509_v31, %v4171_v26 }
 0xbc6   :  { %v1892_v5 = vpop.permute.xlu1 %1891 }
 0xbc7   :  { %v1894_v61 = vmul.f32 %v3507_v4, %v1892_v5  ;;  %v1964_v6 = vpop.permute.xlu0 %1963 }
 0xbc8   :  { %v1966_v10 = vmul.f32 %v3509_v31, %v1964_v6 }
 0xbc9   :  { %1896 = vrot.lane.b32.xlu1 %v1894_v61, %s3595_s23 }
 0xbca   :  { %1968 = vrot.lane.b32.xlu0 %v1966_v10, %s3595_s23 }
 0xc3b   :  { %v1897_v14 = vpop.permute.xlu1 %1896 }
 0xc3c   :  { %v4208_v16 = vadd.f32 %v1897_v14, %v1889_v13  ;;  %v1969_v17 = vpop.permute.xlu0 %1968 }
 0xc3d   :  { %v4210_v18 = vadd.f32 %v1969_v17, %v1961_v15 }
 0xc3e   :  { %3510 = vtanh.f32 %v4208_v16 }
 0xc3f   :  { %3512 = vtanh.f32 %v4210_v18 }
 0xc48   :  { %v3511_v9 = vpop.eup %3510 }
 0xc49   :  { %v3513_v19 = vpop.eup %3512  ;;  %1902 = vrot.lane.b32.xlu1 %v3511_v9, %s3594_s22 }
 0xc4a   :  { %1974 = vrot.lane.b32.xlu0 %v3513_v19, %s3594_s22 }
 0xcbb   :  { %v1903_v20 = vpop.permute.xlu1 %1902 }
 0xcbc   :  { %v1905_v21 = vmul.f32 %v3507_v4, %v1903_v20  ;;  %v1975_v11 = vpop.permute.xlu0 %1974 }
 0xcbd   :  { %v1977_v22 = vmul.f32 %v3509_v31, %v1975_v11 }
 0xcbe   :  { %1983 = vrot.lane.b32.xlu0 %v1905_v21, %s3594_s22  ;;  %v1400_v21 = vadd.f32 %v4045_v30, %v4061_v41 }
 0xcbf   :  { %1979 = vrot.lane.b32.xlu1 %v1977_v22, %s3595_s23  ;;  %v2055_v24 = vpack.c.bf16 %v1977_v22, %v1977_v22 }
 0xcc3   :  { %2057 = vrot.lane.b32.xlu1 %v2055_v24, %s3595_s23 }
 0xd30   :  { %v1984_v26 = vpop.permute.xlu0 %1983 }
 0xd31   :  { %v1980_v27 = vpop.permute.xlu1 %1979 }
 0xd32   :  { %v1986_v28 = vsel %vm1436_vm3, %v1980_v27, %v1984_v26 }
 0xd33   :  { %v1987_v29 = vpack.c.bf16 %v1986_v28, %v1986_v28 }
 0xd35   :  { %3231 = vmatmul.mubr.msk.bf16.vlgmr.msra.gmra.mrb[56].mxu1 %vm1333_vm2, %v1987_v29  ;;  %v2058_v32 = vpop.permute.xlu1 %2057 }
 0xd36   :  { %3239 = vmatmul.mubr.msk.bf16.vlgmr.msra.gmra.mrb[60].mxu0 %vm1436_vm3, %v2058_v32  ;;  %3255 = vmatpush3.bf16.msra.mxu1 %v4012_v7 }
 0xd37   :  { %3243 = vmatpush3.bf16.msra.mxu0 %v4070_v36  ;;  %3256 = vmatprep.subr.bf16.mxu1 %v3591_v8 }
 0xd38   :  { %3244 = vmatprep.subr.bf16.mxu0 %v3591_v8  ;;  %3250 = vmatprep.mubr.msk.bf16.mxu0 %vm3592_vm1, %v3591_v8 }
 0xd39   :  { %3258 = vmatprep.mubr.msk.bf16.mxu1 %vm3592_vm1, %v3591_v8 }
 0xd3a   :  { %3257 = vmatpush3.bf16.msra.mxu1 %v4023_v12 }
 0xd3b   :  { %3245 = vmatpush3.bf16.msra.mxu0 %v4076_v51  ;;  %3262 = vmatprep.subr.bf16.mxu1 %v3591_v8 }
 0xd3c   :  { %3246 = vmatprep.subr.bf16.mxu0 %v3591_v8 }
 0xd3f   :  { %3247 = vmatpush3.bf16.msra.mxu0 %v4083_v52 }
 0xd40   :  { %3248 = vmatprep.subr.bf16.mxu0 %v3591_v8 }
 0xd43   :  { %3249 = vmatpush3.bf16.msra.mxu0 %v4092_v39 }
 0xd44   :  { %3274 = vmatprep.subr.bf16.mxu0 %v3591_v8 }
 0xe08   :  { %v2025_v35 = vpop.f32.mrb[56].mxu1 }
 0xe09   :  { %v2026_v33 = vadd.f32 %v4122_v1, %v2025_v35  ;;  %v3232_v37 = vpop.f32.mrb[57].mxu1  ;;  %v2096_v42 = vpop.f32.mrb[60].mxu0 }
 0xe0a   :  { %v2102_v43 = vadd.f32 %v2096_v42, %v1397_v23  ;;  %v2028_v44 = vpop.f32.mrb[58].mxu1  ;;  %v3240_v45 = vpop.f32.mrb[61].mxu0 }
 0xe0b   :  { %3514 = vtanh.f32 %v2026_v33  ;;  %v3233_v46 = vpop.f32.mrb[59].mxu1  ;;  %v2099_v47 = vpop.f32.mrb[62].mxu0  ;;  %v2835_v25 = vmul.f32 -1.442695, %v2026_v33 }
 0xe0c   :  { %3516 = vtanh.f32 %v2102_v43  ;;  %v3241_v48 = vpop.f32.mrb[63].mxu0  ;;  %v2837_v53 = vmul.f32 -1.442695, %v2102_v43 }
 0xe0d   :  { %3518 = vpow2.f32 %v2835_v25 }
 0xe0e   :  { %3520 = vpow2.f32 %v2837_v53 }
 0xe15   :  { %v3515_v49 = vpop.eup %3514 }
 0xe16   :  { %v3517_v50 = vpop.eup %3516  ;;  %2040 = vrot.lane.b32.xlu0 %v3515_v49, %s3594_s22 }
 0xe17   :  { %2112 = vrot.lane.b32.xlu1 %v3517_v50, %s3594_s22  ;;  %v3519_v54 = vpop.eup %3518 }
 0xe18   :  { %v3521_v56 = vpop.eup %3520  ;;  %v2034_v57 = vadd.f32 1.0, %v3519_v54 }
 0xe19   :  { %v2106_v58 = vadd.f32 1.0, %v3521_v56 }
 0xe1a   :  { %3522 = vrcp.f32 %v2034_v57 }
 0xe1b   :  { %3524 = vrcp.f32 %v2106_v58 }
 0xe24   :  { %v3523_v62 = vpop.eup %3522 }
 0xe25   :  { %v3525_v55 = vpop.eup %3524  ;;  %v2038_v59 = vmul.f32 %v3523_v62, %v4208_v16 }
 0xe26   :  { %v2110_v3 = vmul.f32 %v3525_v55, %v4210_v18 }
 0xe88   :  { %v2041_v63 = vpop.permute.xlu0 %2040 }
 0xe89   :  { %v2043_v34 = vmul.f32 %v3523_v62, %v2041_v63  ;;  %v2113_v0 = vpop.permute.xlu1 %2112 }
 0xe8a   :  { %v2115_v2 = vmul.f32 %v3525_v55, %v2113_v0 }
 0xe8b   :  { %2045 = vrot.lane.b32.xlu0 %v2043_v34, %s3595_s23 }
 0xe8c   :  { %2117 = vrot.lane.b32.xlu1 %v2115_v2, %s3595_s23 }
 0xefd   :  { %v2046_v60 = vpop.permute.xlu0 %2045 }
 0xefe   :  { %v4247_v4 = vadd.f32 %v2046_v60, %v2038_v59  ;;  %v2118_v5 = vpop.permute.xlu1 %2117 }
 0xeff   :  { %v4249_v31 = vadd.f32 %v2118_v5, %v2110_v3 }
 0xf00   :  { %3526 = vtanh.f32 %v4247_v4 }
 0xf01   :  { %3528 = vtanh.f32 %v4249_v31 }
 0xf0a   :  { %v3527_v61 = vpop.eup %3526 }
 0xf0b   :  { %v3529_v6 = vpop.eup %3528  ;;  %2051 = vrot.lane.b32.xlu0 %v3527_v61, %s3594_s22 }
 0xf0c   :  { %2123 = vrot.lane.b32.xlu1 %v3529_v6, %s3594_s22 }
 0xf7d   :  { %v2052_v10 = vpop.permute.xlu0 %2051 }
 0xf7e   :  { %v2054_v13 = vmul.f32 %v3523_v62, %v2052_v10  ;;  %v2124_v14 = vpop.permute.xlu1 %2123 }
 0xf7f   :  { %v2126_v15 = vmul.f32 %v3525_v55, %v2124_v14 }
 0xf80   :  { %2132 = vrot.lane.b32.xlu1 %v2054_v13, %s3594_s22 }
 0xf81   :  { %2128 = vrot.lane.b32.xlu0 %v2126_v15, %s3595_s23  ;;  %v2204_v16 = vpack.c.bf16 %v2126_v15, %v2126_v15 }
 0xf85   :  { %2206 = vrot.lane.b32.xlu0 %v2204_v16, %s3595_s23 }
 0xff2   :  { %v2133_v17 = vpop.permute.xlu1 %2132 }
 0xff3   :  { %v2129_v18 = vpop.permute.xlu0 %2128 }
 0xff4   :  { %v2135_v9 = vsel %vm1436_vm3, %v2129_v18, %v2133_v17 }
 0xff5   :  { %v2136_v19 = vpack.c.bf16 %v2135_v9, %v2135_v9 }
 0xff7   :  { %v2207_v20 = vpop.permute.xlu0 %2206  ;;  %3251 = vmatmul.mubr.msk.bf16.vlgmr.msra.gmra.mrb[64].mxu0 %vm1333_vm2, %v2136_v19 }
 0xff8   :  { %3259 = vmatmul.mubr.msk.bf16.vlgmr.msra.gmra.mrb[60].mxu1 %vm1436_vm3, %v2207_v20  ;;  %3275 = vmatpush3.bf16.msra.mxu0 %v4012_v7 }
 0xff9   :  { %3263 = vmatpush3.bf16.msra.mxu1 %v4070_v36  ;;  %3276 = vmatprep.subr.bf16.mxu0 %v3591_v8 }
 0xffa   :  { %3264 = vmatprep.subr.bf16.mxu1 %v3591_v8  ;;  %3270 = vmatprep.mubr.msk.bf16.mxu1 %vm3592_vm1, %v3591_v8 }
 0xffb   :  { %3278 = vmatprep.mubr.msk.bf16.mxu0 %vm3592_vm1, %v3591_v8 }
 0xffc   :  { %3277 = vmatpush3.bf16.msra.mxu0 %v4023_v12 }
 0xffd   :  { %3265 = vmatpush3.bf16.msra.mxu1 %v4076_v51  ;;  %3282 = vmatprep.subr.bf16.mxu0 %v3591_v8 }
 0xffe   :  { %3266 = vmatprep.subr.bf16.mxu1 %v3591_v8 }
0x1001   :  { %3267 = vmatpush3.bf16.msra.mxu1 %v4083_v52 }
0x1002   :  { %3268 = vmatprep.subr.bf16.mxu1 %v3591_v8 }
0x1005   :  { %3269 = vmatpush3.bf16.msra.mxu1 %v4092_v39 }
0x1006   :  { %3294 = vmatprep.subr.bf16.mxu1 %v3591_v8 }
0x10ca   :  { %v2174_v11 = vpop.f32.mrb[64].mxu0 }
0x10cb   :  { %v2175_v22 = vadd.f32 %v4122_v1, %v2174_v11  ;;  %v3252_v24 = vpop.f32.mrb[65].mxu0  ;;  %v2245_v26 = vpop.f32.mrb[60].mxu1 }
0x10cc   :  { %v2251_v27 = vadd.f32 %v2245_v26, %v1400_v21  ;;  %v2177_v28 = vpop.f32.mrb[66].mxu0  ;;  %v3260_v29 = vpop.f32.mrb[61].mxu1 }
0x10cd   :  { %3530 = vtanh.f32 %v2175_v22  ;;  %v3253_v32 = vpop.f32.mrb[67].mxu0  ;;  %v2248_v23 = vpop.f32.mrb[62].mxu1  ;;  %v2839_v41 = vmul.f32 -1.442695, %v2175_v22 }
0x10ce   :  { %3532 = vtanh.f32 %v2251_v27  ;;  %v3261_v35 = vpop.f32.mrb[63].mxu1  ;;  %v2841_v42 = vmul.f32 -1.442695, %v2251_v27 }
0x10cf   :  { %3534 = vpow2.f32 %v2839_v41 }
0x10d0   :  { %3536 = vpow2.f32 %v2841_v42 }
0x10d7   :  { %v3531_v33 = vpop.eup %3530 }
0x10d8   :  { %v3533_v37 = vpop.eup %3532  ;;  %2189 = vrot.lane.b32.xlu1 %v3531_v33, %s3594_s22 }
0x10d9   :  { %2261 = vrot.lane.b32.xlu0 %v3533_v37, %s3594_s22  ;;  %v3535_v43 = vpop.eup %3534 }
0x10da   :  { %v3537_v44 = vpop.eup %3536  ;;  %v2183_v45 = vadd.f32 1.0, %v3535_v43 }
0x10db   :  { %v2255_v46 = vadd.f32 1.0, %v3537_v44 }
0x10dc   :  { %3538 = vrcp.f32 %v2183_v45 }
0x10dd   :  { %3540 = vrcp.f32 %v2255_v46 }
0x10e6   :  { %v3539_v47 = vpop.eup %3538 }
0x10e7   :  { %v3541_v49 = vpop.eup %3540  ;;  %v2187_v54 = vmul.f32 %v3539_v47, %v4247_v4 }
0x10e8   :  { %v2259_v57 = vmul.f32 %v3541_v49, %v4249_v31 }
0x114a   :  { %v2190_v48 = vpop.permute.xlu1 %2189 }
0x114b   :  { %v2192_v50 = vmul.f32 %v3539_v47, %v2190_v48  ;;  %v2262_v25 = vpop.permute.xlu0 %2261 }
0x114c   :  { %v2264_v53 = vmul.f32 %v3541_v49, %v2262_v25 }
0x114d   :  { %2194 = vrot.lane.b32.xlu1 %v2192_v50, %s3595_s23 }
0x114e   :  { %2266 = vrot.lane.b32.xlu0 %v2264_v53, %s3595_s23 }
0x11bf   :  { %v2195_v56 = vpop.permute.xlu1 %2194 }
0x11c0   :  { %v4286_v58 = vadd.f32 %v2195_v56, %v2187_v54  ;;  %v2267_v62 = vpop.permute.xlu0 %2266 }
0x11c1   :  { %v4288_v63 = vadd.f32 %v2267_v62, %v2259_v57  ;;  %v3590_v62 = vld [vmem:[%s4385_s6] ss:$0 sm:$0xff] }
0x11c2   :  { %3542 = vtanh.f32 %v4286_v58 }
0x11c3   :  { %3544 = vtanh.f32 %v4288_v63 }
0x11cc   :  { %v3543_v55 = vpop.eup %3542 }
0x11cd   :  { %v3545_v34 = vpop.eup %3544  ;;  %2200 = vrot.lane.b32.xlu1 %v3543_v55, %s3594_s22 }
0x11ce   :  { %2272 = vrot.lane.b32.xlu0 %v3545_v34, %s3594_s22 }
0x123f   :  { %v2201_v0 = vpop.permute.xlu1 %2200 }
0x1240   :  { %v2203_v2 = vmul.f32 %v3539_v47, %v2201_v0  ;;  %v2273_v59 = vpop.permute.xlu0 %2272 }
0x1241   :  { %v2275_v60 = vmul.f32 %v3541_v49, %v2273_v59 }
0x1242   :  { %2281 = vrot.lane.b32.xlu0 %v2203_v2, %s3594_s22 }
0x1243   :  { %2277 = vrot.lane.b32.xlu1 %v2275_v60, %s3595_s23  ;;  %v2353_v3 = vpack.c.bf16 %v2275_v60, %v2275_v60 }
0x1247   :  { %2355 = vrot.lane.b32.xlu1 %v2353_v3, %s3595_s23 }
0x12b4   :  { %v2282_v4 = vpop.permute.xlu0 %2281 }
0x12b5   :  { %v2278_v5 = vpop.permute.xlu1 %2277 }
0x12b6   :  { %v2284_v31 = vsel %vm1436_vm3, %v2278_v5, %v2282_v4 }
0x12b7   :  { %v2285_v61 = vpack.c.bf16 %v2284_v31, %v2284_v31 }
0x12b9   :  { %3271 = vmatmul.mubr.msk.bf16.vlgmr.msra.gmra.mrb[64].mxu1 %vm1333_vm2, %v2285_v61  ;;  %v2356_v6 = vpop.permute.xlu1 %2355 }
0x12ba   :  { %3279 = vmatmul.mubr.msk.bf16.vlgmr.msra.gmra.mrb[68].mxu0 %vm1436_vm3, %v2356_v6  ;;  %3295 = vmatpush3.bf16.msra.mxu1 %v4012_v7  ;;  %v1405_v7 = vadd.f32 %v4055_v38, %v4045_v30 }
0x12bb   :  { %3283 = vmatpush3.bf16.msra.mxu0 %v4070_v36  ;;  %3296 = vmatprep.subr.bf16.mxu1 %v3591_v8 }
0x12bc   :  { %3284 = vmatprep.subr.bf16.mxu0 %v3591_v8  ;;  %3290 = vmatprep.mubr.msk.bf16.mxu0 %vm3592_vm1, %v3591_v8 }
0x12bd   :  { %3298 = vmatprep.mubr.msk.bf16.mxu1 %vm3592_vm1, %v3591_v8 }
0x12be   :  { %3297 = vmatpush3.bf16.msra.mxu1 %v4023_v12 }
0x12bf   :  { %3285 = vmatpush3.bf16.msra.mxu0 %v4076_v51  ;;  %3302 = vmatprep.subr.bf16.mxu1 %v3591_v8 }
0x12c0   :  { %3286 = vmatprep.subr.bf16.mxu0 %v3591_v8 }
0x12c3   :  { %3287 = vmatpush3.bf16.msra.mxu0 %v4083_v52 }
0x12c4   :  { %3288 = vmatprep.subr.bf16.mxu0 %v3591_v8 }
0x12c7   :  { %3289 = vmatpush3.bf16.msra.mxu0 %v4092_v39 }
0x138c   :  { %v2323_v10 = vpop.f32.mrb[64].mxu1 }
0x138d   :  { %v2324_v13 = vadd.f32 %v4122_v1, %v2323_v10  ;;  %v3272_v14 = vpop.f32.mrb[65].mxu1  ;;  %v2394_v12 = vpop.f32.mrb[68].mxu0 }
0x138e   :  { %v2400_v15 = vadd.f32 %v2394_v12, %v1405_v7  ;;  %v2326_v16 = vpop.f32.mrb[66].mxu1  ;;  %v3280_v17 = vpop.f32.mrb[69].mxu0 }
0x138f   :  { %3546 = vtanh.f32 %v2324_v13  ;;  %v3273_v18 = vpop.f32.mrb[67].mxu1  ;;  %v2397_v9 = vpop.f32.mrb[70].mxu0  ;;  %v2843_v30 = vmul.f32 -1.442695, %v2324_v13 }
0x1390   :  { %3548 = vtanh.f32 %v2400_v15  ;;  %v3281_v19 = vpop.f32.mrb[71].mxu0  ;;  %v2845_v38 = vmul.f32 -1.442695, %v2400_v15 }
0x1391   :  { %3550 = vpow2.f32 %v2843_v30 }
0x1392   :  { %3552 = vpow2.f32 %v2845_v38 }
0x1399   :  { %v3547_v20 = vpop.eup %3546 }
0x139a   :  { %v3549_v21 = vpop.eup %3548  ;;  %2338 = vrot.lane.b32.xlu0 %v3547_v20, %s3594_s22 }
0x139b   :  { %2410 = vrot.lane.b32.xlu1 %v3549_v21, %s3594_s22  ;;  %v3551_v11 = vpop.eup %3550 }
0x139c   :  { %v3553_v22 = vpop.eup %3552  ;;  %v2332_v24 = vadd.f32 1.0, %v3551_v11 }
0x139d   :  { %v2404_v26 = vadd.f32 1.0, %v3553_v22 }
0x139e   :  { %3554 = vrcp.f32 %v2332_v24 }
0x139f   :  { %3556 = vrcp.f32 %v2404_v26 }
0x13a8   :  { %v3555_v27 = vpop.eup %3554 }
0x13a9   :  { %v3557_v29 = vpop.eup %3556  ;;  %v2336_v33 = vmul.f32 %v3555_v27, %v4286_v58 }
0x13aa   :  { %v2408_v41 = vmul.f32 %v3557_v29, %v4288_v63 }
0x140c   :  { %v2339_v28 = vpop.permute.xlu0 %2338 }
0x140d   :  { %v2341_v32 = vmul.f32 %v3555_v27, %v2339_v28  ;;  %v2411_v23 = vpop.permute.xlu1 %2410 }
0x140e   :  { %v2413_v35 = vmul.f32 %v3557_v29, %v2411_v23 }
0x140f   :  { %2343 = vrot.lane.b32.xlu0 %v2341_v32, %s3595_s23 }
0x1410   :  { %2415 = vrot.lane.b32.xlu1 %v2413_v35, %s3595_s23 }
0x1481   :  { %v2344_v37 = vpop.permute.xlu0 %2343 }
0x1482   :  { %v4324_v42 = vadd.f32 %v2344_v37, %v2336_v33  ;;  %v2416_v43 = vpop.permute.xlu1 %2415 }
0x1483   :  { %v4326_v44 = vadd.f32 %v2416_v43, %v2408_v41 }
0x1484   :  { %3558 = vtanh.f32 %v4324_v42 }
0x1485   :  { %3560 = vtanh.f32 %v4326_v44 }
0x148e   :  { %v3559_v45 = vpop.eup %3558 }
0x148f   :  { %v3561_v46 = vpop.eup %3560  ;;  %2349 = vrot.lane.b32.xlu0 %v3559_v45, %s3594_s22 }
0x1490   :  { %2421 = vrot.lane.b32.xlu1 %v3561_v46, %s3594_s22 }
0x1501   :  { %v2350_v47 = vpop.permute.xlu0 %2349 }
0x1502   :  { %v2352_v48 = vmul.f32 %v3555_v27, %v2350_v47  ;;  %v2422_v49 = vpop.permute.xlu1 %2421 }
0x1503   :  { %v2424_v50 = vmul.f32 %v3557_v29, %v2422_v49 }
0x1504   :  { %2430 = vrot.lane.b32.xlu1 %v2352_v48, %s3594_s22 }
0x1505   :  { %2426 = vrot.lane.b32.xlu0 %v2424_v50, %s3595_s23  ;;  %v2502_v25 = vpack.c.bf16 %v2424_v50, %v2424_v50 }
0x1509   :  { %2504 = vrot.lane.b32.xlu0 %v2502_v25, %s3595_s23 }
0x1576   :  { %v2431_v53 = vpop.permute.xlu1 %2430 }
0x1577   :  { %v2427_v54 = vpop.permute.xlu0 %2426 }
0x1578   :  { %v2433_v56 = vsel %vm1436_vm3, %v2427_v54, %v2431_v53  ;;  %v16_v53 = vstv %s4389_s10 }
0x1579   :  { %v2434_v57 = vpack.c.bf16 %v2433_v56, %v2433_v56  ;;  %17 = vst [vmem:[#allocation2] sm:$0x1] %v16_v53 }
0x157b   :  { %v2505_v58 = vpop.permute.xlu0 %2504  ;;  %3291 = vmatmul.mubr.msk.bf16.vlgmr.msra.gmra.mrb[72].mxu0 %vm1333_vm2, %v2434_v57 }
0x157c   :  { %3299 = vmatmul.mubr.msk.bf16.vlgmr.msra.gmra.mrb[68].mxu1 %vm1436_vm3, %v2505_v58 }
0x157d   :  { %3303 = vmatpush3.bf16.msra.mxu1 %v4070_v36  ;;  %3310 = vmatprep.mubr.msk.bf16.mxu1 %vm3592_vm1, %v3591_v8  ;;  %v1408_v36 = vadd.f32 %v3590_v62, %v4059_v40 }
0x157e   :  { %3304 = vmatprep.subr.bf16.mxu1 %v3591_v8 }
0x1581   :  { %3305 = vmatpush3.bf16.msra.mxu1 %v4076_v51 }
0x1582   :  { %3306 = vmatprep.subr.bf16.mxu1 %v3591_v8 }
0x1585   :  { %3307 = vmatpush3.bf16.msra.mxu1 %v4083_v52 }
0x1586   :  { %3308 = vmatprep.subr.bf16.mxu1 %v3591_v8 }
0x1589   :  { %3309 = vmatpush3.bf16.msra.mxu1 %v4092_v39 }
0x164e   :  { %v2472_v63 = vpop.f32.mrb[72].mxu0 }
0x164f   :  { %v2473_v55 = vadd.f32 %v4122_v1, %v2472_v63  ;;  %v3292_v34 = vpop.f32.mrb[73].mxu0  ;;  %v2543_v0 = vpop.f32.mrb[68].mxu1  ;;  %v2853_v63 = vld [vmem:[#allocation2] ss:$0 sm:$0xff] }
0x1650   :  { %v2549_v51 = vadd.f32 %v2543_v0, %v1408_v36  ;;  %v2475_v2 = vpop.f32.mrb[74].mxu0  ;;  %v3300_v59 = vpop.f32.mrb[69].mxu1 }
0x1651   :  { %3562 = vtanh.f32 %v2473_v55  ;;  %v3293_v52 = vpop.f32.mrb[75].mxu0  ;;  %v2546_v60 = vpop.f32.mrb[70].mxu1  ;;  %v2847_v40 = vmul.f32 -1.442695, %v2473_v55 }
0x1652   :  { %3564 = vtanh.f32 %v2549_v51  ;;  %v3301_v8 = vpop.f32.mrb[71].mxu1  ;;  %v2849_v4 = vmul.f32 -1.442695, %v2549_v51 }
0x1653   :  { %3566 = vpow2.f32 %v2847_v40 }
0x1654   :  { %3568 = vpow2.f32 %v2849_v4 }
0x165b   :  { %v3563_v39 = vpop.eup %3562 }
0x165c   :  { %v3565_v3 = vpop.eup %3564  ;;  %2487 = vrot.lane.b32.xlu1 %v3563_v39, %s3594_s22 }
0x165d   :  { %2559 = vrot.lane.b32.xlu0 %v3565_v3, %s3594_s22  ;;  %v3567_v5 = vpop.eup %3566 }
0x165e   :  { %v3569_v31 = vpop.eup %3568  ;;  %v2481_v61 = vadd.f32 1.0, %v3567_v5 }
0x165f   :  { %v2553_v6 = vadd.f32 1.0, %v3569_v31 }
0x1660   :  { %3570 = vrcp.f32 %v2481_v61 }
0x1661   :  { %3572 = vrcp.f32 %v2553_v6 }
0x166a   :  { %v3571_v7 = vpop.eup %3570 }
0x166b   :  { %v3573_v13 = vpop.eup %3572  ;;  %v2485_v16 = vmul.f32 %v3571_v7, %v4324_v42 }
0x166c   :  { %v2557_v18 = vmul.f32 %v3573_v13, %v4326_v44 }
0x16ce   :  { %v2488_v10 = vpop.permute.xlu1 %2487 }
0x16cf   :  { %v2490_v14 = vmul.f32 %v3571_v7, %v2488_v10  ;;  %v2560_v12 = vpop.permute.xlu0 %2559 }
0x16d0   :  { %v2562_v15 = vmul.f32 %v3573_v13, %v2560_v12 }
0x16d1   :  { %2492 = vrot.lane.b32.xlu1 %v2490_v14, %s3595_s23 }
0x16d2   :  { %2564 = vrot.lane.b32.xlu0 %v2562_v15, %s3595_s23 }
0x1743   :  { %v2493_v17 = vpop.permute.xlu1 %2492 }
0x1744   :  { %v2495_v9 = vadd.f32 %v2493_v17, %v2485_v16  ;;  %v2565_v19 = vpop.permute.xlu0 %2564 }
0x1745   :  { %v2567_v20 = vadd.f32 %v2565_v19, %v2557_v18 }
0x1746   :  { %3574 = vtanh.f32 %v2495_v9 }
0x1747   :  { %3576 = vtanh.f32 %v2567_v20 }
0x1750   :  { %v3575_v21 = vpop.eup %3574 }
0x1751   :  { %v3577_v30 = vpop.eup %3576  ;;  %2498 = vrot.lane.b32.xlu1 %v3575_v21, %s3594_s22 }
0x1752   :  { %2570 = vrot.lane.b32.xlu0 %v3577_v30, %s3594_s22 }
0x17c3   :  { %v2499_v38 = vpop.permute.xlu1 %2498 }
0x17c4   :  { %v2501_v11 = vmul.f32 %v3571_v7, %v2499_v38  ;;  %v2571_v22 = vpop.permute.xlu0 %2570 }
0x17c5   :  { %v2573_v24 = vmul.f32 %v3573_v13, %v2571_v22 }
0x17c6   :  { %2579 = vrot.lane.b32.xlu0 %v2501_v11, %s3594_s22 }
0x17c7   :  { %2575 = vrot.lane.b32.xlu1 %v2573_v24, %s3595_s23 }
0x1838   :  { %v2580_v26 = vpop.permute.xlu0 %2579 }
0x1839   :  { %v2576_v27 = vpop.permute.xlu1 %2575 }
0x183a   :  { %v2582_v28 = vsel %vm1436_vm3, %v2576_v27, %v2580_v26 }
0x183b   :  { %v2583_v29 = vpack.c.bf16 %v2582_v28, %v2582_v28 }
0x183d   :  { %3311 = vmatmul.mubr.msk.bf16.vlgmr.msra.gmra.mrb[72].mxu1 %vm1333_vm2, %v2583_v29 }
0x1910   :  { %v2621_v32 = vpop.f32.mrb[72].mxu1 }
0x1911   :  { %v2622_v23 = vadd.f32 %v4122_v1, %v2621_v32  ;;  %v3312_v35 = vpop.f32.mrb[73].mxu1  ;;  %v2852_v1 = vld [vmem:[%s4388_s9] ss:$0 sm:$0xff] }
0x1912   :  { %v2624_v33 = vpop.f32.mrb[74].mxu1 }
0x1913   :  { %3578 = vtanh.f32 %v2622_v23  ;;  %v3313_v37 = vpop.f32.mrb[75].mxu1  ;;  %v2851_v42 = vmul.f32 -1.442695, %v2622_v23 }
0x1915   :  { %3580 = vpow2.f32 %v2851_v42 }
0x191d   :  { %v3579_v41 = vpop.eup %3578 }
0x191e   :  { %2636 = vrot.lane.b32.xlu1 %v3579_v41, %s3594_s22 }
0x191f   :  { %v3581_v43 = vpop.eup %3580 }
0x1920   :  { %v2630_v44 = vadd.f32 1.0, %v3581_v43 }
0x1922   :  { %3582 = vrcp.f32 %v2630_v44 }
0x192c   :  { %v3583_v45 = vpop.eup %3582 }
0x192d   :  { %v2634_v48 = vmul.f32 %v3583_v45, %v2495_v9 }
0x1990   :  { %v2637_v46 = vpop.permute.xlu1 %2636 }
0x1991   :  { %v2639_v47 = vmul.f32 %v3583_v45, %v2637_v46 }
0x1993   :  { %2641 = vrot.lane.b32.xlu0 %v2639_v47, %s3595_s23 }
0x1997   :  { %2657 = vrot.lane.b32.xlu0 %v2852_v1, %s3596_s15 }
0x1a05   :  { %v2642_v49 = vpop.permute.xlu0 %2641 }
0x1a06   :  { %v2644_v50 = vadd.f32 %v2642_v49, %v2634_v48 }
0x1a08   :  { %3584 = vtanh.f32 %v2644_v50 }
0x1a09   :  { %v2658_v56 = vpop.permute.xlu0 %2657 }
0x1a12   :  { %v3585_v25 = vpop.eup %3584 }
0x1a13   :  { %2647 = vrot.lane.b32.xlu1 %v3585_v25, %s3594_s22 }
0x1a85   :  { %v2648_v54 = vpop.permute.xlu1 %2647 }
0x1a86   :  { %v2650_v57 = vmul.f32 %v3583_v45, %v2648_v54 }
0x1a88   :  { %v2660_v58 = vmul.f32 %v2658_v56, %v2650_v57 }
0x1a8a   :  { %2662 = vrot.lane.b32.xlu1 %v2660_v58, %s3595_s23 }
0x1afc   :  { %v2663_v62 = vpop.permute.xlu1 %2662 }
0x1afd   :  { %v2665_v36 = vsel %vm1436_vm3, %v2663_v62, 0.0 }
0x1afe   :  { %2666 = vadd.xlane.f32.xlu0 %v2665_v36 }
0x1b8b   :  { %v2667_v55 = vpop.xlane.xlu0 %2666 }
0x1b8c   :  { %v2675_v34 = vadd.f32 %v2853_v63, %v2667_v55 }
0x1b8e   :  { %v2854_v0 = vmul.f32 -1.442695, %v2675_v34 }
0x1b90   :  { %3586 = vpow2.f32 %v2854_v0 }
0x1b9a   :  { %v3587_v51 = vpop.eup %3586 }
0x1b9b   :  { %v2679_v2 = vadd.f32 1.0, %v3587_v51 }
0x1b9d   :  { %3588 = vrcp.f32 %v2679_v2 }
0x1ba7   :  { %v3589_v59 = vpop.eup %3588 }
0x1ba8   :  { %2683 = vst.msk [vmem:[%s4390_s11] sm:$0x3] %vm2682_vm4, %v3589_v59 }

</bundles_post_ra>
